<compile_context>
chip_gen: v5e
topology: v5e:2x2
jax: 0.10.0
libtpu: 0.0.40
codegen_flags: <defaults>
</compile_context>

<pallas_src>
import functools

import jax
import jax.numpy as jnp
import numpy as np
from jax.experimental import pallas as pl
from jax.experimental.pallas import tpu as pltpu

NB_CLASSES = 2
HEAD_OUT = NB_CLASSES + 8          # classes + 8 box params
GRID_X = 16
GRID_Y = 16
IN_CHANNELS = 7                    # per-point features
IN_CHANNELS_PAD = 8                # zero-padded channel count (sublane multiple)
FEAT_CHANNELS = 32                 # DenseBlock output channels (synthetic cfg)


def _shift_rows(x, d):
    """Return y with y[r] = x[r + d] (circular); wrapped rows are masked by caller."""
    if d == 0:
        return x
    n = x.shape[0]
    if d > 0:
        return jnp.concatenate([x[d:, :], x[:d, :]], axis=0)
    return jnp.concatenate([x[n + d:, :], x[:n + d, :]], axis=0)


def _fused_kernel(pillars_ref,                    # VMEM (N*P, Cin_pad), point-major
                  rows_ref,                       # VMEM (1, P) int32 flat cell ids
                  w1_ref, b1_ref, w2_ref, b2_ref,
                  wc_ref, bc_ref, wh_ref, bh_ref,
                  out_ref,                        # VMEM (HEAD_OUT, H*W), lane-dense
                  *, n_pillars, n_points):
    C = FEAT_CHANNELS
    H, W = GRID_X, GRID_Y
    HW = H * W
    P = n_pillars

    # ---- pillar feature extraction: pointwise MLP (MXU + VPU) -------------------
    x = pillars_ref[...]                                                # (N*P, 8)
    h = jnp.dot(x, w1_ref[...], preferred_element_type=jnp.float32) + b1_ref[...]
    h = jnp.maximum(h, 0.0)
    h = jnp.dot(h, w2_ref[...], preferred_element_type=jnp.float32) + b2_ref[...]
    h = jnp.maximum(h, 0.0)                                             # (N*P, C)

    # ---- max over points (row layout n*P + p): N-1 sublane-aligned VPU maxima ---
    feat = h[0:P, :]
    for n in range(1, n_points):
        feat = jnp.maximum(feat, h[n * P:(n + 1) * P, :])               # (P, C)

    # ---- scatter into the flat BEV grid as ONE one-hot MXU matmul ---------------
    # rows_ref holds the flat cell id per pillar; shadowed duplicates were
    # redirected to the sentinel HW in the wrapper (=> last-write-wins).
    rows = rows_ref[...]                                                # (1, P)
    cell = jax.lax.broadcasted_iota(jnp.int32, (HW, P), 0)
    onehot = jnp.where(cell == rows, 1.0, 0.0).astype(jnp.float32)      # (HW, P)
    g = jnp.dot(onehot, feat, preferred_element_type=jnp.float32)       # (HW, C)

    # ---- 3x3 "same" conv + ReLU: 9 shifted/masked (HW,C)@(C,C) MXU matmuls ------
    hh = jax.lax.broadcasted_iota(jnp.int32, (H, W, C), 0).reshape(HW, C)
    ww = jax.lax.broadcasted_iota(jnp.int32, (H, W, C), 1).reshape(HW, C)
    row_ok = {-1: hh >= 1, 1: hh < H - 1}
    col_ok = {-1: ww >= 1, 1: ww < W - 1}

    wc = wc_ref[...]                                                    # (9*C, C)
    conv = None
    for dy in (-1, 0, 1):
        for dx in (-1, 0, 1):
            tap = g if (dy == 0 and dx == 0) else _shift_rows(g, dy * W + dx)
            if dy != 0 and dx != 0:
                mask = row_ok[dy] & col_ok[dx]
            elif dy != 0:
                mask = row_ok[dy]
            elif dx != 0:
                mask = col_ok[dx]
            else:
                mask = None
            if mask is not None:
                tap = jnp.where(mask, tap, 0.0)
            t = (dy + 1) * 3 + (dx + 1)                                 # weight tap index
            part = jnp.dot(tap, wc[t * C:(t + 1) * C, :],
                           preferred_element_type=jnp.float32)
            conv = part if conv is None else conv + part
    conv = jnp.maximum(conv + bc_ref[...], 0.0)                         # (HW, C)

    # ---- 1x1 head, written lane-dense as (HEAD_OUT, HW) i.e. already "NC(HW)" ---
    y = jnp.dot(conv, wh_ref[...], preferred_element_type=jnp.float32) + bh_ref[...]
    out_ref[...] = y.T                                                  # (HEAD_OUT, HW)


def pcloud_to_box3d_forward(pillars_nchw, indices, params):
    B, Cin, P, N = pillars_nchw.shape
    C = FEAT_CHANNELS
    HW = GRID_X * GRID_Y

    # point-major channels-last layout; zero-pad Cin 7 -> 8 (bit-exact)
    x = jnp.transpose(pillars_nchw, (0, 3, 2, 1)).reshape(B, N * P, Cin)
    x = jnp.pad(x, ((0, 0), (0, 0), (0, IN_CHANNELS_PAD - Cin)))
    w1p = jnp.pad(params["w1"], ((0, IN_CHANNELS_PAD - Cin), (0, 0)))
    wc2 = params["wc"].reshape(9 * C, C)                 # (dy, dx, cin) row order

    # flat BEV row per pillar; duplicates resolved last-write-wins by pointing
    # shadowed pillars at the out-of-range sentinel row HW.
    rows = (indices[..., 0] * GRID_Y + indices[..., 1]).astype(jnp.int32)   # (B, P)
    later = jnp.arange(P)[None, :] > jnp.arange(P)[:, None]                 # (P, P)
    shadowed = jnp.any((rows[:, :, None] == rows[:, None, :]) & later[None],
                       axis=-1)                                              # (B, P)
    rows = jnp.where(shadowed, HW, rows).astype(jnp.int32).reshape(B, 1, P)

    kernel = functools.partial(_fused_kernel, n_pillars=P, n_points=N)
    flops = 2 * B * (N * P * IN_CHANNELS_PAD * C + N * P * C * C
                     + HW * P * C + 9 * HW * C * C + HW * C * HEAD_OUT)
    bytes_accessed = 4 * (x.size + rows.size + w1p.size + params["w2"].size
                          + wc2.size + params["wh"].size
                          + B * HW * HEAD_OUT + 3 * C + HEAD_OUT)

    out_flat = pl.pallas_call(
        kernel,
        out_shape=jax.ShapeDtypeStruct((B, HEAD_OUT, HW), jnp.float32),
        grid_spec=pltpu.PrefetchScalarGridSpec(
            num_scalar_prefetch=0,
            grid=(B,),
            in_specs=[
                pl.BlockSpec((None, N * P, IN_CHANNELS_PAD), lambda b: (b, 0, 0)),
                pl.BlockSpec((None, 1, P), lambda b: (b, 0, 0)),
                pl.BlockSpec((IN_CHANNELS_PAD, C), lambda b: (0, 0)),
                pl.BlockSpec((1, C), lambda b: (0, 0)),
                pl.BlockSpec((C, C), lambda b: (0, 0)),
                pl.BlockSpec((1, C), lambda b: (0, 0)),
                pl.BlockSpec((9 * C, C), lambda b: (0, 0)),
                pl.BlockSpec((1, C), lambda b: (0, 0)),
                pl.BlockSpec((C, HEAD_OUT), lambda b: (0, 0)),
                pl.BlockSpec((1, HEAD_OUT), lambda b: (0, 0)),
            ],
            out_specs=pl.BlockSpec((None, HEAD_OUT, HW), lambda b: (b, 0, 0)),
        ),
        compiler_params=pltpu.CompilerParams(dimension_semantics=("parallel",)),
        cost_estimate=pl.CostEstimate(flops=flops, transcendentals=0,
                                      bytes_accessed=bytes_accessed),
    )(x, rows, w1p, params["b1"], params["w2"], params["b2"],
      wc2, params["bc"], params["wh"], params["bh"])

    return out_flat.reshape(B, HEAD_OUT, GRID_X, GRID_Y)                # NCHW like torch


# --------------------------------------------------------------------------------
# Pure-JAX reference (correctness check)
# --------------------------------------------------------------------------------
def reference_forward(pillars_nchw, indices, params):
    hp = jax.lax.Precision.HIGHEST
    B, Cin, P, N = pillars_nchw.shape
    x = jnp.transpose(pillars_nchw, (0, 2, 3, 1)).reshape(B, P * N, Cin)
    h = jax.nn.relu(jnp.dot(x, params["w1"], precision=hp) + params["b1"])
    h = jax.nn.relu(jnp.dot(h, params["w2"], precision=hp) + params["b2"])
    feats = jnp.max(h.reshape(B, P, N, -1), axis=2)
    C = feats.shape[-1]

    def scatter_one(f, idx):
        g = jnp.zeros((GRID_X, GRID_Y, C), jnp.float32)
        return g.at[idx[:, 0], idx[:, 1], :].set(f)

    grid = jax.vmap(scatter_one)(feats, indices)
    g = jax.lax.conv_general_dilated(grid, params["wc"], (1, 1), "SAME",
                                     dimension_numbers=("NHWC", "HWIO", "NHWC"),
                                     precision=hp)
    g = jax.nn.relu(g + params["bc"].reshape(1, 1, 1, -1))
    out = jnp.dot(g, params["wh"], precision=hp) + params["bh"].reshape(1, 1, 1, -1)
    return jnp.transpose(out, (0, 3, 1, 2))


# --------------------------------------------------------------------------------
# Deterministic parameter init (synthetic, no checkpoint)
# --------------------------------------------------------------------------------
def init_params(key):
    ks = jax.random.split(key, 8)

    def w(k, shape, fan_in):
        return (jax.random.normal(k, shape, jnp.float32) / np.sqrt(fan_in)).astype(jnp.float32)

    return {
        "w1": w(ks[0], (IN_CHANNELS, FEAT_CHANNELS), IN_CHANNELS),
        "b1": 0.1 * jax.random.normal(ks[1], (1, FEAT_CHANNELS), jnp.float32),
        "w2": w(ks[2], (FEAT_CHANNELS, FEAT_CHANNELS), FEAT_CHANNELS),
        "b2": 0.1 * jax.random.normal(ks[3], (1, FEAT_CHANNELS), jnp.float32),
        "wc": w(ks[4], (3, 3, FEAT_CHANNELS, FEAT_CHANNELS), 9 * FEAT_CHANNELS),
        "bc": 0.1 * jax.random.normal(ks[5], (1, FEAT_CHANNELS), jnp.float32),
        "wh": w(ks[6], (FEAT_CHANNELS, HEAD_OUT), FEAT_CHANNELS),
        "bh": 0.1 * jax.random.normal(ks[7], (1, HEAD_OUT), jnp.float32),
    }


if __name__ == "__main__":
    key = jax.random.PRNGKey(0)
    kp, kx, ki = jax.random.split(key, 3)
    params = init_params(kp)

    B, P, N = 2, 64, 8
    pillars = jax.random.normal(kx, (B, IN_CHANNELS, P, N), jnp.float32)

    # deterministic, duplicate-free pillar -> (x, y) grid-cell indices per batch
    cells = jax.vmap(lambda k: jax.random.permutation(k, GRID_X * GRID_Y)[:P])(
        jax.random.split(ki, B))
    indices = jnp.stack([cells // GRID_Y, cells % GRID_Y], axis=-1).astype(jnp.int32)

    out = jax.jit(pcloud_to_box3d_forward)(pillars, indices, params)
    out = jax.block_until_ready(out)
    assert out.shape == (B, HEAD_OUT, GRID_X, GRID_Y)

    ref = reference_forward(pillars, indices, params)
    np.testing.assert_allclose(np.asarray(out), np.asarray(ref), rtol=1e-2, atol=1e-2)

    print("KERNEL_OK")
</pallas_src>

<mosaic_0001>
module attributes {stable_mosaic.version = 11 : i64} {
  func.func @_fused_kernel(%arg0: i32, %arg1: memref<1x512x8xf32, #tpu.memory_space<vmem>>, %arg2: memref<1x1x64xi32, #tpu.memory_space<vmem>>, %arg3: memref<8x32xf32, #tpu.memory_space<vmem>>, %arg4: memref<1x32xf32, #tpu.memory_space<vmem>>, %arg5: memref<32x32xf32, #tpu.memory_space<vmem>>, %arg6: memref<1x32xf32, #tpu.memory_space<vmem>>, %arg7: memref<288x32xf32, #tpu.memory_space<vmem>>, %arg8: memref<1x32xf32, #tpu.memory_space<vmem>>, %arg9: memref<32x10xf32, #tpu.memory_space<vmem>>, %arg10: memref<1x10xf32, #tpu.memory_space<vmem>>, %arg11: memref<1x10x256xf32, #tpu.memory_space<vmem>>) attributes {dimension_semantics = [#tpu.dimension_semantics<parallel>], iteration_bounds = array<i64: 2>, scalar_prefetch = 0 : i64, scratch_operands = 0 : i64, tpu.core_type = #tpu.core_type<tc>, window_params = [{transform_indices = @transform_0, window_bounds = array<i64: 1, 512, 8>}, {transform_indices = @transform_1, window_bounds = array<i64: 1, 1, 64>}, {pipeline_mode = #tpu.pipeline_mode<synchronous>, transform_indices = @transform_2, window_bounds = array<i64: 8, 32>}, {pipeline_mode = #tpu.pipeline_mode<synchronous>, transform_indices = @transform_3, window_bounds = array<i64: 1, 32>}, {pipeline_mode = #tpu.pipeline_mode<synchronous>, transform_indices = @transform_4, window_bounds = array<i64: 32, 32>}, {pipeline_mode = #tpu.pipeline_mode<synchronous>, transform_indices = @transform_5, window_bounds = array<i64: 1, 32>}, {pipeline_mode = #tpu.pipeline_mode<synchronous>, transform_indices = @transform_6, window_bounds = array<i64: 288, 32>}, {pipeline_mode = #tpu.pipeline_mode<synchronous>, transform_indices = @transform_7, window_bounds = array<i64: 1, 32>}, {pipeline_mode = #tpu.pipeline_mode<synchronous>, transform_indices = @transform_8, window_bounds = array<i64: 32, 10>}, {pipeline_mode = #tpu.pipeline_mode<synchronous>, transform_indices = @transform_9, window_bounds = array<i64: 1, 10>}, {transform_indices = @transform_10, window_bounds = array<i64: 1, 10, 256>}]} {
    %c0 = arith.constant 0 : index
    %c0_0 = arith.constant 0 : index
    %c0_1 = arith.constant 0 : index
    %0 = vector.load %arg1[%c0, %c0_0, %c0_1] : memref<1x512x8xf32, #tpu.memory_space<vmem>>, vector<1x512x8xf32>
    %1 = vector.shape_cast %0 : vector<1x512x8xf32> to vector<512x8xf32>
    %c0_2 = arith.constant 0 : index
    %c0_3 = arith.constant 0 : index
    %2 = vector.load %arg3[%c0_2, %c0_3] : memref<8x32xf32, #tpu.memory_space<vmem>>, vector<8x32xf32>
    %cst = arith.constant dense<0.000000e+00> : vector<512x32xf32>
    %3 = tpu.matmul %1, %2, %cst {dimension_numbers = #tpu.dot_dimension_numbers<[1], [0], [0], [1], [0, 0, 1, 1], [], []>} : vector<512x8xf32>, vector<8x32xf32>, vector<512x32xf32> -> vector<512x32xf32>
    %c0_4 = arith.constant 0 : index
    %c0_5 = arith.constant 0 : index
    %4 = vector.load %arg4[%c0_4, %c0_5] : memref<1x32xf32, #tpu.memory_space<vmem>>, vector<1x32xf32>
    %5 = vector.broadcast %4 : vector<1x32xf32> to vector<512x32xf32>
    %6 = arith.addf %3, %5 : vector<512x32xf32>
    %cst_6 = arith.constant 0.000000e+00 : f32
    %7 = vector.broadcast %cst_6 : f32 to vector<512x32xf32>
    %8 = arith.maximumf %6, %7 : vector<512x32xf32>
    %c0_7 = arith.constant 0 : index
    %c0_8 = arith.constant 0 : index
    %9 = vector.load %arg5[%c0_7, %c0_8] : memref<32x32xf32, #tpu.memory_space<vmem>>, vector<32x32xf32>
    %cst_9 = arith.constant dense<0.000000e+00> : vector<512x32xf32>
    %10 = tpu.matmul %8, %9, %cst_9 {dimension_numbers = #tpu.dot_dimension_numbers<[1], [0], [0], [1], [0, 0, 1, 1], [], []>} : vector<512x32xf32>, vector<32x32xf32>, vector<512x32xf32> -> vector<512x32xf32>
    %c0_10 = arith.constant 0 : index
    %c0_11 = arith.constant 0 : index
    %11 = vector.load %arg6[%c0_10, %c0_11] : memref<1x32xf32, #tpu.memory_space<vmem>>, vector<1x32xf32>
    %12 = vector.broadcast %11 : vector<1x32xf32> to vector<512x32xf32>
    %13 = arith.addf %10, %12 : vector<512x32xf32>
    %cst_12 = arith.constant 0.000000e+00 : f32
    %14 = vector.broadcast %cst_12 : f32 to vector<512x32xf32>
    %15 = arith.maximumf %13, %14 : vector<512x32xf32>
    %16 = vector.extract_strided_slice %15 {offsets = [0, 0], sizes = [64, 32], strides = [1, 1]} : vector<512x32xf32> to vector<64x32xf32>
    %17 = vector.extract_strided_slice %15 {offsets = [64, 0], sizes = [64, 32], strides = [1, 1]} : vector<512x32xf32> to vector<64x32xf32>
    %18 = arith.maximumf %16, %17 : vector<64x32xf32>
    %19 = vector.extract_strided_slice %15 {offsets = [128, 0], sizes = [64, 32], strides = [1, 1]} : vector<512x32xf32> to vector<64x32xf32>
    %20 = arith.maximumf %18, %19 : vector<64x32xf32>
    %21 = vector.extract_strided_slice %15 {offsets = [192, 0], sizes = [64, 32], strides = [1, 1]} : vector<512x32xf32> to vector<64x32xf32>
    %22 = arith.maximumf %20, %21 : vector<64x32xf32>
    %23 = vector.extract_strided_slice %15 {offsets = [256, 0], sizes = [64, 32], strides = [1, 1]} : vector<512x32xf32> to vector<64x32xf32>
    %24 = arith.maximumf %22, %23 : vector<64x32xf32>
    %25 = vector.extract_strided_slice %15 {offsets = [320, 0], sizes = [64, 32], strides = [1, 1]} : vector<512x32xf32> to vector<64x32xf32>
    %26 = arith.maximumf %24, %25 : vector<64x32xf32>
    %27 = vector.extract_strided_slice %15 {offsets = [384, 0], sizes = [64, 32], strides = [1, 1]} : vector<512x32xf32> to vector<64x32xf32>
    %28 = arith.maximumf %26, %27 : vector<64x32xf32>
    %29 = vector.extract_strided_slice %15 {offsets = [448, 0], sizes = [64, 32], strides = [1, 1]} : vector<512x32xf32> to vector<64x32xf32>
    %30 = arith.maximumf %28, %29 : vector<64x32xf32>
    %c0_13 = arith.constant 0 : index
    %c0_14 = arith.constant 0 : index
    %c0_15 = arith.constant 0 : index
    %31 = vector.load %arg2[%c0_13, %c0_14, %c0_15] : memref<1x1x64xi32, #tpu.memory_space<vmem>>, vector<1x1x64xi32>
    %32 = vector.shape_cast %31 : vector<1x1x64xi32> to vector<1x64xi32>
    %33 = tpu.iota {dimensions = array<i32: 0>} : vector<256x64xi32>
    %34 = vector.broadcast %32 : vector<1x64xi32> to vector<256x64xi32>
    %35 = arith.cmpi eq, %33, %34 : vector<256x64xi32>
    %cst_16 = arith.constant 1.000000e+00 : f32
    %cst_17 = arith.constant 0.000000e+00 : f32
    %36 = vector.broadcast %cst_16 : f32 to vector<256x64xf32>
    %37 = vector.broadcast %cst_17 : f32 to vector<256x64xf32>
    %38 = arith.select %35, %36, %37 : vector<256x64xi1>, vector<256x64xf32>
    %cst_18 = arith.constant dense<0.000000e+00> : vector<256x32xf32>
    %39 = tpu.matmul %38, %30, %cst_18 {dimension_numbers = #tpu.dot_dimension_numbers<[1], [0], [0], [1], [0, 0, 1, 1], [], []>} : vector<256x64xf32>, vector<64x32xf32>, vector<256x32xf32> -> vector<256x32xf32>
    %40 = tpu.iota {dimensions = array<i32: 0>} : vector<16x16x32xi32>
    %41 = vector.shape_cast %40 : vector<16x16x32xi32> to vector<256x32xi32>
    %42 = tpu.iota {dimensions = array<i32: 1>} : vector<16x16x32xi32>
    %43 = vector.shape_cast %42 : vector<16x16x32xi32> to vector<256x32xi32>
    %c1_i32 = arith.constant 1 : i32
    %44 = vector.broadcast %c1_i32 : i32 to vector<256x32xi32>
    %45 = arith.cmpi sge, %41, %44 : vector<256x32xi32>
    %c15_i32 = arith.constant 15 : i32
    %46 = vector.broadcast %c15_i32 : i32 to vector<256x32xi32>
    %47 = arith.cmpi slt, %41, %46 : vector<256x32xi32>
    %c1_i32_19 = arith.constant 1 : i32
    %48 = vector.broadcast %c1_i32_19 : i32 to vector<256x32xi32>
    %49 = arith.cmpi sge, %43, %48 : vector<256x32xi32>
    %c15_i32_20 = arith.constant 15 : i32
    %50 = vector.broadcast %c15_i32_20 : i32 to vector<256x32xi32>
    %51 = arith.cmpi slt, %43, %50 : vector<256x32xi32>
    %c0_21 = arith.constant 0 : index
    %c0_22 = arith.constant 0 : index
    %52 = vector.load %arg7[%c0_21, %c0_22] : memref<288x32xf32, #tpu.memory_space<vmem>>, vector<288x32xf32>
    %53 = vector.extract_strided_slice %39 {offsets = [239, 0], sizes = [17, 32], strides = [1, 1]} : vector<256x32xf32> to vector<17x32xf32>
    %54 = vector.extract_strided_slice %39 {offsets = [0, 0], sizes = [239, 32], strides = [1, 1]} : vector<256x32xf32> to vector<239x32xf32>
    %55 = tpu.concatenate %53, %54 in 0 : vector<17x32xf32>, vector<239x32xf32> -> vector<256x32xf32>
    %56 = arith.andi %45, %49 : vector<256x32xi1>
    %cst_23 = arith.constant 0.000000e+00 : f32
    %57 = vector.broadcast %cst_23 : f32 to vector<256x32xf32>
    %58 = arith.select %56, %55, %57 : vector<256x32xi1>, vector<256x32xf32>
    %59 = vector.extract_strided_slice %52 {offsets = [0, 0], sizes = [32, 32], strides = [1, 1]} : vector<288x32xf32> to vector<32x32xf32>
    %cst_24 = arith.constant dense<0.000000e+00> : vector<256x32xf32>
    %60 = tpu.matmul %58, %59, %cst_24 {dimension_numbers = #tpu.dot_dimension_numbers<[1], [0], [0], [1], [0, 0, 1, 1], [], []>} : vector<256x32xf32>, vector<32x32xf32>, vector<256x32xf32> -> vector<256x32xf32>
    %61 = vector.extract_strided_slice %39 {offsets = [240, 0], sizes = [16, 32], strides = [1, 1]} : vector<256x32xf32> to vector<16x32xf32>
    %62 = vector.extract_strided_slice %39 {offsets = [0, 0], sizes = [240, 32], strides = [1, 1]} : vector<256x32xf32> to vector<240x32xf32>
    %63 = tpu.concatenate %61, %62 in 0 : vector<16x32xf32>, vector<240x32xf32> -> vector<256x32xf32>
    %cst_25 = arith.constant 0.000000e+00 : f32
    %64 = vector.broadcast %cst_25 : f32 to vector<256x32xf32>
    %65 = arith.select %45, %63, %64 : vector<256x32xi1>, vector<256x32xf32>
    %66 = vector.extract_strided_slice %52 {offsets = [32, 0], sizes = [32, 32], strides = [1, 1]} : vector<288x32xf32> to vector<32x32xf32>
    %cst_26 = arith.constant dense<0.000000e+00> : vector<256x32xf32>
    %67 = tpu.matmul %65, %66, %cst_26 {dimension_numbers = #tpu.dot_dimension_numbers<[1], [0], [0], [1], [0, 0, 1, 1], [], []>} : vector<256x32xf32>, vector<32x32xf32>, vector<256x32xf32> -> vector<256x32xf32>
    %68 = arith.addf %60, %67 : vector<256x32xf32>
    %69 = vector.extract_strided_slice %39 {offsets = [241, 0], sizes = [15, 32], strides = [1, 1]} : vector<256x32xf32> to vector<15x32xf32>
    %70 = vector.extract_strided_slice %39 {offsets = [0, 0], sizes = [241, 32], strides = [1, 1]} : vector<256x32xf32> to vector<241x32xf32>
    %71 = tpu.concatenate %69, %70 in 0 : vector<15x32xf32>, vector<241x32xf32> -> vector<256x32xf32>
    %72 = arith.andi %45, %51 : vector<256x32xi1>
    %cst_27 = arith.constant 0.000000e+00 : f32
    %73 = vector.broadcast %cst_27 : f32 to vector<256x32xf32>
    %74 = arith.select %72, %71, %73 : vector<256x32xi1>, vector<256x32xf32>
    %75 = vector.extract_strided_slice %52 {offsets = [64, 0], sizes = [32, 32], strides = [1, 1]} : vector<288x32xf32> to vector<32x32xf32>
    %cst_28 = arith.constant dense<0.000000e+00> : vector<256x32xf32>
    %76 = tpu.matmul %74, %75, %cst_28 {dimension_numbers = #tpu.dot_dimension_numbers<[1], [0], [0], [1], [0, 0, 1, 1], [], []>} : vector<256x32xf32>, vector<32x32xf32>, vector<256x32xf32> -> vector<256x32xf32>
    %77 = arith.addf %68, %76 : vector<256x32xf32>
    %78 = vector.extract_strided_slice %39 {offsets = [255, 0], sizes = [1, 32], strides = [1, 1]} : vector<256x32xf32> to vector<1x32xf32>
    %79 = vector.extract_strided_slice %39 {offsets = [0, 0], sizes = [255, 32], strides = [1, 1]} : vector<256x32xf32> to vector<255x32xf32>
    %80 = tpu.concatenate %78, %79 in 0 : vector<1x32xf32>, vector<255x32xf32> -> vector<256x32xf32>
    %cst_29 = arith.constant 0.000000e+00 : f32
    %81 = vector.broadcast %cst_29 : f32 to vector<256x32xf32>
    %82 = arith.select %49, %80, %81 : vector<256x32xi1>, vector<256x32xf32>
    %83 = vector.extract_strided_slice %52 {offsets = [96, 0], sizes = [32, 32], strides = [1, 1]} : vector<288x32xf32> to vector<32x32xf32>
    %cst_30 = arith.constant dense<0.000000e+00> : vector<256x32xf32>
    %84 = tpu.matmul %82, %83, %cst_30 {dimension_numbers = #tpu.dot_dimension_numbers<[1], [0], [0], [1], [0, 0, 1, 1], [], []>} : vector<256x32xf32>, vector<32x32xf32>, vector<256x32xf32> -> vector<256x32xf32>
    %85 = arith.addf %77, %84 : vector<256x32xf32>
    %86 = vector.extract_strided_slice %52 {offsets = [128, 0], sizes = [32, 32], strides = [1, 1]} : vector<288x32xf32> to vector<32x32xf32>
    %cst_31 = arith.constant dense<0.000000e+00> : vector<256x32xf32>
    %87 = tpu.matmul %39, %86, %cst_31 {dimension_numbers = #tpu.dot_dimension_numbers<[1], [0], [0], [1], [0, 0, 1, 1], [], []>} : vector<256x32xf32>, vector<32x32xf32>, vector<256x32xf32> -> vector<256x32xf32>
    %88 = arith.addf %85, %87 : vector<256x32xf32>
    %89 = vector.extract_strided_slice %39 {offsets = [1, 0], sizes = [255, 32], strides = [1, 1]} : vector<256x32xf32> to vector<255x32xf32>
    %90 = vector.extract_strided_slice %39 {offsets = [0, 0], sizes = [1, 32], strides = [1, 1]} : vector<256x32xf32> to vector<1x32xf32>
    %91 = tpu.concatenate %89, %90 in 0 : vector<255x32xf32>, vector<1x32xf32> -> vector<256x32xf32>
    %cst_32 = arith.constant 0.000000e+00 : f32
    %92 = vector.broadcast %cst_32 : f32 to vector<256x32xf32>
    %93 = arith.select %51, %91, %92 : vector<256x32xi1>, vector<256x32xf32>
    %94 = vector.extract_strided_slice %52 {offsets = [160, 0], sizes = [32, 32], strides = [1, 1]} : vector<288x32xf32> to vector<32x32xf32>
    %cst_33 = arith.constant dense<0.000000e+00> : vector<256x32xf32>
    %95 = tpu.matmul %93, %94, %cst_33 {dimension_numbers = #tpu.dot_dimension_numbers<[1], [0], [0], [1], [0, 0, 1, 1], [], []>} : vector<256x32xf32>, vector<32x32xf32>, vector<256x32xf32> -> vector<256x32xf32>
    %96 = arith.addf %88, %95 : vector<256x32xf32>
    %97 = vector.extract_strided_slice %39 {offsets = [15, 0], sizes = [241, 32], strides = [1, 1]} : vector<256x32xf32> to vector<241x32xf32>
    %98 = vector.extract_strided_slice %39 {offsets = [0, 0], sizes = [15, 32], strides = [1, 1]} : vector<256x32xf32> to vector<15x32xf32>
    %99 = tpu.concatenate %97, %98 in 0 : vector<241x32xf32>, vector<15x32xf32> -> vector<256x32xf32>
    %100 = arith.andi %47, %49 : vector<256x32xi1>
    %cst_34 = arith.constant 0.000000e+00 : f32
    %101 = vector.broadcast %cst_34 : f32 to vector<256x32xf32>
    %102 = arith.select %100, %99, %101 : vector<256x32xi1>, vector<256x32xf32>
    %103 = vector.extract_strided_slice %52 {offsets = [192, 0], sizes = [32, 32], strides = [1, 1]} : vector<288x32xf32> to vector<32x32xf32>
    %cst_35 = arith.constant dense<0.000000e+00> : vector<256x32xf32>
    %104 = tpu.matmul %102, %103, %cst_35 {dimension_numbers = #tpu.dot_dimension_numbers<[1], [0], [0], [1], [0, 0, 1, 1], [], []>} : vector<256x32xf32>, vector<32x32xf32>, vector<256x32xf32> -> vector<256x32xf32>
    %105 = arith.addf %96, %104 : vector<256x32xf32>
    %106 = vector.extract_strided_slice %39 {offsets = [16, 0], sizes = [240, 32], strides = [1, 1]} : vector<256x32xf32> to vector<240x32xf32>
    %107 = vector.extract_strided_slice %39 {offsets = [0, 0], sizes = [16, 32], strides = [1, 1]} : vector<256x32xf32> to vector<16x32xf32>
    %108 = tpu.concatenate %106, %107 in 0 : vector<240x32xf32>, vector<16x32xf32> -> vector<256x32xf32>
    %cst_36 = arith.constant 0.000000e+00 : f32
    %109 = vector.broadcast %cst_36 : f32 to vector<256x32xf32>
    %110 = arith.select %47, %108, %109 : vector<256x32xi1>, vector<256x32xf32>
    %111 = vector.extract_strided_slice %52 {offsets = [224, 0], sizes = [32, 32], strides = [1, 1]} : vector<288x32xf32> to vector<32x32xf32>
    %cst_37 = arith.constant dense<0.000000e+00> : vector<256x32xf32>
    %112 = tpu.matmul %110, %111, %cst_37 {dimension_numbers = #tpu.dot_dimension_numbers<[1], [0], [0], [1], [0, 0, 1, 1], [], []>} : vector<256x32xf32>, vector<32x32xf32>, vector<256x32xf32> -> vector<256x32xf32>
    %113 = arith.addf %105, %112 : vector<256x32xf32>
    %114 = vector.extract_strided_slice %39 {offsets = [17, 0], sizes = [239, 32], strides = [1, 1]} : vector<256x32xf32> to vector<239x32xf32>
    %115 = vector.extract_strided_slice %39 {offsets = [0, 0], sizes = [17, 32], strides = [1, 1]} : vector<256x32xf32> to vector<17x32xf32>
    %116 = tpu.concatenate %114, %115 in 0 : vector<239x32xf32>, vector<17x32xf32> -> vector<256x32xf32>
    %117 = arith.andi %47, %51 : vector<256x32xi1>
    %cst_38 = arith.constant 0.000000e+00 : f32
    %118 = vector.broadcast %cst_38 : f32 to vector<256x32xf32>
    %119 = arith.select %117, %116, %118 : vector<256x32xi1>, vector<256x32xf32>
    %120 = vector.extract_strided_slice %52 {offsets = [256, 0], sizes = [32, 32], strides = [1, 1]} : vector<288x32xf32> to vector<32x32xf32>
    %cst_39 = arith.constant dense<0.000000e+00> : vector<256x32xf32>
    %121 = tpu.matmul %119, %120, %cst_39 {dimension_numbers = #tpu.dot_dimension_numbers<[1], [0], [0], [1], [0, 0, 1, 1], [], []>} : vector<256x32xf32>, vector<32x32xf32>, vector<256x32xf32> -> vector<256x32xf32>
    %122 = arith.addf %113, %121 : vector<256x32xf32>
    %c0_40 = arith.constant 0 : index
    %c0_41 = arith.constant 0 : index
    %123 = vector.load %arg8[%c0_40, %c0_41] : memref<1x32xf32, #tpu.memory_space<vmem>>, vector<1x32xf32>
    %124 = vector.broadcast %123 : vector<1x32xf32> to vector<256x32xf32>
    %125 = arith.addf %122, %124 : vector<256x32xf32>
    %cst_42 = arith.constant 0.000000e+00 : f32
    %126 = vector.broadcast %cst_42 : f32 to vector<256x32xf32>
    %127 = arith.maximumf %125, %126 : vector<256x32xf32>
    %c0_43 = arith.constant 0 : index
    %c0_44 = arith.constant 0 : index
    %128 = vector.load %arg9[%c0_43, %c0_44] : memref<32x10xf32, #tpu.memory_space<vmem>>, vector<32x10xf32>
    %cst_45 = arith.constant dense<0.000000e+00> : vector<256x10xf32>
    %129 = tpu.matmul %127, %128, %cst_45 {dimension_numbers = #tpu.dot_dimension_numbers<[1], [0], [0], [1], [0, 0, 1, 1], [], []>} : vector<256x32xf32>, vector<32x10xf32>, vector<256x10xf32> -> vector<256x10xf32>
    %c0_46 = arith.constant 0 : index
    %c0_47 = arith.constant 0 : index
    %130 = vector.load %arg10[%c0_46, %c0_47] : memref<1x10xf32, #tpu.memory_space<vmem>>, vector<1x10xf32>
    %131 = vector.broadcast %130 : vector<1x10xf32> to vector<256x10xf32>
    %132 = arith.addf %129, %131 : vector<256x10xf32>
    %133 = tpu.transpose %132, [1, 0] : vector<256x10xf32> -> vector<10x256xf32>
    %c0_48 = arith.constant 0 : index
    %c0_49 = arith.constant 0 : index
    %c0_50 = arith.constant 0 : index
    %134 = vector.load %arg11[%c0_48, %c0_49, %c0_50] : memref<1x10x256xf32, #tpu.memory_space<vmem>>, vector<1x10x256xf32>
    %135 = vector.shape_cast %134 : vector<1x10x256xf32> to vector<10x256xf32>
    %136 = vector.shape_cast %133 : vector<10x256xf32> to vector<1x10x256xf32>
    tpu.vector_store %arg11[%c0_48, %c0_49, %c0_50], %136 {strides = array<i32>} : memref<1x10x256xf32, #tpu.memory_space<vmem>>, vector<1x10x256xf32>,
    return
  }
  func.func @transform_0(%arg0: i32) -> (i32, i32, i32) {
    %c0_i32 = arith.constant 0 : i32
    %c0_i32_0 = arith.constant 0 : i32
    %c0_i32_1 = arith.constant 0 : i32
    return %arg0, %c0_i32, %c0_i32_0 : i32, i32, i32
  }
  func.func @transform_1(%arg0: i32) -> (i32, i32, i32) {
    %c0_i32 = arith.constant 0 : i32
    %c0_i32_0 = arith.constant 0 : i32
    %c0_i32_1 = arith.constant 0 : i32
    return %arg0, %c0_i32, %c0_i32_0 : i32, i32, i32
  }
  func.func @transform_2(%arg0: i32) -> (i32, i32) {
    %c0_i32 = arith.constant 0 : i32
    %c0_i32_0 = arith.constant 0 : i32
    %c0_i32_1 = arith.constant 0 : i32
    return %c0_i32, %c0_i32_0 : i32, i32
  }
  func.func @transform_3(%arg0: i32) -> (i32, i32) {
    %c0_i32 = arith.constant 0 : i32
    %c0_i32_0 = arith.constant 0 : i32
    %c0_i32_1 = arith.constant 0 : i32
    return %c0_i32, %c0_i32_0 : i32, i32
  }
  func.func @transform_4(%arg0: i32) -> (i32, i32) {
    %c0_i32 = arith.constant 0 : i32
    %c0_i32_0 = arith.constant 0 : i32
    %c0_i32_1 = arith.constant 0 : i32
    return %c0_i32, %c0_i32_0 : i32, i32
  }
  func.func @transform_5(%arg0: i32) -> (i32, i32) {
    %c0_i32 = arith.constant 0 : i32
    %c0_i32_0 = arith.constant 0 : i32
    %c0_i32_1 = arith.constant 0 : i32
    return %c0_i32, %c0_i32_0 : i32, i32
  }
  func.func @transform_6(%arg0: i32) -> (i32, i32) {
    %c0_i32 = arith.constant 0 : i32
    %c0_i32_0 = arith.constant 0 : i32
    %c0_i32_1 = arith.constant 0 : i32
    return %c0_i32, %c0_i32_0 : i32, i32
  }
  func.func @transform_7(%arg0: i32) -> (i32, i32) {
    %c0_i32 = arith.constant 0 : i32
    %c0_i32_0 = arith.constant 0 : i32
    %c0_i32_1 = arith.constant 0 : i32
    return %c0_i32, %c0_i32_0 : i32, i32
  }
  func.func @transform_8(%arg0: i32) -> (i32, i32) {
    %c0_i32 = arith.constant 0 : i32
    %c0_i32_0 = arith.constant 0 : i32
    %c0_i32_1 = arith.constant 0 : i32
    return %c0_i32, %c0_i32_0 : i32, i32
  }
  func.func @transform_9(%arg0: i32) -> (i32, i32) {
    %c0_i32 = arith.constant 0 : i32
    %c0_i32_0 = arith.constant 0 : i32
    %c0_i32_1 = arith.constant 0 : i32
    return %c0_i32, %c0_i32_0 : i32, i32
  }
  func.func @transform_10(%arg0: i32) -> (i32, i32, i32) {
    %c0_i32 = arith.constant 0 : i32
    %c0_i32_0 = arith.constant 0 : i32
    %c0_i32_1 = arith.constant 0 : i32
    return %arg0, %c0_i32, %c0_i32_0 : i32, i32, i32
  }
}

</mosaic_0001>

<bundles_post_ra>
// kernel: pcloud_to_box3d_forward.1
= control target key start
LH: loop header
LB: loop body
LE: loop exit
PB: predicated region body
PF: predicated region fallthrough
CT: control target
= control target key end

     0   :  { %s4565_s13 = smov 0   ;;  %s7081_s0 = inlined_call_operand.vmem [shape: f32[2,512,8], index: 0, kind: input, shape index: {}]   ;;  %s7082_s1 = inlined_call_operand.vmem [shape: s32[2,1,64], index: 1, kind: input, shape index: {}]   ;;  %s7083_s2 = inlined_call_operand.vmem [shape: f32[8,32], index: 2, kind: input, shape index: {}]   ;;  %s7084_s3 = inlined_call_operand.vmem [shape: f32[1,32], index: 3, kind: input, shape index: {}]   ;;  %s7085_s4 = inlined_call_operand.vmem [shape: f32[32,32], index: 4, kind: input, shape index: {}]   ;;  %s7086_s5 = inlined_call_operand.vmem [shape: f32[1,32], index: 5, kind: input, shape index: {}]   ;;  %s7087_s6 = inlined_call_operand.vmem [shape: f32[288,32], index: 6, kind: input, shape index: {}]   ;;  %s7088_s7 = inlined_call_operand.vmem [shape: f32[1,32], index: 7, kind: input, shape index: {}]   ;;  %s7089_s8 = inlined_call_operand.vmem [shape: f32[32,10], index: 8, kind: input, shape index: {}]   ;;  %s7090_s9 = inlined_call_operand.vmem [shape: f32[1,10], index: 9, kind: input, shape index: {}]   ;;  %s7091_s10 = inlined_call_operand.vmem [shape: f32[2,10,256], index: 10, kind: output, shape index: {}]  }
   0x1 LB: > { %s3997_s14 = sadd.s32 4294967295, %s4507_s13   ;;  %p4001_p0 = scmp.ge.s32.totalorder %s4507_s13, 1  ;;  %s4507_s13 = sphi %s4565_s13, %s20_s13  }
   0x2   : > { %p320_p1 = scmp.lt.s32.totalorder %s4507_s13, 3 }
   0x4   : > { %p321_p2 = pnand %p4001_p0, %p320_p1 }
   0x6   : > { %324 = sbr.rel (%p321_p2) target bundleno = 2124 (0x84c), region = 60 }
   0xb   : > { %v438_v0 = vld [vmem:[%s7083_s2] sm:$0xff]  ;;  %p361_p3 = scmp.lt.s32.totalorder %s3997_s14, 1  ;;  %vm443_vm0 = vcmask 64512   ;;  %v912_v13 = vld [vmem:[%s7085_s4 + $0x18] sm:$0xff]  ;;  %v911_v14 = vld [vmem:[%s7085_s4 + $0x10] sm:$0xff]  ;;  %vm917_vm1 = vcmask 261120  }
   0xc   : > { %651 = vmatpush.msra.mxu0 %v438_v0  ;;  %4478 = vmatpush.msra.mxu2 %v438_v0  ;;  %v910_v16 = vld [vmem:[%s7085_s4 + $0x8] sm:$0xff]  ;;  %v909_v17 = vld [vmem:[%s7085_s4] sm:$0xff]  ;;  %vm1538_vm3 = vcmask 523264  }
   0xd   : > { %s7460_s14 = smov (!%p361_p3, %s3997_s14), 1  ;;  %1122 = vmatpush.msra.mxu1 %v912_v13  ;;  %v4631_v21 = vld [vmem:[%s7084_s3] ss:$0 sm:$0xff] }
   0xe   : > { %s4476_s17 = sshll.u32 %s7460_s14, 9  ;;  %4479 = vmatpush.msrb.mxu2 %v912_v13  ;;  %s368_s15 = scalar_lea.vmem %s7082_s1, %s7460_s14 }
   0xf   : > { %s4582_s20 = scalar_lea.vmem %s7081_s0, %s4476_s17  ;;  %1123 = vmatpush.msra.mxu1 %v911_v14  ;;  %s4477_s12 = sshll.u32 %s7460_s14, 5 }
  0x10   : > { %v374_v1 = vld [vmem:[%s4582_s20] sm:$0xff]  ;;  %v375_v2 = vld [vmem:[%s4582_s20 + $0x8] sm:$0xff]  ;;  %v376_v3 = vld [vmem:[%s4582_s20 + $0x10] sm:$0xff]  ;;  %4480 = vmatpush.msrb.mxu2 %v911_v14  ;;  %s373_s17 = scalar_lea.vmem %s7091_s10, %s4477_s12 }
  0x11   : > { %4006 = vmatmul.msk.f32.vlgmr.msra.gmra.mxu0 %vm443_vm0, %v374_v1  ;;  %v377_v4 = vld [vmem:[%s4582_s20 + $0x18] sm:$0xff]  ;;  %v378_v5 = vld [vmem:[%s4582_s20 + $0x20] sm:$0xff]  ;;  %v379_v6 = vld [vmem:[%s4582_s20 + $0x28] sm:$0xff]  ;;  %1124 = vmatpush.msra.mxu1 %v910_v16 }
  0x12   : > { %v380_v7 = vld [vmem:[%s4582_s20 + $0x30] sm:$0xff]  ;;  %v381_v8 = vld [vmem:[%s4582_s20 + $0x38] sm:$0xff]  ;;  %v382_v9 = vld [vmem:[%s4582_s20 + $0x40] sm:$0xff]  ;;  %4481 = vmatpush.msrb.mxu2 %v910_v16 }
  0x13   : > { %v383_v10 = vld [vmem:[%s4582_s20 + $0x48] sm:$0xff]  ;;  %v384_v11 = vld [vmem:[%s4582_s20 + $0x50] sm:$0xff]  ;;  %v385_v12 = vld [vmem:[%s4582_s20 + $0x58] sm:$0xff]  ;;  %1125 = vmatpush.msra.mxu1 %v909_v17 }
  0x14   : > { %v386_v15 = vld [vmem:[%s4582_s20 + $0x60] sm:$0xff]  ;;  %4482 = vmatpush.msrb.mxu2 %v909_v17  ;;  %v387_v18 = vld [vmem:[%s4582_s20 + $0x68] sm:$0xff]  ;;  %v388_v19 = vld [vmem:[%s4582_s20 + $0x70] sm:$0xff] }
  0x15   : > { %v389_v20 = vld [vmem:[%s4582_s20 + $0x78] sm:$0xff]  ;;  %v390_v23 = vld [vmem:[%s4582_s20 + $0x80] sm:$0xff]  ;;  %v391_v27 = vld [vmem:[%s4582_s20 + $0x88] sm:$0xff] }
  0x16   : > { %v392_v31 = vld [vmem:[%s4582_s20 + $0x90] sm:$0xff]  ;;  %v393_v35 = vld [vmem:[%s4582_s20 + $0x98] sm:$0xff]  ;;  %v394_v39 = vld [vmem:[%s4582_s20 + $0xa0] sm:$0xff] }
  0x17   : > { %v395_v43 = vld [vmem:[%s4582_s20 + $0xa8] sm:$0xff]  ;;  %v396_v47 = vld [vmem:[%s4582_s20 + $0xb0] sm:$0xff]  ;;  %v397_v51 = vld [vmem:[%s4582_s20 + $0xb8] sm:$0xff] }
  0x18   : > { %v398_v55 = vld [vmem:[%s4582_s20 + $0xc0] sm:$0xff]  ;;  %v399_v59 = vld [vmem:[%s4582_s20 + $0xc8] sm:$0xff]  ;;  %v400_v63 = vld [vmem:[%s4582_s20 + $0xd0] sm:$0xff] }
  0x19   : > { %4007 = vmatmul.msk.f32.gmra.mxu0 %vm443_vm0, %v375_v2 }
  0x21   : > { %4008 = vmatmul.msk.f32.gmra.mxu0 %vm443_vm0, %v376_v3  ;;  %v401_v3 = vld [vmem:[%s4582_s20 + $0xd8] sm:$0xff] }
  0x29   : > { %4009 = vmatmul.msk.f32.gmra.mxu0 %vm443_vm0, %v377_v4 }
  0x31   : > { %4010 = vmatmul.msk.f32.gmra.mxu0 %vm443_vm0, %v378_v5 }
  0x39   : > { %4011 = vmatmul.msk.f32.gmra.mxu0 %vm443_vm0, %v379_v6 }
  0x41   : > { %4012 = vmatmul.msk.f32.gmra.mxu0 %vm443_vm0, %v380_v7  ;;  %v402_v7 = vld [vmem:[%s4582_s20 + $0xe0] sm:$0xff] }
  0x49   : > { %4013 = vmatmul.msk.f32.gmra.mxu0 %vm443_vm0, %v381_v8 }
  0x51   : > { %4014 = vmatmul.msk.f32.gmra.mxu0 %vm443_vm0, %v382_v9 }
  0x59   : > { %4015 = vmatmul.msk.f32.gmra.mxu0 %vm443_vm0, %v383_v10 }
  0x61   : > { %4016 = vmatmul.msk.f32.gmra.mxu0 %vm443_vm0, %v384_v11  ;;  %v403_v11 = vld [vmem:[%s4582_s20 + $0xe8] sm:$0xff] }
  0x69   : > { %4017 = vmatmul.msk.f32.gmra.mxu0 %vm443_vm0, %v385_v12 }
  0x71   : > { %4018 = vmatmul.msk.f32.gmra.mxu0 %vm443_vm0, %v386_v15  ;;  %v404_v15 = vld [vmem:[%s4582_s20 + $0xf0] sm:$0xff] }
  0x79   : > { %4019 = vmatmul.msk.f32.gmra.mxu0 %vm443_vm0, %v387_v18 }
  0x81   : > { %4020 = vmatmul.msk.f32.gmra.mxu0 %vm443_vm0, %v388_v19  ;;  %v405_v19 = vld [vmem:[%s4582_s20 + $0xf8] sm:$0xff] }
  0x89   : > { %4021 = vmatmul.msk.f32.gmra.mxu0 %vm443_vm0, %v389_v20 }
  0x8e   : > { %v653_v22 = vpop.f32.mrf.mxu0 }
  0x8f   : > { %v654_v24 = vadd.f32 %v4631_v21, %v653_v22 }
  0x91   : > { %v845_v25 = vmax.f32 %v654_v24, 0.0  ;;  %4022 = vmatmul.msk.f32.gmra.mxu0 %vm443_vm0, %v390_v23  ;;  %v406_v24 = vld [vmem:[%s4582_s20 + $0x100] sm:$0xff] }
  0x93   : > { %4070 = vmatmul.msk.f32.vlgmr.msra.gmra.mxu1 %vm917_vm1, %v845_v25 }
  0x96   : > { %v656_v26 = vpop.f32.mrf.mxu0 }
  0x97   : > { %v657_v28 = vadd.f32 %v4631_v21, %v656_v26 }
  0x99   : > { %v846_v29 = vmax.f32 %v657_v28, 0.0  ;;  %4023 = vmatmul.msk.f32.gmra.mxu0 %vm443_vm0, %v391_v27 }
  0x9b   : > { %4071 = vmatmul.msk.f32.gmra.mxu1 %vm917_vm1, %v846_v29  ;;  %v407_v29 = vld [vmem:[%s4582_s20 + $0x108] sm:$0xff] }
  0x9e   : > { %v659_v30 = vpop.f32.mrf.mxu0 }
  0x9f   : > { %v660_v32 = vadd.f32 %v4631_v21, %v659_v30 }
  0xa1   : > { %v847_v33 = vmax.f32 %v660_v32, 0.0  ;;  %4024 = vmatmul.msk.f32.gmra.mxu0 %vm443_vm0, %v392_v31 }
  0xa3   : > { %4072 = vmatmul.msk.f32.gmra.mxu1 %vm917_vm1, %v847_v33 }
  0xa6   : > { %v662_v34 = vpop.f32.mrf.mxu0 }
  0xa7   : > { %v663_v36 = vadd.f32 %v4631_v21, %v662_v34  ;;  %v408_v34 = vld [vmem:[%s4582_s20 + $0x110] sm:$0xff] }
  0xa9   : > { %v848_v37 = vmax.f32 %v663_v36, 0.0  ;;  %4025 = vmatmul.msk.f32.gmra.mxu0 %vm443_vm0, %v393_v35 }
  0xab   : > { %4073 = vmatmul.msk.f32.gmra.mxu1 %vm917_vm1, %v848_v37 }
  0xae   : > { %v665_v38 = vpop.f32.mrf.mxu0 }
  0xaf   : > { %v666_v40 = vadd.f32 %v4631_v21, %v665_v38 }
  0xb1   : > { %v849_v41 = vmax.f32 %v666_v40, 0.0  ;;  %4026 = vmatmul.msk.f32.gmra.mxu0 %vm443_vm0, %v394_v39  ;;  %v409_v39 = vld [vmem:[%s4582_s20 + $0x118] sm:$0xff] }
  0xb3   : > { %4074 = vmatmul.msk.f32.gmra.mxu1 %vm917_vm1, %v849_v41 }
  0xb6   : > { %v668_v42 = vpop.f32.mrf.mxu0 }
  0xb7   : > { %v669_v44 = vadd.f32 %v4631_v21, %v668_v42 }
  0xb9   : > { %v850_v45 = vmax.f32 %v669_v44, 0.0  ;;  %4027 = vmatmul.msk.f32.gmra.mxu0 %vm443_vm0, %v395_v43  ;;  %v410_v44 = vld [vmem:[%s4582_s20 + $0x120] sm:$0xff] }
  0xbb   : > { %4075 = vmatmul.msk.f32.gmra.mxu1 %vm917_vm1, %v850_v45 }
  0xbe   : > { %v671_v46 = vpop.f32.mrf.mxu0 }
  0xbf   : > { %v672_v48 = vadd.f32 %v4631_v21, %v671_v46 }
  0xc1   : > { %v851_v49 = vmax.f32 %v672_v48, 0.0  ;;  %4028 = vmatmul.msk.f32.gmra.mxu0 %vm443_vm0, %v396_v47 }
  0xc3   : > { %4076 = vmatmul.msk.f32.gmra.mxu1 %vm917_vm1, %v851_v49  ;;  %v411_v49 = vld [vmem:[%s4582_s20 + $0x128] sm:$0xff] }
  0xc6   : > { %v674_v50 = vpop.f32.mrf.mxu0 }
  0xc7   : > { %v675_v52 = vadd.f32 %v4631_v21, %v674_v50 }
  0xc9   : > { %v852_v53 = vmax.f32 %v675_v52, 0.0  ;;  %4029 = vmatmul.msk.f32.gmra.mxu0 %vm443_vm0, %v397_v51 }
  0xcb   : > { %4077 = vmatmul.msk.f32.gmra.mxu1 %vm917_vm1, %v852_v53 }
  0xce   : > { %v677_v54 = vpop.f32.mrf.mxu0 }
  0xcf   : > { %v678_v56 = vadd.f32 %v4631_v21, %v677_v54  ;;  %v412_v54 = vld [vmem:[%s4582_s20 + $0x130] sm:$0xff] }
  0xd1   : > { %v853_v57 = vmax.f32 %v678_v56, 0.0  ;;  %4030 = vmatmul.msk.f32.gmra.mxu0 %vm443_vm0, %v398_v55 }
  0xd3   : > { %4078 = vmatmul.msk.f32.gmra.mxu1 %vm917_vm1, %v853_v57 }
  0xd6   : > { %v680_v58 = vpop.f32.mrf.mxu0 }
  0xd7   : > { %v681_v60 = vadd.f32 %v4631_v21, %v680_v58 }
  0xd9   : > { %v854_v61 = vmax.f32 %v681_v60, 0.0  ;;  %4031 = vmatmul.msk.f32.gmra.mxu0 %vm443_vm0, %v399_v59  ;;  %v413_v59 = vld [vmem:[%s4582_s20 + $0x138] sm:$0xff] }
  0xdb   : > { %4079 = vmatmul.msk.f32.gmra.mxu1 %vm917_vm1, %v854_v61 }
  0xde   : > { %v683_v62 = vpop.f32.mrf.mxu0 }
  0xdf   : > { %v684_v0 = vadd.f32 %v4631_v21, %v683_v62 }
  0xe1   : > { %v855_v1 = vmax.f32 %v684_v0, 0.0  ;;  %4032 = vmatmul.msk.f32.gmra.mxu0 %vm443_vm0, %v400_v63  ;;  %v414_v0 = vld [vmem:[%s4582_s20 + $0x140] sm:$0xff] }
  0xe3   : > { %4080 = vmatmul.msk.f32.gmra.mxu1 %vm917_vm1, %v855_v1 }
  0xe6   : > { %v686_v2 = vpop.f32.mrf.mxu0 }
  0xe7   : > { %v687_v4 = vadd.f32 %v4631_v21, %v686_v2 }
  0xe9   : > { %v856_v5 = vmax.f32 %v687_v4, 0.0  ;;  %4033 = vmatmul.msk.f32.gmra.mxu0 %vm443_vm0, %v401_v3 }
  0xeb   : > { %4081 = vmatmul.msk.f32.gmra.mxu1 %vm917_vm1, %v856_v5  ;;  %v415_v5 = vld [vmem:[%s4582_s20 + $0x148] sm:$0xff] }
  0xee   : > { %v689_v6 = vpop.f32.mrf.mxu0 }
  0xef   : > { %v690_v8 = vadd.f32 %v4631_v21, %v689_v6 }
  0xf1   : > { %v857_v9 = vmax.f32 %v690_v8, 0.0  ;;  %4034 = vmatmul.msk.f32.gmra.mxu0 %vm443_vm0, %v402_v7 }
  0xf3   : > { %4082 = vmatmul.msk.f32.gmra.mxu1 %vm917_vm1, %v857_v9 }
  0xf6   : > { %v692_v10 = vpop.f32.mrf.mxu0 }
  0xf7   : > { %v693_v12 = vadd.f32 %v4631_v21, %v692_v10  ;;  %v416_v10 = vld [vmem:[%s4582_s20 + $0x150] sm:$0xff] }
  0xf9   : > { %v858_v13 = vmax.f32 %v693_v12, 0.0  ;;  %4035 = vmatmul.msk.f32.gmra.mxu0 %vm443_vm0, %v403_v11 }
  0xfb   : > { %4083 = vmatmul.msk.f32.gmra.mxu1 %vm917_vm1, %v858_v13 }
  0xfe   : > { %v695_v14 = vpop.f32.mrf.mxu0 }
  0xff   : > { %v696_v16 = vadd.f32 %v4631_v21, %v695_v14 }
 0x101   : > { %v859_v17 = vmax.f32 %v696_v16, 0.0  ;;  %4036 = vmatmul.msk.f32.gmra.mxu0 %vm443_vm0, %v404_v15  ;;  %v417_v15 = vld [vmem:[%s4582_s20 + $0x158] sm:$0xff] }
 0x103   : > { %4084 = vmatmul.msk.f32.gmra.mxu1 %vm917_vm1, %v859_v17 }
 0x106   : > { %v698_v18 = vpop.f32.mrf.mxu0 }
 0x107   : > { %v699_v20 = vadd.f32 %v4631_v21, %v698_v18 }
 0x109   : > { %v860_v22 = vmax.f32 %v699_v20, 0.0  ;;  %4037 = vmatmul.msk.f32.gmra.mxu0 %vm443_vm0, %v405_v19  ;;  %v418_v20 = vld [vmem:[%s4582_s20 + $0x160] sm:$0xff] }
 0x10b   : > { %4085 = vmatmul.msk.f32.gmra.mxu1 %vm917_vm1, %v860_v22 }
 0x10e   : > { %v701_v23 = vpop.f32.mrf.mxu0 }
 0x10f   : > { %v702_v25 = vadd.f32 %v4631_v21, %v701_v23 }
 0x110   : > { %v4699_v26 = vpop.f32.mrf.mxu1 }
 0x111   : > { %v861_v27 = vmax.f32 %v702_v25, 0.0  ;;  %4038 = vmatmul.msk.f32.gmra.mxu0 %vm443_vm0, %v406_v24 }
 0x113   : > { %4086 = vmatmul.msk.f32.gmra.mxu1 %vm917_vm1, %v861_v27  ;;  %v419_v27 = vld [vmem:[%s4582_s20 + $0x168] sm:$0xff] }
 0x116   : > { %v704_v28 = vpop.f32.mrf.mxu0 }
 0x117   : > { %v705_v30 = vadd.f32 %v4631_v21, %v704_v28 }
 0x118   : > { %v4705_v31 = vpop.f32.mrf.mxu1 }
 0x119   : > { %v862_v32 = vmax.f32 %v705_v30, 0.0  ;;  %4039 = vmatmul.msk.f32.gmra.mxu0 %vm443_vm0, %v407_v29 }
 0x11b   : > { %4087 = vmatmul.msk.f32.gmra.mxu1 %vm917_vm1, %v862_v32 }
 0x11e   : > { %v707_v33 = vpop.f32.mrf.mxu0 }
 0x11f   : > { %v708_v35 = vadd.f32 %v4631_v21, %v707_v33  ;;  %v420_v33 = vld [vmem:[%s4582_s20 + $0x170] sm:$0xff] }
 0x120   : > { %v4711_v36 = vpop.f32.mrf.mxu1 }
 0x121   : > { %v863_v37 = vmax.f32 %v708_v35, 0.0  ;;  %4040 = vmatmul.msk.f32.gmra.mxu0 %vm443_vm0, %v408_v34 }
 0x123   : > { %4088 = vmatmul.msk.f32.gmra.mxu1 %vm917_vm1, %v863_v37 }
 0x126   : > { %v710_v38 = vpop.f32.mrf.mxu0 }
 0x127   : > { %v711_v40 = vadd.f32 %v4631_v21, %v710_v38 }
 0x128   : > { %v4717_v41 = vpop.f32.mrf.mxu1 }
 0x129   : > { %v864_v42 = vmax.f32 %v711_v40, 0.0  ;;  %4041 = vmatmul.msk.f32.gmra.mxu0 %vm443_vm0, %v409_v39  ;;  %v421_v39 = vld [vmem:[%s4582_s20 + $0x178] sm:$0xff] }
 0x12b   : > { %4089 = vmatmul.msk.f32.gmra.mxu1 %vm917_vm1, %v864_v42 }
 0x12e   : > { %v713_v43 = vpop.f32.mrf.mxu0 }
 0x12f   : > { %v714_v45 = vadd.f32 %v4631_v21, %v713_v43 }
 0x130   : > { %v4723_v46 = vpop.f32.mrf.mxu1 }
 0x131   : > { %v865_v47 = vmax.f32 %v714_v45, 0.0  ;;  %4042 = vmatmul.msk.f32.gmra.mxu0 %vm443_vm0, %v410_v44  ;;  %v422_v45 = vld [vmem:[%s4582_s20 + $0x180] sm:$0xff] }
 0x133   : > { %4090 = vmatmul.msk.f32.gmra.mxu1 %vm917_vm1, %v865_v47 }
 0x136   : > { %v716_v48 = vpop.f32.mrf.mxu0 }
 0x137   : > { %v717_v50 = vadd.f32 %v4631_v21, %v716_v48 }
 0x138   : > { %v4729_v51 = vpop.f32.mrf.mxu1 }
 0x139   : > { %v866_v52 = vmax.f32 %v717_v50, 0.0  ;;  %4043 = vmatmul.msk.f32.gmra.mxu0 %vm443_vm0, %v411_v49 }
 0x13b   : > { %4091 = vmatmul.msk.f32.gmra.mxu1 %vm917_vm1, %v866_v52  ;;  %v423_v52 = vld [vmem:[%s4582_s20 + $0x188] sm:$0xff] }
 0x13e   : > { %v719_v53 = vpop.f32.mrf.mxu0 }
 0x13f   : > { %v720_v55 = vadd.f32 %v4631_v21, %v719_v53 }
 0x140   : > { %v4735_v56 = vpop.f32.mrf.mxu1 }
 0x141   : > { %v867_v57 = vmax.f32 %v720_v55, 0.0  ;;  %4044 = vmatmul.msk.f32.gmra.mxu0 %vm443_vm0, %v412_v54 }
 0x143   : > { %4092 = vmatmul.msk.f32.gmra.mxu1 %vm917_vm1, %v867_v57 }
 0x146   : > { %v722_v58 = vpop.f32.mrf.mxu0 }
 0x147   : > { %v723_v60 = vadd.f32 %v4631_v21, %v722_v58  ;;  %v424_v58 = vld [vmem:[%s4582_s20 + $0x190] sm:$0xff] }
 0x148   : > { %v4741_v61 = vpop.f32.mrf.mxu1 }
 0x149   : > { %v868_v62 = vmax.f32 %v723_v60, 0.0  ;;  %4045 = vmatmul.msk.f32.gmra.mxu0 %vm443_vm0, %v413_v59 }
 0x14b   : > { %4093 = vmatmul.msk.f32.gmra.mxu1 %vm917_vm1, %v868_v62 }
 0x14e   : > { %v725_v63 = vpop.f32.mrf.mxu0 }
 0x14f   : > { %v726_v1 = vadd.f32 %v4631_v21, %v725_v63 }
 0x150   : > { %v4747_v2 = vpop.f32.mrf.mxu1 }
 0x151   : > { %v869_v3 = vmax.f32 %v726_v1, 0.0  ;;  %4046 = vmatmul.msk.f32.gmra.mxu0 %vm443_vm0, %v414_v0  ;;  %v425_v0 = vld [vmem:[%s4582_s20 + $0x198] sm:$0xff] }
 0x153   : > { %4094 = vmatmul.msk.f32.gmra.mxu1 %vm917_vm1, %v869_v3 }
 0x156   : > { %v728_v4 = vpop.f32.mrf.mxu0 }
 0x157   : > { %v729_v6 = vadd.f32 %v4631_v21, %v728_v4 }
 0x158   : > { %v4753_v7 = vpop.f32.mrf.mxu1 }
 0x159   : > { %v870_v8 = vmax.f32 %v729_v6, 0.0  ;;  %4047 = vmatmul.msk.f32.gmra.mxu0 %vm443_vm0, %v415_v5  ;;  %v426_v6 = vld [vmem:[%s4582_s20 + $0x1a0] sm:$0xff] }
 0x15b   : > { %4095 = vmatmul.msk.f32.gmra.mxu1 %vm917_vm1, %v870_v8 }
 0x15e   : > { %v731_v9 = vpop.f32.mrf.mxu0 }
 0x15f   : > { %v732_v11 = vadd.f32 %v4631_v21, %v731_v9 }
 0x160   : > { %v4759_v12 = vpop.f32.mrf.mxu1 }
 0x161   : > { %v871_v13 = vmax.f32 %v732_v11, 0.0  ;;  %4048 = vmatmul.msk.f32.gmra.mxu0 %vm443_vm0, %v416_v10  ;;  %v431_v11 = vld [vmem:[%s4582_s20 + $0x1c8] sm:$0xff] }
 0x162   : > { %4063 = vmatmul.msk.f32.vlgmr.msra.gmra.mxu2 %vm443_vm0, %v431_v11 }
 0x163   : > { %4096 = vmatmul.msk.f32.gmra.mxu1 %vm917_vm1, %v871_v13 }
 0x166   : > { %v734_v14 = vpop.f32.mrf.mxu0 }
 0x167   : > { %v735_v16 = vadd.f32 %v4631_v21, %v734_v14  ;;  %v427_v14 = vld [vmem:[%s4582_s20 + $0x1a8] sm:$0xff] }
 0x168   : > { %v4765_v17 = vpop.f32.mrf.mxu1 }
 0x169   : > { %v872_v18 = vmax.f32 %v735_v16, 0.0  ;;  %4049 = vmatmul.msk.f32.gmra.mxu0 %vm443_vm0, %v417_v15 }
 0x16b   : > { %4097 = vmatmul.msk.f32.gmra.mxu1 %vm917_vm1, %v872_v18 }
 0x16e   : > { %v737_v19 = vpop.f32.mrf.mxu0 }
 0x16f   : > { %v738_v22 = vadd.f32 %v4631_v21, %v737_v19  ;;  %v432_v19 = vld [vmem:[%s4582_s20 + $0x1d0] sm:$0xff] }
 0x170   : > { %v4771_v23 = vpop.f32.mrf.mxu1  ;;  %4064 = vmatmul.msk.f32.gmra.mxu2 %vm443_vm0, %v432_v19 }
 0x171   : > { %v873_v24 = vmax.f32 %v738_v22, 0.0  ;;  %4050 = vmatmul.msk.f32.gmra.mxu0 %vm443_vm0, %v418_v20  ;;  %v428_v22 = vld [vmem:[%s4582_s20 + $0x1b0] sm:$0xff] }
 0x173   : > { %4098 = vmatmul.msk.f32.gmra.mxu1 %vm917_vm1, %v873_v24 }
 0x176   : > { %v740_v25 = vpop.f32.mrf.mxu0 }
 0x177   : > { %v741_v28 = vadd.f32 %v4631_v21, %v740_v25 }
 0x178   : > { %v4777_v29 = vpop.f32.mrf.mxu1 }
 0x179   : > { %v874_v30 = vmax.f32 %v741_v28, 0.0  ;;  %4051 = vmatmul.msk.f32.gmra.mxu0 %vm443_vm0, %v419_v27  ;;  %v433_v28 = vld [vmem:[%s4582_s20 + $0x1d8] sm:$0xff] }
 0x17a   : > { %4065 = vmatmul.msk.f32.gmra.mxu2 %vm443_vm0, %v433_v28 }
 0x17b   : > { %4099 = vmatmul.msk.f32.gmra.mxu1 %vm917_vm1, %v874_v30 }
 0x17e   : > { %v743_v32 = vpop.f32.mrf.mxu0 }
 0x17f   : > { %v744_v34 = vadd.f32 %v4631_v21, %v743_v32  ;;  %v429_v32 = vld [vmem:[%s4582_s20 + $0x1b8] sm:$0xff] }
 0x180   : > { %v4783_v35 = vpop.f32.mrf.mxu1 }
 0x181   : > { %v875_v37 = vmax.f32 %v744_v34, 0.0  ;;  %4052 = vmatmul.msk.f32.gmra.mxu0 %vm443_vm0, %v420_v33 }
 0x183   : > { %4100 = vmatmul.msk.f32.gmra.mxu1 %vm917_vm1, %v875_v37 }
 0x186   : > { %v746_v38 = vpop.f32.mrf.mxu0 }
 0x187   : > { %v747_v40 = vadd.f32 %v4631_v21, %v746_v38  ;;  %v434_v38 = vld [vmem:[%s4582_s20 + $0x1e0] sm:$0xff] }
 0x188   : > { %v4789_v42 = vpop.f32.mrf.mxu1  ;;  %4066 = vmatmul.msk.f32.gmra.mxu2 %vm443_vm0, %v434_v38 }
 0x189   : > { %v876_v43 = vmax.f32 %v747_v40, 0.0  ;;  %4053 = vmatmul.msk.f32.gmra.mxu0 %vm443_vm0, %v421_v39  ;;  %v430_v40 = vld [vmem:[%s4582_s20 + $0x1c0] sm:$0xff] }
 0x18b   : > { %4101 = vmatmul.msk.f32.gmra.mxu1 %vm917_vm1, %v876_v43 }
 0x18e   : > { %v749_v44 = vpop.f32.mrf.mxu0 }
 0x18f   : > { %v750_v47 = vadd.f32 %v4631_v21, %v749_v44 }
 0x190   : > { %v4795_v48 = vpop.f32.mrf.mxu1 }
 0x191   : > { %v877_v49 = vmax.f32 %v750_v47, 0.0  ;;  %4054 = vmatmul.msk.f32.gmra.mxu0 %vm443_vm0, %v422_v45  ;;  %v435_v47 = vld [vmem:[%s4582_s20 + $0x1e8] sm:$0xff] }
 0x192   : > { %4067 = vmatmul.msk.f32.gmra.mxu2 %vm443_vm0, %v435_v47 }
 0x193   : > { %4102 = vmatmul.msk.f32.gmra.mxu1 %vm917_vm1, %v877_v49 }
 0x196   : > { %v752_v50 = vpop.f32.mrf.mxu0 }
 0x197   : > { %v753_v53 = vadd.f32 %v4631_v21, %v752_v50 }
 0x198   : > { %v4801_v54 = vpop.f32.mrf.mxu1 }
 0x199   : > { %v878_v55 = vmax.f32 %v753_v53, 0.0  ;;  %4055 = vmatmul.msk.f32.gmra.mxu0 %vm443_vm0, %v423_v52 }
 0x19b   : > { %4103 = vmatmul.msk.f32.gmra.mxu1 %vm917_vm1, %v878_v55  ;;  %v436_v55 = vld [vmem:[%s4582_s20 + $0x1f0] sm:$0xff] }
 0x19c   : > { %4068 = vmatmul.msk.f32.gmra.mxu2 %vm443_vm0, %v436_v55 }
 0x19e   : > { %v755_v57 = vpop.f32.mrf.mxu0 }
 0x19f   : > { %v756_v59 = vadd.f32 %v4631_v21, %v755_v57 }
 0x1a0   : > { %v4807_v60 = vpop.f32.mrf.mxu1 }
 0x1a1   : > { %v879_v62 = vmax.f32 %v756_v59, 0.0  ;;  %4056 = vmatmul.msk.f32.gmra.mxu0 %vm443_vm0, %v424_v58 }
 0x1a3   : > { %4104 = vmatmul.msk.f32.gmra.mxu1 %vm917_vm1, %v879_v62  ;;  %v437_v62 = vld [vmem:[%s4582_s20 + $0x1f8] sm:$0xff] }
 0x1a4   : > { %4069 = vmatmul.msk.f32.gmra.mxu2 %vm443_vm0, %v437_v62 }
 0x1a6   : > { %v758_v63 = vpop.f32.mrf.mxu0 }
 0x1a7   : > { %v759_v1 = vadd.f32 %v4631_v21, %v758_v63 }
 0x1a8   : > { %v4813_v3 = vpop.f32.mrf.mxu1 }
 0x1a9   : > { %v880_v4 = vmax.f32 %v759_v1, 0.0  ;;  %4057 = vmatmul.msk.f32.gmra.mxu0 %vm443_vm0, %v425_v0 }
 0x1ab   : > { %4105 = vmatmul.msk.f32.gmra.mxu1 %vm917_vm1, %v880_v4 }
 0x1ae   : > { %v761_v5 = vpop.f32.mrf.mxu0 }
 0x1af   : > { %v762_v8 = vadd.f32 %v4631_v21, %v761_v5 }
 0x1b0   : > { %v4819_v9 = vpop.f32.mrf.mxu1 }
 0x1b1   : > { %v881_v10 = vmax.f32 %v762_v8, 0.0  ;;  %4058 = vmatmul.msk.f32.gmra.mxu0 %vm443_vm0, %v426_v6 }
 0x1b3   : > { %4106 = vmatmul.msk.f32.gmra.mxu1 %vm917_vm1, %v881_v10 }
 0x1b6   : > { %v764_v13 = vpop.f32.mrf.mxu0 }
 0x1b7   : > { %v765_v15 = vadd.f32 %v4631_v21, %v764_v13 }
 0x1b8   : > { %v4827_v16 = vpop.f32.mrf.mxu1 }
 0x1b9   : > { %v882_v18 = vmax.f32 %v765_v15, 0.0  ;;  %4059 = vmatmul.msk.f32.gmra.mxu0 %vm443_vm0, %v427_v14 }
 0x1bb   : > { %4107 = vmatmul.msk.f32.gmra.mxu1 %vm917_vm1, %v882_v18 }
 0x1be   : > { %v767_v20 = vpop.f32.mrf.mxu0 }
 0x1bf   : > { %v768_v24 = vadd.f32 %v4631_v21, %v767_v20 }
 0x1c0   : > { %v4835_v25 = vpop.f32.mrf.mxu1 }
 0x1c1   : > { %v883_v27 = vmax.f32 %v768_v24, 0.0  ;;  %4060 = vmatmul.msk.f32.gmra.mxu0 %vm443_vm0, %v428_v22 }
 0x1c3   : > { %4108 = vmatmul.msk.f32.gmra.mxu1 %vm917_vm1, %v883_v27 }
 0x1c6   : > { %v770_v30 = vpop.f32.mrf.mxu0 }
 0x1c7   : > { %v771_v33 = vadd.f32 %v4631_v21, %v770_v30 }
 0x1c8   : > { %v4843_v34 = vpop.f32.mrf.mxu1 }
 0x1c9   : > { %v884_v37 = vmax.f32 %v771_v33, 0.0  ;;  %4061 = vmatmul.msk.f32.gmra.mxu0 %vm443_vm0, %v429_v32 }
 0x1cb   : > { %4109 = vmatmul.msk.f32.gmra.mxu1 %vm917_vm1, %v884_v37 }
 0x1ce   : > { %v773_v39 = vpop.f32.mrf.mxu0 }
 0x1cf   : > { %v774_v43 = vadd.f32 %v4631_v21, %v773_v39 }
 0x1d0   : > { %v4851_v44 = vpop.f32.mrf.mxu1 }
 0x1d1   : > { %v885_v45 = vmax.f32 %v774_v43, 0.0  ;;  %4062 = vmatmul.msk.f32.gmra.mxu0 %vm443_vm0, %v430_v40 }
 0x1d3   : > { %4110 = vmatmul.msk.f32.gmra.mxu1 %vm917_vm1, %v885_v45 }
 0x1d6   : > { %v776_v49 = vpop.f32.mrf.mxu0 }
 0x1d7   : > { %v777_v50 = vadd.f32 %v4631_v21, %v776_v49 }
 0x1d8   : > { %v4858_v53 = vpop.f32.mrf.mxu1 }
 0x1d9   : > { %v886_v52 = vmax.f32 %v777_v50, 0.0 }
 0x1db   : > { %4111 = vmatmul.msk.f32.gmra.mxu1 %vm917_vm1, %v886_v52 }
 0x1de   : > { %v779_v57 = vpop.f32.mrf.mxu0 }
 0x1df   : > { %v780_v58 = vadd.f32 %v4631_v21, %v779_v57 }
 0x1e0   : > { %v4867_v63 = vpop.f32.mrf.mxu1 }
 0x1e1   : > { %v887_v59 = vmax.f32 %v780_v58, 0.0 }
 0x1e3   : > { %4112 = vmatmul.msk.f32.gmra.mxu1 %vm917_vm1, %v887_v59 }
 0x1e6   : > { %v782_v0 = vpop.f32.mrf.mxu0 }
 0x1e7   : > { %v783_v1 = vadd.f32 %v4631_v21, %v782_v0 }
 0x1e8   : > { %v4871_v5 = vpop.f32.mrf.mxu1 }
 0x1e9   : > { %v888_v4 = vmax.f32 %v783_v1, 0.0 }
 0x1eb   : > { %4113 = vmatmul.msk.f32.gmra.mxu1 %vm917_vm1, %v888_v4 }
 0x1ee   : > { %v785_v6 = vpop.f32.mrf.mxu0 }
 0x1ef   : > { %v786_v8 = vadd.f32 %v4631_v21, %v785_v6 }
 0x1f0   : > { %v4876_v14 = vpop.f32.mrf.mxu1 }
 0x1f1   : > { %v889_v10 = vmax.f32 %v786_v8, 0.0 }
 0x1f3   : > { %4114 = vmatmul.msk.f32.gmra.mxu1 %vm917_vm1, %v889_v10 }
 0x1f6   : > { %v788_v11 = vpop.f32.mrf.mxu0 }
 0x1f7   : > { %v789_v13 = vadd.f32 %v4631_v21, %v788_v11 }
 0x1f8   : > { %v4880_v22 = vpop.f32.mrf.mxu1 }
 0x1f9   : > { %v890_v15 = vmax.f32 %v789_v13, 0.0 }
 0x1fb   : > { %4115 = vmatmul.msk.f32.gmra.mxu1 %vm917_vm1, %v890_v15 }
 0x1fe   : > { %v791_v18 = vpop.f32.mrf.mxu0 }
 0x1ff   : > { %v792_v19 = vadd.f32 %v4631_v21, %v791_v18  ;;  %v824_v18 = vpop.f32.mrf.mxu2 }
 0x200   : > { %v4885_v30 = vpop.f32.mrf.mxu1 }
 0x201   : > { %v891_v20 = vmax.f32 %v792_v19, 0.0 }
 0x203   : > { %4116 = vmatmul.msk.f32.gmra.mxu1 %vm917_vm1, %v891_v20 }
 0x206   : > { %v794_v24 = vpop.f32.mrf.mxu0 }
 0x207   : > { %v795_v27 = vadd.f32 %v4631_v21, %v794_v24 }
 0x208   : > { %v4889_v38 = vpop.f32.mrf.mxu1 }
 0x209   : > { %v892_v28 = vmax.f32 %v795_v27, 0.0 }
 0x20b   : > { %4117 = vmatmul.msk.f32.gmra.mxu1 %vm917_vm1, %v892_v28 }
 0x20e   : > { %v797_v32 = vpop.f32.mrf.mxu0 }
 0x20f   : > { %v798_v33 = vadd.f32 %v4631_v21, %v797_v32  ;;  %v827_v32 = vpop.f32.mrf.mxu2 }
 0x210   : > { %v4894_v49 = vpop.f32.mrf.mxu1 }
 0x211   : > { %v893_v37 = vmax.f32 %v798_v33, 0.0 }
 0x213   : > { %4118 = vmatmul.msk.f32.gmra.mxu1 %vm917_vm1, %v893_v37 }
 0x216   : > { %v800_v39 = vpop.f32.mrf.mxu0 }
 0x217   : > { %v801_v40 = vadd.f32 %v4631_v21, %v800_v39 }
 0x218   : > { %v4898_v58 = vpop.f32.mrf.mxu1 }
 0x219   : > { %v894_v43 = vmax.f32 %v801_v40, 0.0  ;;  %v825_v40 = vadd.f32 %v4631_v21, %v824_v18 }
 0x21b   : > { %4119 = vmatmul.msk.f32.gmra.mxu1 %vm917_vm1, %v894_v43  ;;  %v902_v43 = vmax.f32 %v825_v40, 0.0 }
 0x21e   : > { %v803_v45 = vpop.f32.mrf.mxu0 }
 0x21f   : > { %v804_v47 = vadd.f32 %v4631_v21, %v803_v45  ;;  %v830_v45 = vpop.f32.mrf.mxu2 }
 0x220   : > { %v4903_v1 = vpop.f32.mrf.mxu1 }
 0x221   : > { %v895_v50 = vmax.f32 %v804_v47, 0.0  ;;  %v828_v47 = vadd.f32 %v4631_v21, %v827_v32 }
 0x223   : > { %4120 = vmatmul.msk.f32.gmra.mxu1 %vm917_vm1, %v895_v50 }
 0x226   : > { %v806_v52 = vpop.f32.mrf.mxu0 }
 0x227   : > { %v807_v55 = vadd.f32 %v4631_v21, %v806_v52  ;;  %v903_v52 = vmax.f32 %v828_v47, 0.0 }
 0x228   : > { %v4907_v10 = vpop.f32.mrf.mxu1 }
 0x229   : > { %v896_v57 = vmax.f32 %v807_v55, 0.0  ;;  %v833_v55 = vpop.f32.mrf.mxu2 }
 0x22b   : > { %4121 = vmatmul.msk.f32.gmra.mxu1 %vm917_vm1, %v896_v57  ;;  %v831_v57 = vadd.f32 %v4631_v21, %v830_v45 }
 0x22e   : > { %v809_v59 = vpop.f32.mrf.mxu0 }
 0x22f   : > { %v810_v62 = vadd.f32 %v4631_v21, %v809_v59 }
 0x230   : > { %v4912_v24 = vpop.f32.mrf.mxu1 }
 0x231   : > { %v897_v0 = vmax.f32 %v810_v62, 0.0  ;;  %v904_v62 = vmax.f32 %v831_v57, 0.0 }
 0x233   : > { %4122 = vmatmul.msk.f32.gmra.mxu1 %vm917_vm1, %v897_v0  ;;  %v834_v0 = vadd.f32 %v4631_v21, %v833_v55 }
 0x236   : > { %v812_v4 = vpop.f32.mrf.mxu0 }
 0x237   : > { %v813_v6 = vadd.f32 %v4631_v21, %v812_v4  ;;  %v836_v4 = vpop.f32.mrf.mxu2 }
 0x238   : > { %v4916_v39 = vpop.f32.mrf.mxu1 }
 0x239   : > { %v898_v8 = vmax.f32 %v813_v6, 0.0  ;;  %v905_v6 = vmax.f32 %v834_v0, 0.0 }
 0x23b   : > { %4123 = vmatmul.msk.f32.gmra.mxu1 %vm917_vm1, %v898_v8 }
 0x23e   : > { %v815_v11 = vpop.f32.mrf.mxu0 }
 0x23f   : > { %v816_v13 = vadd.f32 %v4631_v21, %v815_v11  ;;  %v837_v11 = vadd.f32 %v4631_v21, %v836_v4 }
 0x240   : > { %v4922_v50 = vpop.f32.mrf.mxu1 }
 0x241   : > { %v899_v15 = vmax.f32 %v816_v13, 0.0  ;;  %v839_v13 = vpop.f32.mrf.mxu2 }
 0x243   : > { %4124 = vmatmul.msk.f32.gmra.mxu1 %vm917_vm1, %v899_v15  ;;  %v906_v15 = vmax.f32 %v837_v11, 0.0  ;;  %v4976_v11 = vld [vmem:[%s7086_s5] ss:$0 sm:$0xff] }
 0x246   : > { %v818_v19 = vpop.f32.mrf.mxu0 }
 0x247   : > { %v819_v20 = vadd.f32 %v4631_v21, %v818_v19  ;;  %v840_v19 = vadd.f32 %v4631_v21, %v839_v13  ;;  %v1128_v13 = vadd.f32 %v4976_v11, %v4699_v26  ;;  %v1143_v26 = vadd.f32 %v4976_v11, %v4729_v51 }
 0x248   : > { %v4926_v59 = vpop.f32.mrf.mxu1  ;;  %v1164_v51 = vadd.f32 %v4976_v11, %v4771_v23 }
 0x249   : > { %v900_v27 = vmax.f32 %v819_v20, 0.0  ;;  %v907_v20 = vmax.f32 %v840_v19, 0.0  ;;  %v1134_v19 = vadd.f32 %v4976_v11, %v4711_v36  ;;  %v1146_v36 = vadd.f32 %v4976_v11, %v4735_v56 }
 0x24b   : > { %4125 = vmatmul.msk.f32.gmra.mxu1 %vm917_vm1, %v900_v27  ;;  %v842_v27 = vpop.f32.mrf.mxu2 }
 0x24e   : > { %v821_v28 = vpop.f32.mrf.mxu0 }
 0x24f   : > { %v822_v33 = vadd.f32 %v4631_v21, %v821_v28  ;;  %v843_v28 = vadd.f32 %v4631_v21, %v842_v27  ;;  %v1137_v27 = vadd.f32 %v4976_v11, %v4717_v41  ;;  %v1158_v41 = vadd.f32 %v4976_v11, %v4759_v12 }
 0x250   : > { %v4930_v8 = vpop.f32.mrf.mxu1  ;;  %v1170_v12 = vadd.f32 %v4976_v11, %v4783_v35 }
 0x251   : > { %v901_v37 = vmax.f32 %v822_v33, 0.0  ;;  %v908_v33 = vmax.f32 %v843_v28, 0.0  ;;  %v1140_v28 = vadd.f32 %v4976_v11, %v4723_v46  ;;  %v1161_v46 = vadd.f32 %v4976_v11, %v4765_v17 }
 0x252   : > { %v1173_v17 = vadd.f32 %v4976_v11, %v4789_v42  ;;  %v1185_v42 = vadd.f32 %v4976_v11, %v4813_v3 }
 0x253   : > { %4126 = vmatmul.msk.f32.vlgmr.msrb.gmra.mxu2 %vm917_vm1, %v901_v37  ;;  %v1330_v23 = vmax.f32 %v1161_v46, 0.0 }
 0x258   : > { %v4934_v18 = vpop.f32.mrf.mxu1 }
 0x25b   : > { %4127 = vmatmul.msk.f32.gmra.mxu2 %vm917_vm1, %v902_v43 }
 0x260   : > { %v4940_v32 = vpop.f32.mrf.mxu1 }
 0x263   : > { %4128 = vmatmul.msk.f32.gmra.mxu2 %vm917_vm1, %v903_v52 }
 0x268   : > { %v4943_v37 = vpop.f32.mrf.mxu1 }
 0x26b   : > { %4129 = vmatmul.msk.f32.gmra.mxu2 %vm917_vm1, %v904_v62 }
 0x270   : > { %v4945_v40 = vpop.f32.mrf.mxu1 }
 0x273   : > { %4130 = vmatmul.msk.f32.gmra.mxu2 %vm917_vm1, %v905_v6 }
 0x278   : > { %v4951_v43 = vpop.f32.mrf.mxu1 }
 0x27b   : > { %4131 = vmatmul.msk.f32.gmra.mxu2 %vm917_vm1, %v906_v15  ;;  %v1131_v15 = vadd.f32 %v4976_v11, %v4705_v31  ;;  %v1155_v31 = vadd.f32 %v4976_v11, %v4753_v7  ;;  %v1322_v7 = vmax.f32 %v1137_v27, 0.0  ;;  %v1176_v27 = vadd.f32 %v4976_v11, %v4795_v48 }
 0x27c   : > { %v1191_v48 = vadd.f32 %v4976_v11, %v4827_v16 }
 0x27d   : > { %v1386_v46 = vmax.f32 %v1322_v7, %v1330_v23  ;;  %v1203_v7 = vadd.f32 %v4976_v11, %v4858_v53 }
 0x280   : > { %v4953_v45 = vpop.f32.mrf.mxu1 }
 0x283   : > { %4132 = vmatmul.msk.f32.gmra.mxu2 %vm917_vm1, %v907_v20 }
 0x288   : > { %v4955_v47 = vpop.f32.mrf.mxu1 }
 0x28b   : > { %4133 = vmatmul.msk.f32.gmra.mxu2 %vm917_vm1, %v908_v33  ;;  %v1152_v33 = vadd.f32 %v4976_v11, %v4747_v2  ;;  %v1320_v2 = vmax.f32 %v1131_v15, 0.0 }
 0x28d   : > { %v1327_v56 = vmax.f32 %v1152_v33, 0.0 }
 0x290   : > { %v4957_v21 = vpop.f32.mrf.mxu1 }
 0x291   : > { %7152 = vst [vmem:[#allocation2_spill] sm:$0xff] %v4957_v21  ;;  %v1321_v21 = vmax.f32 %v1134_v19, 0.0  ;;  %v1329_v19 = vmax.f32 %v1158_v41, 0.0  ;;  %v1334_v41 = vmax.f32 %v1173_v17, 0.0 }
 0x298   : > { %v4959_v52 = vpop.f32.mrf.mxu1 }
 0x299   : > { %7153 = vst [vmem:[#allocation3_spill] sm:$0xff] %v4959_v52  ;;  %v1323_v52 = vmax.f32 %v1140_v28, 0.0  ;;  %v1179_v28 = vadd.f32 %v4976_v11, %v4801_v54  ;;  %v1385_v54 = vmax.f32 %v1321_v21, %v1329_v19  ;;  %v1340_v21 = vmax.f32 %v1191_v48, 0.0 }
 0x29a   : > { %v1242_v48 = vadd.f32 %v4976_v11, %v4922_v50 }
 0x29b   : > { %v1336_v3 = vmax.f32 %v1179_v28, 0.0  ;;  %v1215_v28 = vadd.f32 %v4976_v11, %v4880_v22  ;;  %v1236_v22 = vadd.f32 %v4976_v11, %v4912_v24  ;;  %v5070_v24 = vadd.f32 %v4976_v11, %v4894_v49 }
 0x2a0   : > { %v4961_v55 = vpop.f32.mrf.mxu1 }
 0x2a1   : > { %7154 = vst [vmem:[#allocation4_spill] sm:$0xff] %v4961_v55  ;;  %v1328_v55 = vmax.f32 %v1155_v31, 0.0 }
 0x2a3   : > { %v1384_v31 = vmax.f32 %v1320_v2, %v1328_v55  ;;  %v1200_v2 = vadd.f32 %v4976_v11, %v4851_v44  ;;  %v1212_v44 = vadd.f32 %v4976_v11, %v4876_v14 }
 0x2a5   : > { %v1392_v19 = vmax.f32 %v1384_v31, %v1336_v3  ;;  %v1347_v31 = vmax.f32 %v1212_v44, 0.0  ;;  %v1355_v3 = vmax.f32 %v1236_v22, 0.0 }
 0x2a8   : > { %v4965_v62 = vpop.f32.mrf.mxu1 }
 0x2a9   : > { %7156 = vst [vmem:[#allocation6_spill] sm:$0xff] %v4965_v62  ;;  %v1331_v62 = vmax.f32 %v1164_v51, 0.0 }
 0x2ab   : > { %v1387_v51 = vmax.f32 %v1323_v52, %v1331_v62  ;;  %v1206_v52 = vadd.f32 %v4976_v11, %v4867_v63  ;;  %v1209_v62 = vadd.f32 %v4976_v11, %v4871_v5  ;;  %v1218_v63 = vadd.f32 %v4976_v11, %v4885_v30 }
 0x2ac   : > { %v1221_v5 = vadd.f32 %v4976_v11, %v4889_v38  ;;  %v1348_v30 = vmax.f32 %v1215_v28, 0.0  ;;  %v1239_v38 = vadd.f32 %v4976_v11, %v4916_v39 }
 0x2ad   : > { %v1346_v14 = vmax.f32 %v1209_v62, 0.0 }
 0x2b0   : > { %v4971_v6 = vpop.f32.mrf.mxu1 }
 0x2d6   : > { %v4963_v57 = vpop.f32.mrf.mxu2 }
 0x2d7   : > { %7155 = vst [vmem:[#allocation5_spill] sm:$0xff] %v4963_v57  ;;  %v1149_v57 = vadd.f32 %v4976_v11, %v4741_v61  ;;  %v1167_v61 = vadd.f32 %v4976_v11, %v4777_v29  ;;  %v1182_v29 = vadd.f32 %v4976_v11, %v4807_v60  ;;  %v1194_v60 = vadd.f32 %v4976_v11, %v4835_v25 }
 0x2d9   : > { %v1326_v15 = vmax.f32 %v1149_v57, 0.0  ;;  %v1188_v57 = vadd.f32 %v4976_v11, %v4819_v9  ;;  %v1338_v9 = vmax.f32 %v1185_v42, 0.0  ;;  %v1341_v17 = vmax.f32 %v1194_v60, 0.0 }
 0x2da   : > { %v1350_v60 = vmax.f32 %v1221_v5, 0.0  ;;  %v1257_v5 = vadd.f32 %v4976_v11, %v4943_v37 }
 0x2db   : > { %v1339_v55 = vmax.f32 %v1188_v57, 0.0  ;;  %v1390_v16 = vmax.f32 %v1326_v15, %v1334_v41  ;;  %v1394_v15 = vmax.f32 %v1386_v46, %v1338_v9  ;;  %v1345_v57 = vmax.f32 %v1206_v52, 0.0 }
 0x2dc   : > { %v1233_v41 = vadd.f32 %v4976_v11, %v4907_v10  ;;  %v1349_v46 = vmax.f32 %v1218_v63, 0.0 }
 0x2dd   : > { %v1395_v53 = vmax.f32 %v1387_v51, %v1339_v55  ;;  %v5074_v51 = vadd.f32 %v4976_v11, %v4898_v58  ;;  %v1351_v58 = vmax.f32 %v5070_v24, 0.0 }
 0x2de   : > { %v4967_v0 = vpop.f32.mrf.mxu2  ;;  %v1354_v50 = vmax.f32 %v1233_v41, 0.0  ;;  %v7161_v41 = vld [vmem:[#allocation6_spill] sm:$0xff] }
 0x2df   : > { %7157 = vst [vmem:[#allocation7_spill] sm:$0xff] %v4967_v0  ;;  %v1319_v0 = vmax.f32 %v1128_v13, 0.0  ;;  %v1325_v13 = vmax.f32 %v1146_v36, 0.0  ;;  %v1333_v36 = vmax.f32 %v1170_v12, 0.0  ;;  %v1403_v39 = vmax.f32 %v1395_v53, %v1347_v31 }
 0x2e1   : > { %v1383_v35 = vmax.f32 %v1319_v0, %v1327_v56  ;;  %v1197_v0 = vadd.f32 %v4976_v11, %v4843_v34  ;;  %v1335_v56 = vmax.f32 %v1176_v27, 0.0  ;;  %v1389_v12 = vmax.f32 %v1325_v13, %v1333_v36 }
 0x2e2   : > { %v1343_v27 = vmax.f32 %v1200_v2, 0.0  ;;  %v1230_v36 = vadd.f32 %v4976_v11, %v4903_v1  ;;  %v1245_v1 = vadd.f32 %v4976_v11, %v4926_v59  ;;  %v1356_v2 = vmax.f32 %v1239_v38, 0.0 }
 0x2e3   : > { %v1342_v34 = vmax.f32 %v1197_v0, 0.0  ;;  %v1402_v0 = vmax.f32 %v1394_v15, %v1346_v14  ;;  %v1269_v59 = vadd.f32 %v4976_v11, %v4955_v47  ;;  %v1263_v47 = vadd.f32 %v4976_v11, %v4951_v43 }
 0x2e4   : > { %v1358_v49 = vmax.f32 %v1245_v1, 0.0  ;;  %v7163_v1 = vld [vmem:[#allocation4_spill] sm:$0xff] }
 0x2e5   : > { %v1398_v42 = vmax.f32 %v1390_v16, %v1342_v34  ;;  %v5084_v34 = vadd.f32 %v4976_v11, %v4934_v18  ;;  %v1366_v15 = vmax.f32 %v1269_v59, 0.0 }
 0x2e6   : > { %v4969_v4 = vpop.f32.mrf.mxu2 }
 0x2e7   : > { %7158 = vst [vmem:[#allocation8_spill] sm:$0xff] %v4969_v4  ;;  %v5006_v4 = vpop.f32.mrf.mxu1  ;;  %v1360_v43 = vmax.f32 %v5084_v34, 0.0  ;;  %v7167_v34 = vld [vmem:[#allocation2_spill] sm:$0xff] }
 0x2e8   : > { %v1287_v28 = vadd.f32 %v4976_v11, %v5006_v4 }
 0x2ea   : > { %v1372_v22 = vmax.f32 %v1287_v28, 0.0 }
 0x2ee   : > { %v4984_v20 = vpop.f32.mrf.mxu2  ;;  %v7166_v59 = vld [vmem:[#allocation8_spill] sm:$0xff] }
 0x2ef   : > { %7159 = vst [vmem:[#allocation9_spill] sm:$0xff] %v4984_v20  ;;  %v1324_v20 = vmax.f32 %v1143_v26, 0.0  ;;  %v1332_v26 = vmax.f32 %v1167_v61, 0.0  ;;  %v1337_v61 = vmax.f32 %v1182_v29, 0.0  ;;  %v5036_v25 = vpop.f32.mrf.mxu1 }
 0x2f1   : > { %v1393_v23 = vmax.f32 %v1385_v54, %v1337_v61 }
 0x2f3   : > { %v1401_v10 = vmax.f32 %v1393_v23, %v1345_v57 }
 0x2f6   : > { %v5020_v33 = vpop.f32.mrf.mxu2 }
 0x2f7   : > { %7160 = vst [vmem:[#allocation10_spill] sm:$0xff] %v5020_v33  ;;  %v1388_v33 = vmax.f32 %v1324_v20, %v1332_v26  ;;  %v1391_v20 = vmax.f32 %v1383_v35, %v1335_v56  ;;  %v1344_v26 = vmax.f32 %v1203_v7, 0.0  ;;  %v1397_v35 = vmax.f32 %v1389_v12, %v1341_v17  ;;  %v1292_v61 = vpop.f32.mrf.mxu1 }
 0x2f8   : > { %v1353_v56 = vmax.f32 %v1230_v36, 0.0  ;;  %v1357_v12 = vmax.f32 %v1242_v48, 0.0  ;;  %v1266_v7 = vadd.f32 %v4976_v11, %v4953_v45  ;;  %v1352_v17 = vmax.f32 %v5074_v51, 0.0  ;;  %v7164_v51 = vld [vmem:[#allocation9_spill] sm:$0xff] }
 0x2f9   : > { %v1396_v29 = vmax.f32 %v1388_v33, %v1340_v21  ;;  %v5058_v33 = vmax.f32 %v1391_v20, %v1343_v27  ;;  %v5064_v54 = vmax.f32 %v1392_v19, %v1344_v26  ;;  %v1405_v16 = vmax.f32 %v1397_v35, %v1349_v46 }
 0x2fa   : > { %v1406_v21 = vmax.f32 %v1398_v42, %v1350_v60  ;;  %v1293_v52 = vadd.f32 %v4976_v11, %v1292_v61  ;;  %v1409_v62 = vmax.f32 %v1401_v10, %v1353_v56  ;;  %v1410_v20 = vmax.f32 %v1402_v0, %v1354_v50 }
 0x2fb   : > { %v1404_v55 = vmax.f32 %v1396_v29, %v1348_v30  ;;  %v1411_v19 = vmax.f32 %v1403_v39, %v1355_v3  ;;  %v1413_v44 = vmax.f32 %v1405_v16, %v1357_v12  ;;  %v1290_v45 = vadd.f32 %v4976_v11, %v5036_v25 }
 0x2fc   : > { %v1414_v53 = vmax.f32 %v1406_v21, %v1358_v49  ;;  %v1260_v27 = vadd.f32 %v4976_v11, %v4945_v40  ;;  %v1365_v18 = vmax.f32 %v1266_v7, 0.0  ;;  %v5097_v29 = vadd.f32 %v4976_v11, %v4930_v8 }
 0x2fd   : > { %v1412_v23 = vmax.f32 %v1404_v55, %v1356_v2  ;;  %v1374_v26 = vmax.f32 %v1293_v52, 0.0  ;;  %v1254_v25 = vadd.f32 %v4976_v11, %v4940_v32  ;;  %v1364_v40 = vmax.f32 %v1263_v47, 0.0 }
 0x2fe   : > { %v5044_v13 = vpop.f32.mrf.mxu2  ;;  %v1284_v35 = vadd.f32 %v4976_v11, %v4971_v6  ;;  %v1422_v42 = vmax.f32 %v1414_v53, %v1366_v15  ;;  %v1373_v57 = vmax.f32 %v1290_v45, 0.0  ;;  %v1363_v31 = vmax.f32 %v1260_v27, 0.0  ;;  %v7162_v37 = vld [vmem:[#allocation10_spill] sm:$0xff]  ;;  %v7168_v15 = vld [vmem:[#allocation7_spill] sm:$0xff] }
 0x2ff   : > { %v1311_v8 = vadd.f32 %v4976_v11, %v5044_v13  ;;  %v1421_v36 = vmax.f32 %v1413_v44, %v1365_v18  ;;  %v1281_v32 = vadd.f32 %v4976_v11, %v7161_v41  ;;  %v1308_v38 = vadd.f32 %v4976_v11, %v7162_v37 }
 0x300   : > { %v1430_v30 = vmax.f32 %v1422_v42, %v1374_v26  ;;  %v1362_v46 = vmax.f32 %v1257_v5, 0.0  ;;  %v1420_v60 = vmax.f32 %v1412_v23, %v1364_v40  ;;  %v1278_v10 = vadd.f32 %v4976_v11, %v7163_v1 }
 0x301   : > { %v1371_v13 = vmax.f32 %v1284_v35, 0.0  ;;  %v1429_v0 = vmax.f32 %v1421_v36, %v1373_v57  ;;  %v1305_v39 = vadd.f32 %v4976_v11, %v7164_v51  ;;  %v1380_v56 = vmax.f32 %v1311_v8, 0.0 }
 0x302   : > { %v1361_v3 = vmax.f32 %v1254_v25, 0.0  ;;  %v1419_v61 = vmax.f32 %v1411_v19, %v1363_v31  ;;  %v1370_v2 = vmax.f32 %v1281_v32, 0.0  ;;  %v1428_v12 = vmax.f32 %v1420_v60, %v1372_v22 }
 0x303   : > { %v1302_v16 = vadd.f32 %v4976_v11, %v7166_v59  ;;  %v1379_v21 = vmax.f32 %v1308_v38, 0.0  ;;  %v1418_v7 = vmax.f32 %v1410_v20, %v1362_v46  ;;  %v1272_v52 = vadd.f32 %v4976_v11, %v7167_v34  ;;  %v1768_v34 = vld [vmem:[%s7087_s6 + $0x80] sm:$0xff] }
 0x304   : > { %v1369_v47 = vmax.f32 %v1278_v10, 0.0  ;;  %v1440_v23 = vlaneseq  ;;  %v1427_v44 = vmax.f32 %v1419_v61, %v1371_v13  ;;  %v1299_v19 = vadd.f32 %v4976_v11, %v7168_v15 }
 0x305   : > { %v1378_v45 = vmax.f32 %v1305_v39, 0.0  ;;  %v1436_v53 = vmax.f32 %v1428_v12, %v1380_v56  ;;  %v1408_v27 = vmax.f32 %v5064_v54, %v1352_v17  ;;  %v1359_v18 = vmax.f32 %v5097_v29, 0.0  ;;  %v5140_v54 = vld [vmem:[%s368_s15] ss:$0 sm:$0xff] }
 0x306   : > { %v1313_v9 = vpop.f32.mrf.mxu2  ;;  %v1417_v28 = vmax.f32 %v1409_v62, %v1361_v3  ;;  %v1426_v20 = vmax.f32 %v1418_v7, %v1370_v2  ;;  %v1377_v5 = vmax.f32 %v1302_v16, 0.0  ;;  %v1435_v40 = vmax.f32 %v1427_v44, %v1379_v21  ;;  %v1771_v3 = vld [vmem:[%s7087_s6 + $0x98] sm:$0xff]  ;;  %v1770_v16 = vld [vmem:[%s7087_s6 + $0x90] sm:$0xff]  ;;  %v1769_v7 = vld [vmem:[%s7087_s6 + $0x88] sm:$0xff] }
 0x307   : > { %v1314_v63 = vadd.f32 %v4976_v11, %v1313_v9  ;;  %v7165_v9 = vld [vmem:[#allocation3_spill] sm:$0xff]  ;;  %v1407_v35 = vmax.f32 %v5058_v33, %v1351_v58  ;;  %v5133_v42 = vshrl.u32 %v1440_v23, 7  ;;  %v1367_v17 = vmax.f32 %v1272_v52, 0.0  ;;  %2853 = vmatpush.msrb.mxu1 %v1771_v3 }
 0x308   : > { %v1275_v55 = vadd.f32 %v4976_v11, %v7165_v9  ;;  %v1425_v62 = vmax.f32 %v1417_v28, %v1369_v47  ;;  %v1376_v29 = vmax.f32 %v1299_v19, 0.0  ;;  %v7093_v31 = vmov 0.0  }
 0x309   : > { %v1381_v48 = vmax.f32 %v1314_v63, 0.0  ;;  %v7169_v63 = vld [vmem:[#allocation5_spill] sm:$0xff]  ;;  %v1415_v57 = vmax.f32 %v1407_v35, %v1359_v18  ;;  %vm1474_vm2 = vcmp.eq.s32.totalorder %v5133_v42, %v5140_v54  ;;  %v5146_v41 = vadd.s32 8, %v5133_v42  ;;  %2854 = vmatpush.msrb.mxu1 %v1770_v16  ;;  %v1756_v35 = vld [vmem:[%s7087_s6 + $0x20] sm:$0xff] }
 0x30a   : > { %v1368_v26 = vmax.f32 %v1275_v55, 0.0  ;;  %v1296_v25 = vadd.f32 %v4976_v11, %v7169_v63  ;;  %v1433_v24 = vmax.f32 %v1425_v62, %v1377_v5  ;;  %v1506_v36 = vsel %vm1474_vm2, 1.0, %v7093_v31  ;;  %v1758_v63 = vld [vmem:[%s7087_s6 + $0x30] sm:$0xff] }
 0x30b   : > { %v1437_v49 = vmax.f32 %v1429_v0, %v1381_v48  ;;  %v1423_v33 = vmax.f32 %v1415_v57, %v1367_v17  ;;  %vm1475_vm4 = vcmp.eq.s32.totalorder %v5146_v41, %v5140_v54  ;;  %v1443_v22 = vadd.s32 16, %v5133_v42  ;;  %v1767_v0 = vld [vmem:[%s7087_s6 + $0x78] sm:$0xff]  ;;  %2855 = vmatpush.msrb.mxu1 %v1769_v7 }
 0x30c   : > { %v1507_v32 = vsel %vm1475_vm4, 1.0, %v7093_v31  ;;  %v1444_v37 = vadd.s32 24, %v5133_v42  ;;  %v1445_v48 = vadd.s32 32, %v5133_v42  ;;  %v1446_v46 = vadd.s32 40, %v5133_v42  ;;  %2704 = vmatpush.msrb.mxu0 %v1767_v0 }
 0x30d   : > { %vm1476_vm5 = vcmp.eq.s32.totalorder %v1443_v22, %v5140_v54  ;;  %v1447_v1 = vadd.s32 48, %v5133_v42  ;;  %v1448_v13 = vadd.s32 56, %v5133_v42  ;;  %v1449_v39 = vadd.s32 64, %v5133_v42  ;;  %2856 = vmatpush.msrb.mxu1 %v1768_v34 }
 0x30e   : > { %v1316_v4 = vpop.f32.mrf.mxu2  ;;  %vm1477_vm6 = vcmp.eq.s32.totalorder %v1444_v37, %v5140_v54  ;;  %vm1478_vm7 = vcmp.eq.s32.totalorder %v1445_v48, %v5140_v54  ;;  %vm1479_vm8 = vcmp.eq.s32.totalorder %v1446_v46, %v5140_v54  ;;  %v1451_v9 = vadd.s32 80, %v5133_v42  ;;  %v1755_v46 = vld [vmem:[%s7087_s6 + $0x18] sm:$0xff] }
 0x30f   : > { %v1317_v14 = vadd.f32 %v4976_v11, %v1316_v4  ;;  %v1416_v4 = vmax.f32 %v1408_v27, %v1360_v43  ;;  %v1434_v11 = vmax.f32 %v1426_v20, %v1378_v45  ;;  %v1509_v38 = vsel %vm1477_vm6, 1.0, %v7093_v31  ;;  %v1759_v20 = vld [vmem:[%s7087_s6 + $0x38] sm:$0xff] }
 0x310   : > { %v1511_v60 = vsel %vm1479_vm8, 1.0, %v7093_v31  ;;  %vm1480_vm9 = vcmp.eq.s32.totalorder %v1447_v1, %v5140_v54  ;;  %vm1481_vm10 = vcmp.eq.s32.totalorder %v1448_v13, %v5140_v54  ;;  %vm1482_vm11 = vcmp.eq.s32.totalorder %v1449_v39, %v5140_v54  ;;  %4483 = vmatpush.msra.mxu3 %v1759_v20 }
 0x311   : > { %v1382_v6 = vmax.f32 %v1317_v14, 0.0  ;;  %v1424_v8 = vmax.f32 %v1416_v4, %v1368_v26  ;;  %v1375_v14 = vmax.f32 %v1296_v25, 0.0  ;;  %v1512_v10 = vsel %vm1480_vm9, 1.0, %v7093_v31 }
 0x312   : > { %v1513_v51 = vsel %vm1481_vm10, 1.0, %v7093_v31  ;;  %v1514_v56 = vsel %vm1482_vm11, 1.0, %v7093_v31  ;;  %vm1484_vm13 = vcmp.eq.s32.totalorder %v1451_v9, %v5140_v54  ;;  %v1452_v2 = vadd.s32 88, %v5133_v42  ;;  %4484 = vmatpush.msra.mxu3 %v1758_v63 }
 0x313   : > { %v1438_v50 = vmax.f32 %v1430_v30, %v1382_v6  ;;  %v1432_v58 = vmax.f32 %v1424_v8, %v1376_v29  ;;  %v1431_v43 = vmax.f32 %v1423_v33, %v1375_v14  ;;  %v1508_v30 = vsel %vm1476_vm5, 1.0, %v7093_v31  ;;  %v1766_v33 = vld [vmem:[%s7087_s6 + $0x70] sm:$0xff] }
 0x314   : > { %v1510_v6 = vsel %vm1478_vm7, 1.0, %v7093_v31  ;;  %v1516_v55 = vsel %vm1484_vm13, 1.0, %v7093_v31  ;;  %vm1485_vm14 = vcmp.eq.s32.totalorder %v1452_v2, %v5140_v54  ;;  %v1453_v59 = vadd.s32 96, %v5133_v42  ;;  %2705 = vmatpush.msrb.mxu0 %v1766_v33 }
 0x315   : > { %1643 = vmatpush.msra.mxu2 %v1438_v50  ;;  %v1450_v50 = vadd.s32 72, %v5133_v42  ;;  %v1517_v12 = vsel %vm1485_vm14, 1.0, %v7093_v31  ;;  %v1455_v47 = vadd.s32 112, %v5133_v42  ;;  %v1456_v44 = vadd.s32 120, %v5133_v42 }
 0x316   : > { %vm1486_vm15 = vcmp.eq.s32.totalorder %v1453_v59, %v5140_v54  ;;  %v1457_v19 = vadd.s32 128, %v5133_v42  ;;  %v1459_v28 = vadd.s32 144, %v5133_v42  ;;  %v1460_v5 = vadd.s32 152, %v5133_v42 }
 0x317   : > { %1644 = vmatpush.msra.mxu2 %v1437_v49  ;;  %vm1483_vm12 = vcmp.eq.s32.totalorder %v1450_v50, %v5140_v54  ;;  %v1518_v21 = vsel %vm1486_vm15, 1.0, %v7093_v31  ;;  %v1454_v49 = vadd.s32 104, %v5133_v42  ;;  %vm1488_vm2 = vcmp.eq.s32.totalorder %v1455_v47, %v5140_v54 }
 0x318   : > { %v1515_v61 = vsel %vm1483_vm12, 1.0, %v7093_v31  ;;  %v1520_v23 = vsel %vm1488_vm2, 1.0, %v7093_v31  ;;  %vm1489_vm4 = vcmp.eq.s32.totalorder %v1456_v44, %v5140_v54  ;;  %vm1490_vm5 = vcmp.eq.s32.totalorder %v1457_v19, %v5140_v54  ;;  %v1763_v19 = vld [vmem:[%s7087_s6 + $0x58] sm:$0xff] }
 0x319   : > { %1645 = vmatpush.msra.mxu2 %v1436_v53  ;;  %vm1487_vm0 = vcmp.eq.s32.totalorder %v1454_v49, %v5140_v54  ;;  %v1521_v15 = vsel %vm1489_vm4, 1.0, %v7093_v31  ;;  %v1522_v45 = vsel %vm1490_vm5, 1.0, %v7093_v31  ;;  %v1458_v53 = vadd.s32 136, %v5133_v42  ;;  %v1754_v49 = vld [vmem:[%s7087_s6 + $0x10] sm:$0xff] }
 0x31a   : > { %v1519_v52 = vsel %vm1487_vm0, 1.0, %v7093_v31  ;;  %vm1492_vm7 = vcmp.eq.s32.totalorder %v1459_v28, %v5140_v54  ;;  %vm1493_vm8 = vcmp.eq.s32.totalorder %v1460_v5, %v5140_v54  ;;  %v1461_v62 = vadd.s32 160, %v5133_v42  ;;  %v1765_v28 = vld [vmem:[%s7087_s6 + $0x68] sm:$0xff] }
 0x31b   : > { %1646 = vmatpush.msra.mxu2 %v1435_v40  ;;  %vm1491_vm6 = vcmp.eq.s32.totalorder %v1458_v53, %v5140_v54  ;;  %v1524_v25 = vsel %vm1492_vm7, 1.0, %v7093_v31  ;;  %v1757_v40 = vld [vmem:[%s7087_s6 + $0x28] sm:$0xff]  ;;  %v1525_v17 = vsel %vm1493_vm8, 1.0, %v7093_v31  ;;  %v1462_v57 = vadd.s32 168, %v5133_v42  ;;  %v1762_v53 = vld [vmem:[%s7087_s6 + $0x50] sm:$0xff]  ;;  %2706 = vmatpush.msrb.mxu0 %v1765_v28 }
 0x31c   : > { %v1523_v18 = vsel %vm1491_vm6, 1.0, %v7093_v31  ;;  %4485 = vmatpush.msra.mxu3 %v1757_v40  ;;  %vm1494_vm9 = vcmp.eq.s32.totalorder %v1461_v62, %v5140_v54  ;;  %v1466_v48 = vadd.s32 200, %v5133_v42  ;;  %v1467_v1 = vadd.s32 208, %v5133_v42 }
 0x31d   : > { %1647 = vmatpush.msra.mxu2 %v1434_v11  ;;  %v1526_v11 = vsel %vm1494_vm9, 1.0, %v7093_v31  ;;  %vm1495_vm10 = vcmp.eq.s32.totalorder %v1462_v57, %v5140_v54  ;;  %v1468_v0 = vadd.s32 216, %v5133_v42  ;;  %v1471_v2 = vadd.s32 240, %v5133_v42 }
 0x31e   : > { %4486 = vmatpush.msra.mxu3 %v1756_v35  ;;  %v1527_v14 = vsel %vm1495_vm10, 1.0, %v7093_v31  ;;  %vm1499_vm14 = vcmp.eq.s32.totalorder %v1466_v48, %v5140_v54  ;;  %vm1500_vm15 = vcmp.eq.s32.totalorder %v1467_v1, %v5140_v54  ;;  %v1472_v16 = vadd.s32 248, %v5133_v42 }
 0x31f   : > { %1648 = vmatpush.msra.mxu2 %v1433_v24  ;;  %v1463_v24 = vadd.s32 176, %v5133_v42  ;;  %v1532_v13 = vsel %vm1500_vm15, 1.0, %v7093_v31  ;;  %vm1501_vm0 = vcmp.eq.s32.totalorder %v1468_v0, %v5140_v54  ;;  %vm1504_vm5 = vcmp.eq.s32.totalorder %v1471_v2, %v5140_v54  ;;  %v1752_v0 = vld [vmem:[%s7087_s6] sm:$0xff] }
 0x320   : > { %2220 = vmatpush.msrb.mxu3 %v1755_v46  ;;  %v1533_v39 = vsel %vm1501_vm0, 1.0, %v7093_v31  ;;  %v1536_v59 = vsel %vm1504_vm5, 1.0, %v7093_v31  ;;  %vm1505_vm6 = vcmp.eq.s32.totalorder %v1472_v16, %v5140_v54  ;;  %vm1751_vm7 = vcmp.lt.s32.totalorder %v5146_v41, 15  ;;  %v1787_v16 = vld [vmem:[%s7087_s6 + $0x118] sm:$0xff] }
 0x321   : > { %1649 = vmatpush.msra.mxu2 %v1432_v58  ;;  %vm1496_vm11 = vcmp.eq.s32.totalorder %v1463_v24, %v5140_v54  ;;  %v1537_v7 = vsel %vm1505_vm6, 1.0, %v7093_v31  ;;  %3447 = vmatpush.msra.mxu1 %v1787_v16  ;;  %vm1821_vm8 = vcmask 1040384   ;;  %vm1748_vm9 = vcmp.ge.s32.totalorder %v5133_v42, 1 }
 0x322   : > { %2221 = vmatpush.msrb.mxu3 %v1754_v49  ;;  %v1764_v49 = vld [vmem:[%s7087_s6 + $0x60] sm:$0xff] }
 0x323   : > { %1650 = vmatpush.msra.mxu2 %v1431_v43  ;;  %v1528_v43 = vsel %vm1496_vm11, 1.0, %v7093_v31  ;;  %2707 = vmatpush.msrb.mxu0 %v1764_v49 }
 0x324   : > { %4134 = vmatmul.msk.f32.vlgmr.msra.gmra.mxu2 %vm1538_vm3, %v1506_v36  ;;  %v1464_v36 = vadd.s32 184, %v5133_v42 }
 0x325   : > { %2017 = vmatpush.msrb.mxu2 %v1759_v20  ;;  %v1761_v20 = vld [vmem:[%s7087_s6 + $0x48] sm:$0xff] }
 0x326   : > { %vm1497_vm12 = vcmp.eq.s32.totalorder %v1464_v36, %v5140_v54 }
 0x327   : > { %2018 = vmatpush.msrb.mxu2 %v1758_v63  ;;  %v1529_v22 = vsel %vm1497_vm12, 1.0, %v7093_v31  ;;  %v1760_v63 = vld [vmem:[%s7087_s6 + $0x40] sm:$0xff] }
 0x329   : > { %2019 = vmatpush.msrb.mxu2 %v1757_v40  ;;  %v1753_v40 = vld [vmem:[%s7087_s6 + $0x8] sm:$0xff] }
 0x32a   : > { %2222 = vmatpush.msrb.mxu3 %v1753_v40 }
 0x32b   : > { %2020 = vmatpush.msrb.mxu2 %v1756_v35 }
 0x32c   : > { %4135 = vmatmul.msk.f32.gmra.mxu2 %vm1538_vm3, %v1507_v32  ;;  %2223 = vmatpush.msrb.mxu3 %v1752_v0 }
 0x32d   : > { %2546 = vmatpush.msra.mxu2 %v1763_v19 }
 0x32f   : > { %2547 = vmatpush.msra.mxu2 %v1762_v53 }
 0x331   : > { %2548 = vmatpush.msra.mxu2 %v1761_v20  ;;  %v1785_v20 = vld [vmem:[%s7087_s6 + $0x108] sm:$0xff] }
 0x333   : > { %2549 = vmatpush.msra.mxu2 %v1760_v63  ;;  %v1784_v63 = vld [vmem:[%s7087_s6 + $0x100] sm:$0xff] }
 0x334   : > { %4136 = vmatmul.msk.f32.gmra.mxu2 %vm1538_vm3, %v1508_v30  ;;  %v1465_v30 = vadd.s32 192, %v5133_v42 }
 0x336   : > { %vm1498_vm13 = vcmp.eq.s32.totalorder %v1465_v30, %v5140_v54 }
 0x33c   : > { %4137 = vmatmul.msk.f32.gmra.mxu2 %vm1538_vm3, %v1509_v38  ;;  %v1530_v38 = vsel %vm1498_vm13, 1.0, %v7093_v31 }
 0x344   : > { %4138 = vmatmul.msk.f32.gmra.mxu2 %vm1538_vm3, %v1510_v6 }
 0x34c   : > { %4139 = vmatmul.msk.f32.gmra.mxu2 %vm1538_vm3, %v1511_v60  ;;  %v1531_v60 = vsel %vm1499_vm14, 1.0, %v7093_v31 }
 0x354   : > { %4140 = vmatmul.msk.f32.gmra.mxu2 %vm1538_vm3, %v1512_v10 }
 0x35c   : > { %4141 = vmatmul.msk.f32.gmra.mxu2 %vm1538_vm3, %v1513_v51 }
 0x364   : > { %4142 = vmatmul.msk.f32.gmra.mxu2 %vm1538_vm3, %v1514_v56  ;;  %v1469_v56 = vadd.s32 224, %v5133_v42 }
 0x366   : > { %vm1502_vm2 = vcmp.eq.s32.totalorder %v1469_v56, %v5140_v54 }
 0x367   : > { %v1534_v3 = vsel %vm1502_vm2, 1.0, %v7093_v31 }
 0x36c   : > { %4143 = vmatmul.msk.f32.gmra.mxu2 %vm1538_vm3, %v1515_v61  ;;  %v1470_v61 = vadd.s32 232, %v5133_v42  ;;  %v7301_v42 = vmov 0.0  }
 0x36e   : > { %vm1503_vm4 = vcmp.eq.s32.totalorder %v1470_v61, %v5140_v54 }
 0x374   : > { %4144 = vmatmul.msk.f32.gmra.mxu2 %vm1538_vm3, %v1516_v55  ;;  %v1535_v55 = vsel %vm1503_vm4, 1.0, %v7093_v31 }
 0x37c   : > { %4145 = vmatmul.msk.f32.gmra.mxu2 %vm1538_vm3, %v1517_v12 }
 0x384   : > { %4146 = vmatmul.msk.f32.gmra.mxu2 %vm1538_vm3, %v1518_v21 }
 0x38c   : > { %4147 = vmatmul.msk.f32.gmra.mxu2 %vm1538_vm3, %v1519_v52 }
 0x394   : > { %4148 = vmatmul.msk.f32.gmra.mxu2 %vm1538_vm3, %v1520_v23 }
 0x39c   : > { %4149 = vmatmul.msk.f32.gmra.mxu2 %vm1538_vm3, %v1521_v15 }
 0x3a4   : > { %4150 = vmatmul.msk.f32.gmra.mxu2 %vm1538_vm3, %v1522_v45 }
 0x3a7   : > { %v5230_v27 = vpop.f32.mrf.mxu2 }
 0x3a8   : > { %4288 = vmatmul.msk.f32.vlgmr.msrb.gmra.mxu1 %vm917_vm1, %v5230_v27  ;;  %v7092_v48 = vrot.slane %v5230_v27, 1 }
 0x3ac   : > { %4151 = vmatmul.msk.f32.gmra.mxu2 %vm1538_vm3, %v1523_v18 }
 0x3af   : > { %v5238_v26 = vpop.f32.mrf.mxu2 }
 0x3b0   : > { %4289 = vmatmul.msk.f32.gmra.mxu1 %vm917_vm1, %v5238_v26 }
 0x3b4   : > { %4152 = vmatmul.msk.f32.gmra.mxu2 %vm1538_vm3, %v1524_v25 }
 0x3b7   : > { %v5258_v4 = vpop.f32.mrf.mxu2 }
 0x3b8   : > { %7170 = vst [vmem:[#allocation6_spill] sm:$0xff] %v5258_v4  ;;  %4290 = vmatmul.msk.f32.gmra.mxu1 %vm917_vm1, %v5258_v4 }
 0x3bc   : > { %4153 = vmatmul.msk.f32.gmra.mxu2 %vm1538_vm3, %v1525_v17 }
 0x3bf   : > { %v5266_v29 = vpop.f32.mrf.mxu2 }
 0x3c0   : > { %7171 = vst [vmem:[#allocation10_spill] sm:$0xff] %v5266_v29  ;;  %4291 = vmatmul.msk.f32.gmra.mxu1 %vm917_vm1, %v5266_v29 }
 0x3c4   : > { %4154 = vmatmul.msk.f32.gmra.mxu2 %vm1538_vm3, %v1526_v11 }
 0x3c7   : > { %v5274_v8 = vpop.f32.mrf.mxu2 }
 0x3c8   : > { %7172 = vst [vmem:[#allocation4_spill] sm:$0xff] %v5274_v8  ;;  %4292 = vmatmul.msk.f32.gmra.mxu1 %vm917_vm1, %v5274_v8  ;;  %v2330_v28 = vrot.slane %v5274_v8, 1 }
 0x3cc   : > { %4155 = vmatmul.msk.f32.gmra.mxu2 %vm1538_vm3, %v1527_v14 }
 0x3cf   : > { %v5285_v58 = vpop.f32.mrf.mxu2 }
 0x3d0   : > { %7173 = vst [vmem:[#allocation9_spill] sm:$0xff] %v5285_v58  ;;  %4293 = vmatmul.msk.f32.gmra.mxu1 %vm917_vm1, %v5285_v58  ;;  %v2332_v49 = vrot.slane %v5285_v58, 1 }
 0x3d4   : > { %4156 = vmatmul.msk.f32.gmra.mxu2 %vm1538_vm3, %v1528_v43 }
 0x3d7   : > { %v5293_v32 = vpop.f32.mrf.mxu2 }
 0x3d8   : > { %7174 = vst [vmem:[#allocation3_spill] sm:$0xff] %v5293_v32  ;;  %4172 = vmatmul.msk.f32.vlgmr.msra.gmra.mxu3 %vm917_vm1, %v5293_v32  ;;  %4294 = vmatmul.msk.f32.gmra.mxu1 %vm917_vm1, %v5293_v32 }
 0x3dc   : > { %4157 = vmatmul.msk.f32.gmra.mxu2 %vm1538_vm3, %v1529_v22 }
 0x3df   : > { %v5303_v37 = vpop.f32.mrf.mxu2 }
 0x3e0   : > { %7175 = vst [vmem:[#allocation8_spill] sm:$0xff] %v5303_v37  ;;  %4173 = vmatmul.msk.f32.gmra.mxu3 %vm917_vm1, %v5303_v37  ;;  %4295 = vmatmul.msk.f32.gmra.mxu1 %vm917_vm1, %v5303_v37 }
 0x3e4   : > { %4158 = vmatmul.msk.f32.gmra.mxu2 %vm1538_vm3, %v1530_v38  ;;  %v2324_v38 = vrot.slane %v5238_v26, 1 }
 0x3e7   : > { %v5313_v6 = vpop.f32.mrf.mxu2 }
 0x3e8   : > { %7176 = vst [vmem:[#allocation2_spill] sm:$0xff] %v5313_v6  ;;  %4174 = vmatmul.msk.f32.gmra.mxu3 %vm917_vm1, %v5313_v6  ;;  %4296 = vmatmul.msk.f32.gmra.mxu1 %vm917_vm1, %v5313_v6 }
 0x3ec   : > { %4159 = vmatmul.msk.f32.gmra.mxu2 %vm1538_vm3, %v1531_v60 }
 0x3ef   : > { %v5326_v10 = vpop.f32.mrf.mxu2 }
 0x3f0   : > { %7177 = vst [vmem:[#allocation7_spill] sm:$0xff] %v5326_v10  ;;  %4175 = vmatmul.msk.f32.gmra.mxu3 %vm917_vm1, %v5326_v10  ;;  %4297 = vmatmul.msk.f32.gmra.mxu1 %vm917_vm1, %v5326_v10 }
 0x3f4   : > { %4160 = vmatmul.msk.f32.gmra.mxu2 %vm1538_vm3, %v1532_v13  ;;  %v2326_v13 = vrot.slane %v5258_v4, 1 }
 0x3f7   : > { %v5336_v51 = vpop.f32.mrf.mxu2 }
 0x3f8   : > { %7178 = vst [vmem:[#allocation5_spill] sm:$0xff] %v5336_v51  ;;  %4176 = vmatmul.msk.f32.gmra.mxu3 %vm917_vm1, %v5336_v51  ;;  %4298 = vmatmul.msk.f32.gmra.mxu1 %vm917_vm1, %v5336_v51 }
 0x3fc   : > { %4161 = vmatmul.msk.f32.gmra.mxu2 %vm1538_vm3, %v1533_v39 }
 0x3ff   : > { %v5346_v50 = vpop.f32.mrf.mxu2 }
 0x400   : > { %7179 = vst [vmem:[#allocation11_spill] sm:$0xff] %v5346_v50  ;;  %4177 = vmatmul.msk.f32.gmra.mxu3 %vm917_vm1, %v5346_v50  ;;  %4299 = vmatmul.msk.f32.gmra.mxu1 %vm917_vm1, %v5346_v50 }
 0x404   : > { %4162 = vmatmul.msk.f32.gmra.mxu2 %vm1538_vm3, %v1534_v3 }
 0x407   : > { %v5356_v9 = vpop.f32.mrf.mxu2 }
 0x408   : > { %7180 = vst [vmem:[#allocation12_spill] sm:$0xff] %v5356_v9  ;;  %4178 = vmatmul.msk.f32.gmra.mxu3 %vm917_vm1, %v5356_v9  ;;  %4300 = vmatmul.msk.f32.gmra.mxu1 %vm917_vm1, %v5356_v9 }
 0x40c   : > { %4163 = vmatmul.msk.f32.gmra.mxu2 %vm1538_vm3, %v1535_v55 }
 0x40f   : > { %v5366_v12 = vpop.f32.mrf.mxu2 }
 0x410   : > { %7181 = vst [vmem:[#allocation13_spill] sm:$0xff] %v5366_v12  ;;  %4179 = vmatmul.msk.f32.gmra.mxu3 %vm917_vm1, %v5366_v12  ;;  %4301 = vmatmul.msk.f32.gmra.mxu1 %vm917_vm1, %v5366_v12 }
 0x414   : > { %4164 = vmatmul.msk.f32.gmra.mxu2 %vm1538_vm3, %v1536_v59  ;;  %v2328_v59 = vrot.slane %v5266_v29, 1 }
 0x417   : > { %v5376_v21 = vpop.f32.mrf.mxu2 }
 0x418   : > { %7182 = vst [vmem:[#allocation14_spill] sm:$0xff] %v5376_v21  ;;  %4180 = vmatmul.msk.f32.gmra.mxu3 %vm917_vm1, %v5376_v21  ;;  %4302 = vmatmul.msk.f32.gmra.mxu1 %vm917_vm1, %v5376_v21 }
 0x41c   : > { %4165 = vmatmul.msk.f32.gmra.mxu2 %vm1538_vm3, %v1537_v7  ;;  %vm2322_vm3 = vcmask 1046528   ;;  %v1786_v7 = vld [vmem:[%s7087_s6 + $0x110] sm:$0xff] }
 0x41d   : > { %v5518_v60 = vsel %vm2322_vm3, %v7092_v48, %v2324_v38  ;;  %v2327_v56 = vsel %vm2322_vm3, %v2324_v38, %v2326_v13  ;;  %v5565_v53 = vsel %vm2322_vm3, %v2326_v13, %v2328_v59  ;;  %3448 = vmatpush.msra.mxu1 %v1786_v7  ;;  %v2331_v13 = vsel %vm2322_vm3, %v2328_v59, %v2330_v28 }
 0x41e   : > { %7196 = vst [vmem:[#allocation28_spill] sm:$0xff] %v5518_v60  ;;  %v5540_v61 = vsel %vm1751_vm7, %v2327_v56, 0.0  ;;  %v5589_v56 = vsel %vm1751_vm7, %v2331_v13, 0.0 }
 0x41f   : > { %v5387_v34 = vpop.f32.mrf.mxu2  ;;  %7198 = vst [vmem:[#allocation30_spill] sm:$0xff] %v5540_v61  ;;  %3449 = vmatpush.msra.mxu1 %v1785_v20  ;;  %v5605_v20 = vsel %vm2322_vm3, %v2330_v28, %v2332_v49 }
 0x420   : > { %7183 = vst [vmem:[#allocation15_spill] sm:$0xff] %v5387_v34  ;;  %4181 = vmatmul.msk.f32.gmra.mxu3 %vm917_vm1, %v5387_v34  ;;  %4303 = vmatmul.msk.f32.gmra.mxu1 %vm917_vm1, %v5387_v34 }
 0x421   : > { %7200 = vst [vmem:[#allocation32_spill] sm:$0xff] %v5565_v53  ;;  %3450 = vmatpush.msra.mxu1 %v1784_v63  ;;  %v2334_v63 = vrot.slane %v5293_v32, 1 }
 0x422   : > { %7202 = vst [vmem:[#allocation34_spill] sm:$0xff] %v5589_v56 }
 0x423   : > { %7204 = vst [vmem:[#allocation36_spill] sm:$0xff] %v5605_v20  ;;  %v2335_v48 = vsel %vm2322_vm3, %v2332_v49, %v2334_v63  ;;  %v7209_v49 = vmov 0.0  }
 0x424   : > { %2021 = vmatmul.f32.vlgmr.msrb.gmra.mxu2 %v7093_v31  ;;  %v5620_v28 = vsel %vm1751_vm7, %v2335_v48, 0.0 }
 0x425   : > { %v5394_v54 = vpop.f32.mrf.mxu1  ;;  %7207 = vst [vmem:[#allocation39_spill] sm:$0xff] %v5620_v28 }
 0x426   : > { %7184 = vst [vmem:[#allocation16_spill] sm:$0xff] %v5394_v54 }
 0x427   : > { %v5396_v52 = vpop.f32.mrf.mxu2 }
 0x428   : > { %7185 = vst [vmem:[#allocation17_spill] sm:$0xff] %v5396_v52  ;;  %4182 = vmatmul.msk.f32.gmra.mxu3 %vm917_vm1, %v5396_v52  ;;  %4304 = vmatmul.msk.f32.gmra.mxu1 %vm917_vm1, %v5396_v52 }
 0x42c   : > { %2024 = vmatmul.f32.gmra.mxu2 %v7093_v31 }
 0x42d   : > { %v5403_v47 = vpop.f32.mrf.mxu1 }
 0x42e   : > { %7186 = vst [vmem:[#allocation18_spill] sm:$0xff] %v5403_v47  ;;  %v2340_v47 = vrot.slane %v5326_v10, 1 }
 0x42f   : > { %v5405_v23 = vpop.f32.mrf.mxu2 }
 0x430   : > { %4183 = vmatmul.msk.f32.gmra.mxu3 %vm917_vm1, %v5405_v23  ;;  %4305 = vmatmul.msk.f32.gmra.mxu1 %vm917_vm1, %v5405_v23 }
 0x434   : > { %4166 = vmatmul.msk.f32.gmra.mxu2 %vm917_vm1, %v5230_v27 }
 0x435   : > { %v5413_v44 = vpop.f32.mrf.mxu1 }
 0x436   : > { %7187 = vst [vmem:[#allocation19_spill] sm:$0xff] %v5413_v44 }
 0x437   : > { %v5415_v15 = vpop.f32.mrf.mxu2 }
 0x438   : > { %4184 = vmatmul.msk.f32.gmra.mxu3 %vm917_vm1, %v5415_v15  ;;  %4306 = vmatmul.msk.f32.gmra.mxu1 %vm917_vm1, %v5415_v15 }
 0x43c   : > { %4167 = vmatmul.msk.f32.gmra.mxu2 %vm917_vm1, %v5238_v26 }
 0x43d   : > { %v5426_v45 = vpop.f32.mrf.mxu1 }
 0x43e   : > { %7188 = vst [vmem:[#allocation20_spill] sm:$0xff] %v5426_v45 }
 0x43f   : > { %v5431_v18 = vpop.f32.mrf.mxu2 }
 0x440   : > { %4185 = vmatmul.msk.f32.gmra.mxu3 %vm917_vm1, %v5431_v18  ;;  %4307 = vmatmul.msk.f32.gmra.mxu1 %vm917_vm1, %v5431_v18 }
 0x444   : > { %4168 = vmatmul.msk.f32.gmra.mxu2 %vm917_vm1, %v5258_v4 }
 0x445   : > { %v5448_v25 = vpop.f32.mrf.mxu1 }
 0x446   : > { %7189 = vst [vmem:[#allocation21_spill] sm:$0xff] %v5448_v25 }
 0x447   : > { %v5450_v5 = vpop.f32.mrf.mxu2 }
 0x448   : > { %7190 = vst [vmem:[#allocation22_spill] sm:$0xff] %v5450_v5  ;;  %4186 = vmatmul.msk.f32.gmra.mxu3 %vm917_vm1, %v5450_v5  ;;  %4308 = vmatmul.msk.f32.gmra.mxu1 %vm917_vm1, %v5450_v5 }
 0x44c   : > { %4169 = vmatmul.msk.f32.gmra.mxu2 %vm917_vm1, %v5266_v29 }
 0x44d   : > { %v5461_v35 = vpop.f32.mrf.mxu1 }
 0x44e   : > { %7191 = vst [vmem:[#allocation23_spill] sm:$0xff] %v5461_v35  ;;  %v2338_v35 = vrot.slane %v5313_v6, 1 }
 0x44f   : > { %v5463_v17 = vpop.f32.mrf.mxu2 }
 0x450   : > { %4187 = vmatmul.msk.f32.gmra.mxu3 %vm917_vm1, %v5463_v17  ;;  %4309 = vmatmul.msk.f32.gmra.mxu1 %vm917_vm1, %v5463_v17  ;;  %v5684_v54 = vsel %vm2322_vm3, %v2338_v35, %v2340_v47 }
 0x451   : > { %7217 = vst [vmem:[#allocation48_spill] sm:$0xff] %v5684_v54 }
 0x454   : > { %4170 = vmatmul.msk.f32.gmra.mxu2 %vm917_vm1, %v5274_v8 }
 0x455   : > { %v5471_v62 = vpop.f32.mrf.mxu1 }
 0x456   : > { %7192 = vst [vmem:[#allocation24_spill] sm:$0xff] %v5471_v62 }
 0x457   : > { %v5473_v11 = vpop.f32.mrf.mxu2 }
 0x458   : > { %7193 = vst [vmem:[#allocation25_spill] sm:$0xff] %v5473_v11  ;;  %4188 = vmatmul.msk.f32.gmra.mxu3 %vm917_vm1, %v5473_v11  ;;  %4310 = vmatmul.msk.f32.gmra.mxu1 %vm917_vm1, %v5473_v11 }
 0x45b   : > { %v5479_v57 = vpop.f32.mrf.mxu3 }
 0x45c   : > { %4171 = vmatmul.msk.f32.gmra.mxu2 %vm917_vm1, %v5285_v58 }
 0x45d   : > { %v5485_v24 = vpop.f32.mrf.mxu1 }
 0x45e   : > { %7194 = vst [vmem:[#allocation26_spill] sm:$0xff] %v5485_v24 }
 0x45f   : > { %v5483_v14 = vpop.f32.mrf.mxu2 }
 0x460   : > { %4189 = vmatmul.msk.f32.gmra.mxu3 %vm917_vm1, %v5483_v14  ;;  %4311 = vmatmul.msk.f32.gmra.mxu1 %vm917_vm1, %v5483_v14 }
 0x463   : > { %v5491_v33 = vpop.f32.mrf.mxu3 }
 0x464   : > { %2550 = vmatmul.f32.vlgmr.msra.gmra.mxu2 %v7093_v31 }
 0x465   : > { %v5500_v36 = vpop.f32.mrf.mxu1 }
 0x466   : > { %7195 = vst [vmem:[#allocation27_spill] sm:$0xff] %v5500_v36 }
 0x467   : > { %v5494_v43 = vpop.f32.mrf.mxu2 }
 0x468   : > { %4190 = vmatmul.msk.f32.gmra.mxu3 %vm917_vm1, %v5494_v43  ;;  %4312 = vmatmul.msk.f32.gmra.mxu1 %vm917_vm1, %v5494_v43 }
 0x46b   : > { %v5502_v22 = vpop.f32.mrf.mxu3 }
 0x46c   : > { %2553 = vmatmul.f32.gmra.mxu2 %v7093_v31 }
 0x46d   : > { %v5520_v1 = vpop.f32.mrf.mxu1 }
 0x46e   : > { %7197 = vst [vmem:[#allocation29_spill] sm:$0xff] %v5520_v1  ;;  %v1822_v1 = vrot.slane %v5230_v27, 7 }
 0x46f   : > { %v5505_v30 = vpop.f32.mrf.mxu2 }
 0x470   : > { %4191 = vmatmul.msk.f32.gmra.mxu3 %vm917_vm1, %v5505_v30  ;;  %4313 = vmatmul.msk.f32.gmra.mxu1 %vm917_vm1, %v5505_v30 }
 0x473   : > { %v5513_v46 = vpop.f32.mrf.mxu3 }
 0x474   : > { %4226 = vmatmul.msk.f32.gmra.mxu2 %vm917_vm1, %v5518_v60 }
 0x475   : > { %v5544_v55 = vpop.f32.mrf.mxu1 }
 0x476   : > { %7199 = vst [vmem:[#allocation31_spill] sm:$0xff] %v5544_v55 }
 0x477   : > { %v5528_v39 = vpop.f32.mrf.mxu2 }
 0x478   : > { %4192 = vmatmul.msk.f32.gmra.mxu3 %vm917_vm1, %v5528_v39  ;;  %4314 = vmatmul.msk.f32.gmra.mxu1 %vm917_vm1, %v5528_v39 }
 0x47b   : > { %v5536_v3 = vpop.f32.mrf.mxu3 }
 0x47c   : > { %4227 = vmatmul.msk.f32.gmra.mxu2 %vm917_vm1, %v5540_v61 }
 0x47d   : > { %v5578_v38 = vpop.f32.mrf.mxu1 }
 0x47e   : > { %7201 = vst [vmem:[#allocation33_spill] sm:$0xff] %v5578_v38 }
 0x47f   : > { %v5546_v2 = vpop.f32.mrf.mxu2 }
 0x480   : > { %4193 = vmatmul.msk.f32.gmra.mxu3 %vm917_vm1, %v5546_v2  ;;  %4315 = vmatmul.msk.f32.gmra.mxu1 %vm917_vm1, %v5546_v2 }
 0x483   : > { %v5562_v19 = vpop.f32.mrf.mxu3 }
 0x484   : > { %4228 = vmatmul.msk.f32.gmra.mxu2 %vm917_vm1, %v5565_v53 }
 0x485   : > { %v5600_v59 = vpop.f32.mrf.mxu1 }
 0x486   : > { %7203 = vst [vmem:[#allocation35_spill] sm:$0xff] %v5600_v59 }
 0x487   : > { %v5576_v40 = vpop.f32.mrf.mxu2 }
 0x488   : > { %4194 = vmatmul.msk.f32.gmra.mxu3 %vm917_vm1, %v5576_v40  ;;  %4316 = vmatmul.msk.f32.gmra.mxu1 %vm917_vm1, %v5576_v40 }
 0x48b   : > { %v5585_v0 = vpop.f32.mrf.mxu3 }
 0x48c   : > { %4229 = vmatmul.msk.f32.gmra.mxu2 %vm917_vm1, %v5589_v56 }
 0x48d   : > { %v5622_v38 = vpop.f32.mrf.mxu1 }
 0x48e   : > { %7208 = vst [vmem:[#allocation40_spill] sm:$0xff] %v5622_v38 }
 0x48f   : > { %v5593_v16 = vpop.f32.mrf.mxu2 }
 0x490   : > { %4195 = vmatmul.msk.f32.gmra.mxu3 %vm917_vm1, %v5593_v16  ;;  %4317 = vmatmul.msk.f32.gmra.mxu1 %vm917_vm1, %v5593_v16 }
 0x493   : > { %v5602_v7 = vpop.f32.mrf.mxu3 }
 0x494   : > { %4230 = vmatmul.msk.f32.gmra.mxu2 %vm917_vm1, %v5605_v20 }
 0x495   : > { %v5649_v25 = vpop.f32.mrf.mxu1 }
 0x496   : > { %7212 = vst [vmem:[#allocation43_spill] sm:$0xff] %v5649_v25 }
 0x497   : > { %v5610_v13 = vpop.f32.mrf.mxu2 }
 0x498   : > { %7205 = vst [vmem:[#allocation37_spill] sm:$0xff] %v5610_v13  ;;  %2224 = vmatmul.f32.vlgmr.msrb.gmra.mxu3 %v7093_v31  ;;  %4318 = vmatmul.msk.f32.gmra.mxu1 %vm917_vm1, %v5610_v13  ;;  %v2336_v31 = vrot.slane %v5303_v37, 1 }
 0x49a   : > { %v5641_v24 = vsel %vm2322_vm3, %v2334_v63, %v2336_v31  ;;  %v2339_v63 = vsel %vm2322_vm3, %v2336_v31, %v2338_v35  ;;  %v1825_v31 = vrot.slane %v5258_v4, 7 }
 0x49b   : > { %v5616_v59 = vpop.f32.mrf.mxu3  ;;  %7211 = vst [vmem:[#allocation42_spill] sm:$0xff] %v5641_v24  ;;  %v5665_v25 = vsel %vm1751_vm7, %v2339_v63, 0.0 }
 0x49c   : > { %7206 = vst [vmem:[#allocation38_spill] sm:$0xff] %v5616_v59  ;;  %4231 = vmatmul.msk.f32.gmra.mxu2 %vm917_vm1, %v5620_v28 }
 0x49d   : > { %7214 = vst [vmem:[#allocation45_spill] sm:$0xff] %v5665_v25 }
 0x49f   : > { %v5626_v55 = vpop.f32.mrf.mxu2 }
 0x4a0   : > { %v7095_v36 = vrot.slane %v5626_v55, 7  ;;  %2227 = vmatmul.f32.gmra.mxu3 %v7209_v49  ;;  %4319 = vmatmul.msk.f32.gmra.mxu1 %vm917_vm1, %v5626_v55 }
 0x4a2   : > { %v1911_v48 = vsel %vm1821_vm8, %v7095_v36, %v1822_v1  ;;  %v1823_v36 = vrot.slane %v5238_v26, 7 }
 0x4a3   : > { %v5638_v38 = vpop.f32.mrf.mxu3  ;;  %v1912_v62 = vsel %vm1748_vm9, %v1911_v48, 0.0  ;;  %v1775_v48 = vld [vmem:[%s7087_s6 + $0xb8] sm:$0xff] }
 0x4a4   : > { %7210 = vst [vmem:[#allocation41_spill] sm:$0xff] %v5638_v38  ;;  %4232 = vmatmul.msk.f32.gmra.mxu2 %vm917_vm1, %v5641_v24  ;;  %4256 = vmatmul.msk.f32.vlgmr.msrb.gmra.mxu0 %vm917_vm1, %v1912_v62  ;;  %v1824_v26 = vsel %vm1821_vm8, %v1822_v1, %v1823_v36  ;;  %v1826_v1 = vsel %vm1821_vm8, %v1823_v36, %v1825_v31  ;;  %v1827_v36 = vrot.slane %v5266_v29, 7 }
 0x4a5   : > { %3012 = vmatpush.msra.mxu3 %v1775_v48  ;;  %v5675_v48 = vpop.f32.mrf.mxu1 }
 0x4a6   : > { %7215 = vst [vmem:[#allocation46_spill] sm:$0xff] %v5675_v48 }
 0x4a7   : > { %v5651_v45 = vpop.f32.mrf.mxu2 }
 0x4a8   : > { %4196 = vmatmul.msk.f32.gmra.mxu3 %vm917_vm1, %v1912_v62  ;;  %4412 = vmatmul.msk.f32.vlgmr.msra.gmra.mxu1 %vm917_vm1, %v5565_v53  ;;  %v5712_v53 = vsel %vm1821_vm8, %v1825_v31, %v1827_v36 }
 0x4ab   : > { %v5661_v44 = vpop.f32.mrf.mxu3 }
 0x4ac   : > { %7213 = vst [vmem:[#allocation44_spill] sm:$0xff] %v5661_v44  ;;  %4233 = vmatmul.msk.f32.gmra.mxu2 %vm917_vm1, %v5665_v25  ;;  %4257 = vmatmul.msk.f32.gmra.mxu0 %vm917_vm1, %v1824_v26  ;;  %v5688_v44 = vsel %vm1748_vm9, %v1826_v1, 0.0 }
 0x4ad   : > { %v5703_v1 = vpop.f32.mrf.mxu1 }
 0x4ae   : > { %7218 = vst [vmem:[#allocation49_spill] sm:$0xff] %v5703_v1  ;;  %v2344_v1 = vrot.slane %v5346_v50, 1 }
 0x4af   : > { %v5672_v62 = vpop.f32.mrf.mxu2 }
 0x4b0   : > { %4197 = vmatmul.msk.f32.gmra.mxu3 %vm917_vm1, %v1824_v26  ;;  %4413 = vmatmul.msk.f32.gmra.mxu1 %vm917_vm1, %v5589_v56  ;;  %v2342_v26 = vrot.slane %v5336_v51, 1 }
 0x4b2   : > { %v2343_v35 = vsel %vm2322_vm3, %v2340_v47, %v2342_v26 }
 0x4b3   : > { %v5681_v63 = vpop.f32.mrf.mxu3  ;;  %v5709_v56 = vsel %vm1751_vm7, %v2343_v35, 0.0 }
 0x4b4   : > { %7216 = vst [vmem:[#allocation47_spill] sm:$0xff] %v5681_v63  ;;  %4234 = vmatmul.msk.f32.gmra.mxu2 %vm917_vm1, %v5684_v54  ;;  %4258 = vmatmul.msk.f32.gmra.mxu0 %vm917_vm1, %v5688_v44 }
 0x4b5   : > { %7220 = vst [vmem:[#allocation51_spill] sm:$0xff] %v5709_v56  ;;  %v5736_v29 = vpop.f32.mrf.mxu1 }
 0x4b6   : > { %7223 = vst [vmem:[#allocation54_spill] sm:$0xff] %v5736_v29 }
 0x4b7   : > { %v5695_v48 = vpop.f32.mrf.mxu2 }
 0x4b8   : > { %4198 = vmatmul.msk.f32.gmra.mxu3 %vm917_vm1, %v5688_v44  ;;  %4414 = vmatmul.msk.f32.gmra.mxu1 %vm917_vm1, %v5605_v20  ;;  %v1829_v20 = vrot.slane %v5274_v8, 7 }
 0x4ba   : > { %v1830_v31 = vsel %vm1821_vm8, %v1827_v36, %v1829_v20 }
 0x4bb   : > { %v5705_v63 = vpop.f32.mrf.mxu3  ;;  %v5734_v8 = vsel %vm1748_vm9, %v1830_v31, 0.0 }
 0x4bc   : > { %7219 = vst [vmem:[#allocation50_spill] sm:$0xff] %v5705_v63  ;;  %4235 = vmatmul.msk.f32.gmra.mxu2 %vm917_vm1, %v5709_v56  ;;  %4259 = vmatmul.msk.f32.gmra.mxu0 %vm917_vm1, %v5712_v53  ;;  %v5730_v63 = vsel %vm2322_vm3, %v2342_v26, %v2344_v1 }
 0x4bd   : > { %7222 = vst [vmem:[#allocation53_spill] sm:$0xff] %v5730_v63 }
 0x4bf   : > { %v5719_v47 = vpop.f32.mrf.mxu2 }
 0x4c0   : > { %4199 = vmatmul.msk.f32.gmra.mxu3 %vm917_vm1, %v5712_v53  ;;  %4415 = vmatmul.msk.f32.gmra.mxu1 %vm917_vm1, %v5620_v28  ;;  %v2346_v28 = vrot.slane %v5356_v9, 1 }
 0x4c2   : > { %v2347_v26 = vsel %vm2322_vm3, %v2344_v1, %v2346_v28 }
 0x4c3   : > { %v5727_v35 = vpop.f32.mrf.mxu3  ;;  %v5755_v29 = vsel %vm1751_vm7, %v2347_v26, 0.0 }
 0x4c4   : > { %7221 = vst [vmem:[#allocation52_spill] sm:$0xff] %v5727_v35  ;;  %4236 = vmatmul.msk.f32.gmra.mxu2 %vm917_vm1, %v5730_v63  ;;  %4260 = vmatmul.msk.f32.gmra.mxu0 %vm917_vm1, %v5734_v8  ;;  %v1831_v35 = vrot.slane %v5285_v58, 7  ;;  %v1833_v58 = vrot.slane %v5293_v32, 7  ;;  %v2350_v32 = vrot.slane %v5376_v21, 1 }
 0x4c5   : > { %7225 = vst [vmem:[#allocation56_spill] sm:$0xff] %v5755_v29 }
 0x4c6   : > { %v5758_v4 = vsel %vm1821_vm8, %v1829_v20, %v1831_v35  ;;  %v1834_v20 = vsel %vm1821_vm8, %v1831_v35, %v1833_v58  ;;  %v1835_v35 = vrot.slane %v5303_v37, 7 }
 0x4c7   : > { %v5743_v36 = vpop.f32.mrf.mxu2 }
 0x4c8   : > { %4200 = vmatmul.msk.f32.gmra.mxu3 %vm917_vm1, %v5734_v8  ;;  %4416 = vmatmul.msk.f32.gmra.mxu1 %vm917_vm1, %v5641_v24  ;;  %v5765_v24 = vpop.f32.mrf.mxu1  ;;  %v5806_v59 = vsel %vm1821_vm8, %v1833_v58, %v1835_v35 }
 0x4c9   : > { %7226 = vst [vmem:[#allocation57_spill] sm:$0xff] %v5765_v24  ;;  %v5782_v24 = vsel %vm1748_vm9, %v1834_v20, 0.0 }
 0x4cb   : > { %v5751_v31 = vpop.f32.mrf.mxu3 }
 0x4cc   : > { %7224 = vst [vmem:[#allocation55_spill] sm:$0xff] %v5751_v31  ;;  %4237 = vmatmul.msk.f32.gmra.mxu2 %vm917_vm1, %v5755_v29  ;;  %4261 = vmatmul.msk.f32.gmra.mxu0 %vm917_vm1, %v5758_v4  ;;  %v2348_v31 = vrot.slane %v5366_v12, 1 }
 0x4ce   : > { %v5778_v38 = vsel %vm2322_vm3, %v2346_v28, %v2348_v31  ;;  %v2351_v28 = vsel %vm2322_vm3, %v2348_v31, %v2350_v32  ;;  %v2352_v31 = vrot.slane %v5387_v34, 1 }
 0x4cf   : > { %v5767_v1 = vpop.f32.mrf.mxu2  ;;  %7228 = vst [vmem:[#allocation59_spill] sm:$0xff] %v5778_v38  ;;  %v5803_v61 = vsel %vm1751_vm7, %v2351_v28, 0.0 }
 0x4d0   : > { %4201 = vmatmul.msk.f32.gmra.mxu3 %vm917_vm1, %v5758_v4  ;;  %4417 = vmatmul.msk.f32.gmra.mxu1 %vm917_vm1, %v5665_v25  ;;  %7231 = vst [vmem:[#allocation62_spill] sm:$0xff] %v5803_v61  ;;  %v5826_v37 = vsel %vm2322_vm3, %v2350_v32, %v2352_v31 }
 0x4d1   : > { %7234 = vst [vmem:[#allocation65_spill] sm:$0xff] %v5826_v37 }
 0x4d3   : > { %v5775_v26 = vpop.f32.mrf.mxu3 }
 0x4d4   : > { %7227 = vst [vmem:[#allocation58_spill] sm:$0xff] %v5775_v26  ;;  %4238 = vmatmul.msk.f32.gmra.mxu2 %vm917_vm1, %v5778_v38  ;;  %4262 = vmatmul.msk.f32.gmra.mxu0 %vm917_vm1, %v5782_v24  ;;  %v5792_v26 = vpop.f32.mrf.mxu1 }
 0x4d5   : > { %7229 = vst [vmem:[#allocation60_spill] sm:$0xff] %v5792_v26  ;;  %v1837_v26 = vrot.slane %v5313_v6, 7 }
 0x4d7   : > { %v5789_v25 = vpop.f32.mrf.mxu2  ;;  %v1838_v58 = vsel %vm1821_vm8, %v1835_v35, %v1837_v26 }
 0x4d8   : > { %4202 = vmatmul.msk.f32.gmra.mxu3 %vm917_vm1, %v5782_v24  ;;  %4418 = vmatmul.msk.f32.gmra.mxu1 %vm917_vm1, %v5684_v54  ;;  %v5830_v6 = vsel %vm1748_vm9, %v1838_v58, 0.0  ;;  %v1774_v58 = vld [vmem:[%s7087_s6 + $0xb0] sm:$0xff] }
 0x4d9   : > { %7235 = vst [vmem:[#allocation66_spill] sm:$0xff] %v5830_v6  ;;  %3013 = vmatpush.msra.mxu3 %v1774_v58 }
 0x4db   : > { %v5799_v20 = vpop.f32.mrf.mxu3 }
 0x4dc   : > { %7230 = vst [vmem:[#allocation61_spill] sm:$0xff] %v5799_v20  ;;  %4239 = vmatmul.msk.f32.gmra.mxu2 %vm917_vm1, %v5803_v61  ;;  %4263 = vmatmul.msk.f32.gmra.mxu0 %vm917_vm1, %v5806_v59  ;;  %v5821_v28 = vpop.f32.mrf.mxu1 }
 0x4dd   : > { %7232 = vst [vmem:[#allocation63_spill] sm:$0xff] %v5821_v28  ;;  %v1839_v28 = vrot.slane %v5326_v10, 7 }
 0x4df   : > { %v5813_v54 = vpop.f32.mrf.mxu2  ;;  %v5855_v10 = vsel %vm1821_vm8, %v1837_v26, %v1839_v28 }
 0x4e0   : > { %4203 = vmatmul.msk.f32.gmra.mxu3 %vm917_vm1, %v5806_v59  ;;  %4419 = vmatmul.msk.f32.gmra.mxu1 %vm917_vm1, %v5709_v56  ;;  %v2354_v56 = vrot.slane %v5396_v52, 1  ;;  %7238 = vst [vmem:[#allocation69_spill] sm:$0xff] %v5855_v10  ;;  %v7297_v41 = vld [vmem:[#allocation66_spill] sm:$0xff] }
 0x4e2   : > { %v2355_v32 = vsel %vm2322_vm3, %v2352_v31, %v2354_v56  ;;  %v1841_v31 = vrot.slane %v5336_v51, 7  ;;  %v2358_v51 = vrot.slane %v5415_v15, 1 }
 0x4e3   : > { %v5823_v20 = vpop.f32.mrf.mxu3  ;;  %v5852_v49 = vsel %vm1751_vm7, %v2355_v32, 0.0 }
 0x4e4   : > { %7233 = vst [vmem:[#allocation64_spill] sm:$0xff] %v5823_v20  ;;  %4240 = vmatmul.msk.f32.gmra.mxu2 %vm917_vm1, %v5826_v37  ;;  %4264 = vmatmul.msk.f32.gmra.mxu0 %vm917_vm1, %v5830_v6  ;;  %v5857_v60 = vpop.f32.mrf.mxu1  ;;  %v1842_v26 = vsel %vm1821_vm8, %v1839_v28, %v1841_v31 }
 0x4e5   : > { %7237 = vst [vmem:[#allocation68_spill] sm:$0xff] %v5852_v49 }
 0x4e6   : > { %7239 = vst [vmem:[#allocation70_spill] sm:$0xff] %v5857_v60 }
 0x4e7   : > { %v5837_v35 = vpop.f32.mrf.mxu2 }
 0x4e8   : > { %4204 = vmatmul.msk.f32.gmra.mxu3 %vm917_vm1, %v5830_v6  ;;  %4420 = vmatmul.msk.f32.gmra.mxu1 %vm917_vm1, %v5730_v63  ;;  %v5879_v63 = vsel %vm1748_vm9, %v1842_v26, 0.0 }
 0x4e9   : > { %7242 = vst [vmem:[#allocation73_spill] sm:$0xff] %v5879_v63 }
 0x4eb   : > { %v5848_v20 = vpop.f32.mrf.mxu3 }
 0x4ec   : > { %7236 = vst [vmem:[#allocation67_spill] sm:$0xff] %v5848_v20  ;;  %4241 = vmatmul.msk.f32.gmra.mxu2 %vm917_vm1, %v5852_v49  ;;  %4265 = vmatmul.msk.f32.gmra.mxu0 %vm917_vm1, %v5855_v10  ;;  %v2356_v20 = vrot.slane %v5405_v23, 1 }
 0x4ee   : > { %v5875_v60 = vsel %vm2322_vm3, %v2354_v56, %v2356_v20  ;;  %v2359_v56 = vsel %vm2322_vm3, %v2356_v20, %v2358_v51  ;;  %v2360_v20 = vrot.slane %v5431_v18, 1 }
 0x4ef   : > { %v5864_v58 = vpop.f32.mrf.mxu2  ;;  %7241 = vst [vmem:[#allocation72_spill] sm:$0xff] %v5875_v60 }
 0x4f0   : > { %4205 = vmatmul.msk.f32.gmra.mxu3 %vm917_vm1, %v5855_v10  ;;  %4421 = vmatmul.msk.f32.gmra.mxu1 %vm917_vm1, %v5755_v29  ;;  %v5886_v29 = vpop.f32.mrf.mxu1  ;;  %v5900_v10 = vsel %vm1751_vm7, %v2359_v56, 0.0 }
 0x4f1   : > { %7243 = vst [vmem:[#allocation74_spill] sm:$0xff] %v5886_v29 }
 0x4f2   : > { %7245 = vst [vmem:[#allocation76_spill] sm:$0xff] %v5900_v10 }
 0x4f3   : > { %v5872_v32 = vpop.f32.mrf.mxu3 }
 0x4f4   : > { %7240 = vst [vmem:[#allocation71_spill] sm:$0xff] %v5872_v32  ;;  %4242 = vmatmul.msk.f32.gmra.mxu2 %vm917_vm1, %v5875_v60  ;;  %4266 = vmatmul.msk.f32.gmra.mxu0 %vm917_vm1, %v5879_v63  ;;  %v1843_v32 = vrot.slane %v5346_v50, 7  ;;  %v1845_v50 = vrot.slane %v5356_v9, 7 }
 0x4f6   : > { %v5903_v29 = vsel %vm1821_vm8, %v1841_v31, %v1843_v32  ;;  %v1846_v31 = vsel %vm1821_vm8, %v1843_v32, %v1845_v50  ;;  %v1847_v32 = vrot.slane %v5366_v12, 7 }
 0x4f7   : > { %v5888_v28 = vpop.f32.mrf.mxu2  ;;  %7246 = vst [vmem:[#allocation77_spill] sm:$0xff] %v5903_v29  ;;  %v5927_v9 = vsel %vm1748_vm9, %v1846_v31, 0.0 }
 0x4f8   : > { %4206 = vmatmul.msk.f32.gmra.mxu3 %vm917_vm1, %v5879_v63  ;;  %4422 = vmatmul.msk.f32.gmra.mxu1 %vm917_vm1, %v5778_v38  ;;  %v5923_v63 = vsel %vm2322_vm3, %v2358_v51, %v2360_v20  ;;  %7250 = vst [vmem:[#allocation81_spill] sm:$0xff] %v5927_v9  ;;  %v5951_v6 = vsel %vm1821_vm8, %v1845_v50, %v1847_v32 }
 0x4f9   : > { %7249 = vst [vmem:[#allocation80_spill] sm:$0xff] %v5923_v63 }
 0x4fa   : > { %7254 = vst [vmem:[#allocation85_spill] sm:$0xff] %v5951_v6 }
 0x4fb   : > { %v5896_v26 = vpop.f32.mrf.mxu3 }
 0x4fc   : > { %7244 = vst [vmem:[#allocation75_spill] sm:$0xff] %v5896_v26  ;;  %4243 = vmatmul.msk.f32.gmra.mxu2 %vm917_vm1, %v5900_v10  ;;  %4267 = vmatmul.msk.f32.gmra.mxu0 %vm917_vm1, %v5903_v29  ;;  %v5913_v26 = vpop.f32.mrf.mxu1 }
 0x4fd   : > { %7247 = vst [vmem:[#allocation78_spill] sm:$0xff] %v5913_v26  ;;  %v2362_v26 = vrot.slane %v5450_v5, 1 }
 0x4ff   : > { %v5910_v38 = vpop.f32.mrf.mxu2  ;;  %v2363_v51 = vsel %vm2322_vm3, %v2360_v20, %v2362_v26 }
 0x500   : > { %4207 = vmatmul.msk.f32.gmra.mxu3 %vm917_vm1, %v5903_v29  ;;  %4423 = vmatmul.msk.f32.gmra.mxu1 %vm917_vm1, %v5803_v61  ;;  %v5948_v29 = vsel %vm1751_vm7, %v2363_v51, 0.0 }
 0x501   : > { %7253 = vst [vmem:[#allocation84_spill] sm:$0xff] %v5948_v29 }
 0x503   : > { %v5920_v56 = vpop.f32.mrf.mxu3 }
 0x504   : > { %7248 = vst [vmem:[#allocation79_spill] sm:$0xff] %v5920_v56  ;;  %4244 = vmatmul.msk.f32.gmra.mxu2 %vm917_vm1, %v5923_v63  ;;  %4268 = vmatmul.msk.f32.gmra.mxu0 %vm917_vm1, %v5927_v9  ;;  %v5942_v31 = vpop.f32.mrf.mxu1 }
 0x505   : > { %7251 = vst [vmem:[#allocation82_spill] sm:$0xff] %v5942_v31  ;;  %v2364_v31 = vrot.slane %v5463_v17, 1 }
 0x507   : > { %v5934_v61 = vpop.f32.mrf.mxu2 }
 0x508   : > { %4208 = vmatmul.msk.f32.gmra.mxu3 %vm917_vm1, %v5927_v9  ;;  %4424 = vmatmul.msk.f32.gmra.mxu1 %vm917_vm1, %v5826_v37  ;;  %v1849_v37 = vrot.slane %v5376_v21, 7 }
 0x50a   : > { %v1850_v50 = vsel %vm1821_vm8, %v1847_v32, %v1849_v37 }
 0x50b   : > { %v5944_v56 = vpop.f32.mrf.mxu3  ;;  %v5973_v21 = vsel %vm1748_vm9, %v1850_v50, 0.0 }
 0x50c   : > { %7252 = vst [vmem:[#allocation83_spill] sm:$0xff] %v5944_v56  ;;  %4245 = vmatmul.msk.f32.gmra.mxu2 %vm917_vm1, %v5948_v29  ;;  %4269 = vmatmul.msk.f32.gmra.mxu0 %vm917_vm1, %v5951_v6  ;;  %v5969_v56 = vsel %vm2322_vm3, %v2362_v26, %v2364_v31  ;;  %v5975_v12 = vpop.f32.mrf.mxu1 }
 0x50d   : > { %7256 = vst [vmem:[#allocation87_spill] sm:$0xff] %v5969_v56 }
 0x50e   : > { %7257 = vst [vmem:[#allocation88_spill] sm:$0xff] %v5975_v12 }
 0x50f   : > { %v5958_v20 = vpop.f32.mrf.mxu2 }
 0x510   : > { %4209 = vmatmul.msk.f32.gmra.mxu3 %vm917_vm1, %v5951_v6  ;;  %4425 = vmatmul.msk.f32.gmra.mxu1 %vm917_vm1, %v5852_v49  ;;  %v2366_v49 = vrot.slane %v5473_v11, 1 }
 0x512   : > { %v2367_v26 = vsel %vm2322_vm3, %v2364_v31, %v2366_v49  ;;  %v1779_v31 = vld [vmem:[%s7087_s6 + $0xd8] sm:$0xff] }
 0x513   : > { %v5966_v51 = vpop.f32.mrf.mxu3  ;;  %v5992_v12 = vsel %vm1751_vm7, %v2367_v26, 0.0  ;;  %3157 = vmatpush.msrb.mxu2 %v1779_v31 }
 0x514   : > { %7255 = vst [vmem:[#allocation86_spill] sm:$0xff] %v5966_v51  ;;  %4246 = vmatmul.msk.f32.gmra.mxu2 %vm917_vm1, %v5969_v56  ;;  %4270 = vmatmul.msk.f32.gmra.mxu0 %vm917_vm1, %v5973_v21  ;;  %v1851_v51 = vrot.slane %v5387_v34, 7  ;;  %v6006_v26 = vpop.f32.mrf.mxu1 }
 0x515   : > { %7258 = vst [vmem:[#allocation89_spill] sm:$0xff] %v5992_v12 }
 0x516   : > { %v5995_v6 = vsel %vm1821_vm8, %v1849_v37, %v1851_v51  ;;  %7259 = vst [vmem:[#allocation90_spill] sm:$0xff] %v6006_v26 }
 0x517   : > { %v5982_v32 = vpop.f32.mrf.mxu2 }
 0x518   : > { %4210 = vmatmul.msk.f32.gmra.mxu3 %vm917_vm1, %v5973_v21  ;;  %4426 = vmatmul.msk.f32.gmra.mxu1 %vm917_vm1, %v5875_v60  ;;  %v1853_v60 = vrot.slane %v5396_v52, 7 }
 0x51b   : > { %v2225_v50 = vpop.f32.mrf.mxu3 }
 0x51c   : > { %v2226_v9 = vadd.f32 %v2225_v50, %v5651_v45  ;;  %4247 = vmatmul.msk.f32.gmra.mxu2 %vm917_vm1, %v5992_v12  ;;  %4271 = vmatmul.msk.f32.gmra.mxu0 %vm917_vm1, %v5995_v6  ;;  %v2368_v45 = vrot.slane %v5483_v14, 1  ;;  %v1854_v50 = vsel %vm1821_vm8, %v1851_v51, %v1853_v60  ;;  %v2370_v51 = vrot.slane %v5494_v43, 1 }
 0x51e   : > { %v6009_v37 = vadd.f32 %v5837_v35, %v2226_v9  ;;  %v6022_v26 = vsel %vm2322_vm3, %v2366_v49, %v2368_v45  ;;  %v6026_v9 = vsel %vm1748_vm9, %v1854_v50, 0.0 }
 0x51f   : > { %v6011_v34 = vpop.f32.mrf.mxu2  ;;  %7262 = vst [vmem:[#allocation93_spill] sm:$0xff] %v6022_v26 }
 0x520   : > { %7260 = vst [vmem:[#allocation91_spill] sm:$0xff] %v6009_v37  ;;  %4211 = vmatmul.msk.f32.gmra.mxu3 %vm917_vm1, %v5995_v6  ;;  %4427 = vmatmul.msk.f32.gmra.mxu1 %vm917_vm1, %v5900_v10  ;;  %v1783_v10 = vld [vmem:[%s7087_s6 + $0xf8] sm:$0xff] }
 0x521   : > { %v6019_v52 = vpop.f32.mrf.mxu0  ;;  %3302 = vmatpush.msra.mxu0 %v1783_v10  ;;  %v1773_v10 = vld [vmem:[%s7087_s6 + $0xa8] sm:$0xff] }
 0x522   : > { %7261 = vst [vmem:[#allocation92_spill] sm:$0xff] %v6019_v52  ;;  %v2371_v52 = vsel %vm2322_vm3, %v2368_v45, %v2370_v51  ;;  %3014 = vmatpush.msra.mxu3 %v1773_v10  ;;  %v1857_v45 = vrot.slane %v5415_v15, 7 }
 0x523   : > { %v2228_v31 = vpop.f32.mrf.mxu3 }
 0x524   : > { %v2229_v35 = vadd.f32 %v2228_v31, %v5672_v62  ;;  %4248 = vmatmul.msk.f32.gmra.mxu2 %vm917_vm1, %v6022_v26  ;;  %4272 = vmatmul.msk.f32.gmra.mxu0 %vm917_vm1, %v6026_v9  ;;  %v1855_v62 = vrot.slane %v5405_v23, 7  ;;  %v6043_v31 = vpop.f32.mrf.mxu1 }
 0x525   : > { %7264 = vst [vmem:[#allocation95_spill] sm:$0xff] %v6043_v31 }
 0x526   : > { %v6038_v49 = vadd.f32 %v5864_v58, %v2229_v35  ;;  %v6057_v35 = vsel %vm1751_vm7, %v2371_v52, 0.0  ;;  %v6060_v31 = vsel %vm1821_vm8, %v1853_v60, %v1855_v62  ;;  %v2372_v52 = vrot.slane %v5505_v30, 1 }
 0x527   : > { %v6040_v50 = vpop.f32.mrf.mxu2  ;;  %7266 = vst [vmem:[#allocation97_spill] sm:$0xff] %v6057_v35  ;;  %v1858_v60 = vsel %vm1821_vm8, %v1855_v62, %v1857_v45  ;;  %v2374_v62 = vrot.slane %v5528_v39, 1 }
 0x528   : > { %7263 = vst [vmem:[#allocation94_spill] sm:$0xff] %v6038_v49  ;;  %4212 = vmatmul.msk.f32.gmra.mxu3 %vm917_vm1, %v6026_v9  ;;  %4428 = vmatmul.msk.f32.gmra.mxu1 %vm917_vm1, %v5923_v63 }
 0x529   : > { %v6050_v37 = vpop.f32.mrf.mxu0 }
 0x52a   : > { %7265 = vst [vmem:[#allocation96_spill] sm:$0xff] %v6050_v37 }
 0x52b   : > { %v2231_v58 = vpop.f32.mrf.mxu3 }
 0x52c   : > { %v2232_v49 = vadd.f32 %v2231_v58, %v5695_v48  ;;  %4249 = vmatmul.msk.f32.gmra.mxu2 %vm917_vm1, %v6057_v35  ;;  %4273 = vmatmul.msk.f32.gmra.mxu0 %vm917_vm1, %v6060_v31  ;;  %v6081_v10 = vpop.f32.mrf.mxu1 }
 0x52d   : > { %7269 = vst [vmem:[#allocation100_spill] sm:$0xff] %v6081_v10 }
 0x52e   : > { %v6069_v63 = vadd.f32 %v5888_v28, %v2232_v49  ;;  %v6084_v28 = vsel %vm2322_vm3, %v2370_v51, %v2372_v52  ;;  %v6088_v49 = vsel %vm1748_vm9, %v1858_v60, 0.0  ;;  %v1859_v51 = vrot.slane %v5431_v18, 7 }
 0x52f   : > { %v6071_v37 = vpop.f32.mrf.mxu2  ;;  %7270 = vst [vmem:[#allocation101_spill] sm:$0xff] %v6084_v28 }
 0x530   : > { %7267 = vst [vmem:[#allocation98_spill] sm:$0xff] %v6069_v63  ;;  %4213 = vmatmul.msk.f32.gmra.mxu3 %vm917_vm1, %v6060_v31  ;;  %4429 = vmatmul.msk.f32.gmra.mxu1 %vm917_vm1, %v5948_v29 }
 0x531   : > { %v6079_v48 = vpop.f32.mrf.mxu0 }
 0x532   : > { %7268 = vst [vmem:[#allocation99_spill] sm:$0xff] %v6079_v48 }
 0x533   : > { %v2234_v58 = vpop.f32.mrf.mxu3 }
 0x534   : > { %v2235_v63 = vadd.f32 %v2234_v58, %v5719_v47  ;;  %4250 = vmatmul.msk.f32.gmra.mxu2 %vm917_vm1, %v6084_v28  ;;  %4274 = vmatmul.msk.f32.gmra.mxu0 %vm917_vm1, %v6088_v49  ;;  %v2375_v47 = vsel %vm2322_vm3, %v2372_v52, %v2374_v62  ;;  %v1861_v52 = vrot.slane %v5450_v5, 7 }
 0x535   : > { %v6111_v48 = vsel %vm1751_vm7, %v2375_v47, 0.0 }
 0x536   : > { %v6097_v10 = vadd.f32 %v5910_v38, %v2235_v63  ;;  %7272 = vst [vmem:[#allocation103_spill] sm:$0xff] %v6111_v48  ;;  %v6114_v38 = vsel %vm1821_vm8, %v1857_v45, %v1859_v51  ;;  %v6116_v63 = vpop.f32.mrf.mxu1  ;;  %v1778_v45 = vld [vmem:[%s7087_s6 + $0xd0] sm:$0xff] }
 0x537   : > { %v6099_v29 = vpop.f32.mrf.mxu2  ;;  %7273 = vst [vmem:[#allocation104_spill] sm:$0xff] %v6116_v63  ;;  %v2376_v63 = vrot.slane %v5546_v2, 1  ;;  %3158 = vmatpush.msrb.mxu2 %v1778_v45 }
 0x538   : > { %7271 = vst [vmem:[#allocation102_spill] sm:$0xff] %v6097_v10  ;;  %4214 = vmatmul.msk.f32.gmra.mxu3 %vm917_vm1, %v6088_v49  ;;  %4430 = vmatmul.msk.f32.gmra.mxu1 %vm917_vm1, %v5969_v56 }
 0x539   : > { %v6107_v60 = vpop.f32.mrf.mxu0 }
 0x53b   : > { %v2237_v58 = vpop.f32.mrf.mxu3 }
 0x53c   : > { %v2238_v10 = vadd.f32 %v2237_v58, %v5743_v36  ;;  %4251 = vmatmul.msk.f32.gmra.mxu2 %vm917_vm1, %v6111_v48  ;;  %4275 = vmatmul.msk.f32.gmra.mxu0 %vm917_vm1, %v6114_v38  ;;  %v1862_v36 = vsel %vm1821_vm8, %v1859_v51, %v1861_v52  ;;  %v1776_v58 = vld [vmem:[%s7087_s6 + $0xc0] sm:$0xff] }
 0x53e   : > { %v6125_v56 = vadd.f32 %v5934_v61, %v2238_v10  ;;  %v1777_v61 = vld [vmem:[%s7087_s6 + $0xc8] sm:$0xff] }
 0x53f   : > { %v6130_v47 = vpop.f32.mrf.mxu2  ;;  %3159 = vmatpush.msrb.mxu2 %v1777_v61  ;;  %v2378_v61 = vrot.slane %v5576_v40, 1 }
 0x540   : > { %7274 = vst [vmem:[#allocation105_spill] sm:$0xff] %v6125_v56  ;;  %4215 = vmatmul.msk.f32.gmra.mxu3 %vm917_vm1, %v6114_v38  ;;  %4431 = vmatmul.msk.f32.gmra.mxu1 %vm917_vm1, %v5992_v12  ;;  %v6147_v56 = vsel %vm2322_vm3, %v2374_v62, %v2376_v63  ;;  %v6151_v12 = vsel %vm1748_vm9, %v1862_v36, 0.0  ;;  %v1863_v36 = vrot.slane %v5463_v17, 7 }
 0x541   : > { %v6141_v10 = vpop.f32.mrf.mxu0  ;;  %7276 = vst [vmem:[#allocation107_spill] sm:$0xff] %v6147_v56  ;;  %3160 = vmatpush.msrb.mxu2 %v1776_v58 }
 0x542   : > { %7275 = vst [vmem:[#allocation106_spill] sm:$0xff] %v6141_v10  ;;  %v6159_v10 = vpop.f32.mrf.mxu1 }
 0x543   : > { %v2240_v45 = vpop.f32.mrf.mxu3  ;;  %7277 = vst [vmem:[#allocation108_spill] sm:$0xff] %v6159_v10 }
 0x544   : > { %v2241_v51 = vadd.f32 %v2240_v45, %v5767_v1  ;;  %4252 = vmatmul.msk.f32.gmra.mxu2 %vm917_vm1, %v6147_v56  ;;  %4276 = vmatmul.msk.f32.gmra.mxu0 %vm917_vm1, %v6151_v12  ;;  %v2379_v1 = vsel %vm2322_vm3, %v2376_v63, %v2378_v61  ;;  %v1865_v63 = vrot.slane %v5473_v11, 7 }
 0x545   : > { %v6176_v10 = vsel %vm1751_vm7, %v2379_v1, 0.0 }
 0x546   : > { %v6162_v62 = vadd.f32 %v5958_v20, %v2241_v51  ;;  %v6179_v20 = vsel %vm1821_vm8, %v1861_v52, %v1863_v36 }
 0x547   : > { %v6164_v5 = vpop.f32.mrf.mxu2 }
 0x548   : > { %4216 = vmatmul.msk.f32.gmra.mxu3 %vm917_vm1, %v6151_v12  ;;  %4432 = vmatmul.msk.f32.gmra.mxu1 %vm917_vm1, %v6022_v26 }
 0x549   : > { %v6172_v58 = vpop.f32.mrf.mxu0 }
 0x54a   : > { %7278 = vst [vmem:[#allocation109_spill] sm:$0xff] %v6172_v58  ;;  %v2380_v58 = vrot.slane %v5593_v16, 1  ;;  %v6191_v1 = vpop.f32.mrf.mxu1 }
 0x54b   : > { %v2243_v45 = vpop.f32.mrf.mxu3  ;;  %7280 = vst [vmem:[#allocation111_spill] sm:$0xff] %v6191_v1  ;;  %v7144_v1 = vrot.slane %v5610_v13, 1 }
 0x54c   : > { %v2244_v51 = vadd.f32 %v2243_v45, %v5789_v25  ;;  %4253 = vmatmul.msk.f32.gmra.mxu2 %vm917_vm1, %v6176_v10  ;;  %4277 = vmatmul.msk.f32.gmra.mxu0 %vm917_vm1, %v6179_v20  ;;  %v1866_v25 = vsel %vm1821_vm8, %v1863_v36, %v1865_v63 }
 0x54e   : > { %v6188_v26 = vadd.f32 %v5982_v32, %v2244_v51  ;;  %v6203_v32 = vsel %vm2322_vm3, %v2378_v61, %v2380_v58  ;;  %v6207_v51 = vsel %vm1748_vm9, %v1866_v25, 0.0  ;;  %v1867_v61 = vrot.slane %v5483_v14, 7 }
 0x54f   : > { %v6198_v52 = vpop.f32.mrf.mxu2  ;;  %7281 = vst [vmem:[#allocation112_spill] sm:$0xff] %v6203_v32 }
 0x550   : > { %7279 = vst [vmem:[#allocation110_spill] sm:$0xff] %v6188_v26  ;;  %4217 = vmatmul.msk.f32.gmra.mxu3 %vm917_vm1, %v6179_v20  ;;  %4433 = vmatmul.msk.f32.gmra.mxu1 %vm917_vm1, %v6057_v35 }
 0x551   : > { %v6200_v45 = vpop.f32.mrf.mxu0 }
 0x552   : > { %v6228_v25 = vpop.f32.mrf.mxu1 }
 0x553   : > { %v2246_v11 = vpop.f32.mrf.mxu3  ;;  %7283 = vst [vmem:[#allocation114_spill] sm:$0xff] %v6228_v25 }
 0x554   : > { %v2247_v26 = vadd.f32 %v2246_v11, %v5813_v54  ;;  %4254 = vmatmul.msk.f32.gmra.mxu2 %vm917_vm1, %v6203_v32  ;;  %4278 = vmatmul.msk.f32.gmra.mxu0 %vm917_vm1, %v6207_v51  ;;  %v2383_v54 = vsel %vm2322_vm3, %v2380_v58, %v7144_v1  ;;  %v1869_v58 = vrot.slane %v5494_v43, 7 }
 0x556   : > { %v6216_v36 = vadd.f32 %v6011_v34, %v2247_v26  ;;  %v6234_v26 = vsel %vm1751_vm7, %v2383_v54, 0.0 }
 0x557   : > { %v6230_v35 = vpop.f32.mrf.mxu2  ;;  %7284 = vst [vmem:[#allocation115_spill] sm:$0xff] %v6234_v26 }
 0x558   : > { %7282 = vst [vmem:[#allocation113_spill] sm:$0xff] %v6216_v36  ;;  %4218 = vmatmul.msk.f32.gmra.mxu3 %vm917_vm1, %v6207_v51  ;;  %4434 = vmatmul.msk.f32.gmra.mxu1 %vm917_vm1, %v6084_v28  ;;  %v6237_v36 = vsel %vm1821_vm8, %v1865_v63, %v1867_v61  ;;  %v1870_v63 = vsel %vm1821_vm8, %v1867_v61, %v1869_v58 }
 0x559   : > { %v6226_v11 = vpop.f32.mrf.mxu0 }
 0x55a   : > { %v6259_v25 = vpop.f32.mrf.mxu1 }
 0x55b   : > { %v2249_v34 = vpop.f32.mrf.mxu3  ;;  %7285 = vst [vmem:[#allocation116_spill] sm:$0xff] %v6259_v25  ;;  %v1871_v25 = vrot.slane %v5505_v30, 7 }
 0x55c   : > { %v2250_v28 = vadd.f32 %v2249_v34, %v5479_v57  ;;  %4255 = vmatmul.msk.f32.gmra.mxu2 %vm917_vm1, %v6234_v26  ;;  %4279 = vmatmul.msk.f32.gmra.mxu0 %vm917_vm1, %v6237_v36  ;;  %v6257_v34 = vsel %vm1748_vm9, %v1870_v63, 0.0 }
 0x55e   : > { %v6246_v1 = vadd.f32 %v6040_v50, %v2250_v28  ;;  %v1782_v28 = vld [vmem:[%s7087_s6 + $0xf0] sm:$0xff] }
 0x55f   : > { %v6269_v61 = vpop.f32.mrf.mxu2  ;;  %3303 = vmatpush.msra.mxu0 %v1782_v28  ;;  %v6285_v28 = vsel %vm1821_vm8, %v1869_v58, %v1871_v25 }
 0x560   : > { %4219 = vmatmul.msk.f32.gmra.mxu3 %vm917_vm1, %v6237_v36  ;;  %4435 = vmatmul.msk.f32.gmra.mxu1 %vm917_vm1, %v6111_v48 }
 0x561   : > { %v6253_v57 = vpop.f32.mrf.mxu0 }
 0x563   : > { %v2252_v54 = vpop.f32.mrf.mxu3 }
 0x564   : > { %v2253_v50 = vadd.f32 %v2252_v54, %v5491_v33  ;;  %4280 = vmatmul.msk.f32.gmra.mxu0 %vm917_vm1, %v6257_v34  ;;  %4352 = vmatmul.msk.f32.vlgmr.msrb.gmra.mxu2 %vm917_vm1, %v5688_v44  ;;  %v1772_v44 = vld [vmem:[%s7087_s6 + $0xa0] sm:$0xff] }
 0x565   : > { %3015 = vmatpush.msra.mxu3 %v1772_v44 }
 0x566   : > { %v6272_v63 = vadd.f32 %v6071_v37, %v2253_v50  ;;  %v1873_v50 = vrot.slane %v5528_v39, 7 }
 0x568   : > { %4220 = vmatmul.msk.f32.gmra.mxu3 %vm917_vm1, %v6257_v34  ;;  %4436 = vmatmul.msk.f32.gmra.mxu1 %vm917_vm1, %v6147_v56  ;;  %v6293_v56 = vpop.f32.mrf.mxu1 }
 0x569   : > { %v6279_v33 = vpop.f32.mrf.mxu0  ;;  %7287 = vst [vmem:[#allocation118_spill] sm:$0xff] %v6293_v56 }
 0x56a   : > { %7286 = vst [vmem:[#allocation117_spill] sm:$0xff] %v6279_v33  ;;  %v6298_v33 = vpop.f32.mrf.mxu2 }
 0x56b   : > { %v2255_v54 = vpop.f32.mrf.mxu3 }
 0x56c   : > { %v2256_v37 = vadd.f32 %v2255_v54, %v5502_v22  ;;  %4281 = vmatmul.msk.f32.gmra.mxu0 %vm917_vm1, %v6285_v28  ;;  %4353 = vmatmul.msk.f32.gmra.mxu2 %vm917_vm1, %v5712_v53  ;;  %v1874_v22 = vsel %vm1821_vm8, %v1871_v25, %v1873_v50  ;;  %v1875_v25 = vrot.slane %v5546_v2, 7 }
 0x56d   : > { %v6309_v44 = vsel %vm1748_vm9, %v1874_v22, 0.0 }
 0x56e   : > { %v6296_v48 = vadd.f32 %v6099_v29, %v2256_v37 }
 0x570   : > { %4221 = vmatmul.msk.f32.gmra.mxu3 %vm917_vm1, %v6285_v28  ;;  %4437 = vmatmul.msk.f32.gmra.mxu1 %vm917_vm1, %v6176_v10  ;;  %v6320_v37 = vpop.f32.mrf.mxu1 }
 0x571   : > { %v6305_v58 = vpop.f32.mrf.mxu0  ;;  %7288 = vst [vmem:[#allocation119_spill] sm:$0xff] %v6320_v37 }
 0x573   : > { %v2258_v53 = vpop.f32.mrf.mxu3 }
 0x574   : > { %v2259_v29 = vadd.f32 %v2258_v53, %v5513_v46  ;;  %4282 = vmatmul.msk.f32.gmra.mxu0 %vm917_vm1, %v6309_v44  ;;  %4354 = vmatmul.msk.f32.gmra.mxu2 %vm917_vm1, %v5734_v8  ;;  %v6326_v46 = vpop.f32.mrf.mxu2  ;;  %v6331_v8 = vsel %vm1821_vm8, %v1873_v50, %v1875_v25 }
 0x576   : > { %v6317_v54 = vadd.f32 %v6130_v47, %v2259_v29  ;;  %v1877_v29 = vrot.slane %v5576_v40, 7 }
 0x578   : > { %4222 = vmatmul.msk.f32.gmra.mxu3 %vm917_vm1, %v6309_v44  ;;  %4438 = vmatmul.msk.f32.gmra.mxu1 %vm917_vm1, %v6203_v32  ;;  %v1878_v50 = vsel %vm1821_vm8, %v1875_v25, %v1877_v29  ;;  %v2986_v25 = vrot.slane %v5626_v55, 1 }
 0x579   : > { %v6328_v22 = vpop.f32.mrf.mxu0 }
 0x57b   : > { %v2261_v53 = vpop.f32.mrf.mxu3 }
 0x57c   : > { %v2262_v47 = vadd.f32 %v2261_v53, %v5536_v3  ;;  %4283 = vmatmul.msk.f32.gmra.mxu0 %vm917_vm1, %v6331_v8  ;;  %4355 = vmatmul.msk.f32.gmra.mxu2 %vm917_vm1, %v5758_v4  ;;  %v1781_v3 = vld [vmem:[%s7087_s6 + $0xe8] sm:$0xff]  ;;  %v6352_v4 = vpop.f32.mrf.mxu1 }
 0x57d   : > { %3304 = vmatpush.msra.mxu0 %v1781_v3  ;;  %7290 = vst [vmem:[#allocation121_spill] sm:$0xff] %v6352_v4  ;;  %v7291_v4 = vrot.slane %v5610_v13, 1 }
 0x57e   : > { %v6340_v37 = vadd.f32 %v6164_v5, %v2262_v47  ;;  %v1780_v5 = vld [vmem:[%s7087_s6 + $0xe0] sm:$0xff]  ;;  %v6357_v47 = vpop.f32.mrf.mxu2 }
 0x57f   : > { %3305 = vmatpush.msra.mxu0 %v1780_v5  ;;  %v7295_v5 = vrot.slane %v5230_v27, 1 }
 0x580   : > { %4223 = vmatmul.msk.f32.gmra.mxu3 %vm917_vm1, %v6331_v8  ;;  %4439 = vmatmul.msk.f32.gmra.mxu1 %vm917_vm1, %v6234_v26  ;;  %v6361_v26 = vsel %vm1748_vm9, %v1878_v50, 0.0  ;;  %v1879_v50 = vrot.slane %v5593_v16, 7 }
 0x581   : > { %v6350_v53 = vpop.f32.mrf.mxu0 }
 0x582   : > { %7289 = vst [vmem:[#allocation120_spill] sm:$0xff] %v6350_v53  ;;  %v6375_v53 = vsel %vm2322_vm3, %v7291_v4, %v2986_v25 }
 0x583   : > { %v2264_v56 = vpop.f32.mrf.mxu3  ;;  %7292 = vst [vmem:[#allocation122_spill] sm:$0xff] %v6375_v53 }
 0x584   : > { %v2265_v32 = vadd.f32 %v2264_v56, %v5562_v19  ;;  %4284 = vmatmul.msk.f32.gmra.mxu0 %vm917_vm1, %v6361_v26  ;;  %4356 = vmatmul.msk.f32.gmra.mxu2 %vm917_vm1, %v5782_v24  ;;  %v6385_v24 = vsel %vm1821_vm8, %v1877_v29, %v1879_v50 }
 0x586   : > { %v6370_v3 = vadd.f32 %v6198_v52, %v2265_v32  ;;  %v2679_v52 = vrot.slane %v5610_v13, 7  ;;  %v6388_v32 = vpop.f32.mrf.mxu1 }
 0x587   : > { %7294 = vst [vmem:[#allocation124_spill] sm:$0xff] %v6388_v32  ;;  %v7308_v32 = vld [vmem:[#allocation30_spill] sm:$0xff] }
 0x588   : > { %4224 = vmatmul.msk.f32.gmra.mxu3 %vm917_vm1, %v6361_v26  ;;  %4440 = vmatmul.msk.f32.gmra.mxu1 %vm917_vm1, %v6375_v53  ;;  %v2991_v53 = vsel %vm2322_vm3, %v2986_v25, %v7295_v5  ;;  %v7302_v5 = vrot.slane %v5626_v55, 7 }
 0x589   : > { %v6382_v19 = vpop.f32.mrf.mxu0  ;;  %v6403_v13 = vsel %vm1751_vm7, %v2991_v53, 0.0 }
 0x58a   : > { %7293 = vst [vmem:[#allocation123_spill] sm:$0xff] %v6382_v19  ;;  %v2608_v19 = vpop.f32.mrf.mxu2 }
 0x58b   : > { %v2267_v56 = vpop.f32.mrf.mxu3  ;;  %7296 = vst [vmem:[#allocation125_spill] sm:$0xff] %v6403_v13 }
 0x58c   : > { %v2268_v4 = vadd.f32 %v2267_v56, %v5585_v0  ;;  %4285 = vmatmul.msk.f32.gmra.mxu0 %vm917_vm1, %v6385_v24  ;;  %4357 = vmatmul.msk.f32.gmra.mxu2 %vm917_vm1, %v5806_v59  ;;  %v2680_v0 = vsel %vm1821_vm8, %v1879_v50, %v2679_v52 }
 0x58d   : > { %v6412_v27 = vsel %vm1748_vm9, %v2680_v0, 0.0  ;;  %v6432_v0 = vsel %vm1821_vm8, %v2679_v52, %v7302_v5  ;;  %v7309_v5 = vld [vmem:[#allocation41_spill] sm:$0xff] }
 0x58e   : > { %v6399_v29 = vadd.f32 %v6230_v35, %v2268_v4  ;;  %v6421_v25 = vpop.f32.mrf.mxu1  ;;  %v7300_v4 = vld [vmem:[#allocation28_spill] sm:$0xff] }
 0x58f   : > { %7298 = vst [vmem:[#allocation66_spill] sm:$0xff] %v6421_v25  ;;  %v7304_v25 = vld [vmem:[#allocation69_spill] sm:$0xff] }
 0x590   : > { %4225 = vmatmul.msk.f32.gmra.mxu3 %vm917_vm1, %v6385_v24  ;;  %4441 = vmatmul.msk.f32.gmra.mxu1 %vm917_vm1, %v6403_v13  ;;  %v7310_v13 = vld [vmem:[#allocation73_spill] sm:$0xff] }
 0x591   : > { %v6419_v53 = vpop.f32.mrf.mxu0 }
 0x592   : > { %v2611_v50 = vpop.f32.mrf.mxu2 }
 0x593   : > { %v2270_v59 = vpop.f32.mrf.mxu3 }
 0x594   : > { %v2271_v35 = vadd.f32 %v2270_v59, %v5602_v7  ;;  %4286 = vmatmul.msk.f32.gmra.mxu0 %vm917_vm1, %v6412_v27  ;;  %4358 = vmatmul.msk.f32.gmra.mxu2 %vm917_vm1, %v7297_v41  ;;  %v7303_v59 = vld [vmem:[#allocation38_spill] sm:$0xff] }
 0x596   : > { %v6424_v56 = vadd.f32 %v6269_v61, %v2271_v35 }
 0x598   : > { %7299 = vst [vmem:[#allocation126_spill] sm:$0xff] %v6424_v56  ;;  %4320 = vmatmul.msk.f32.vlgmr.msra.gmra.mxu3 %vm917_vm1, %v7300_v4  ;;  %3541 = vmatmul.f32.gmra.mxu1 %v7301_v42  ;;  %v6444_v4 = vpop.f32.mrf.mxu1 }
 0x599   : > { %v6442_v35 = vpop.f32.mrf.mxu0  ;;  %7307 = vst [vmem:[#allocation69_spill] sm:$0xff] %v6444_v4 }
 0x59a   : > { %7306 = vst [vmem:[#allocation38_spill] sm:$0xff] %v6442_v35  ;;  %v2614_v52 = vpop.f32.mrf.mxu2  ;;  %v7316_v35 = vld [vmem:[#allocation77_spill] sm:$0xff] }
 0x59b   : > { %v2273_v7 = vpop.f32.mrf.mxu3 }
 0x59c   : > { %v2274_v41 = vadd.f32 %v2273_v7, %v7303_v59  ;;  %4287 = vmatmul.msk.f32.gmra.mxu0 %vm917_vm1, %v6432_v0  ;;  %4359 = vmatmul.msk.f32.gmra.mxu2 %vm917_vm1, %v7304_v25  ;;  %v7311_v25 = vld [vmem:[#allocation6_spill] sm:$0xff] }
 0x59e   : > { %v6440_v61 = vadd.f32 %v6298_v33, %v2274_v41  ;;  %v7313_v41 = vld [vmem:[#allocation32_spill] sm:$0xff] }
 0x5a0   : > { %7305 = vst [vmem:[#allocation28_spill] sm:$0xff] %v6440_v61  ;;  %4321 = vmatmul.msk.f32.gmra.mxu3 %vm917_vm1, %v7308_v32  ;;  %3544 = vmatmul.f32.gmra.mxu1 %v7301_v42  ;;  %v3651_v32 = vld [vmem:[%s7089_s8 + $0x18] sm:$0xff] }
 0x5a1   : > { %v6459_v4 = vpop.f32.mrf.mxu0  ;;  %3764 = vmatpush.msrb.mxu3 %v3651_v32  ;;  %v7322_v32 = vld [vmem:[#allocation81_spill] sm:$0xff] }
 0x5a2   : > { %7314 = vst [vmem:[#allocation41_spill] sm:$0xff] %v6459_v4  ;;  %v2617_v61 = vpop.f32.mrf.mxu2  ;;  %v7321_v4 = vld [vmem:[#allocation47_spill] sm:$0xff] }
 0x5a3   : > { %v2276_v7 = vpop.f32.mrf.mxu3 }
 0x5a4   : > { %v2277_v59 = vadd.f32 %v2276_v7, %v7309_v5  ;;  %4360 = vmatmul.msk.f32.gmra.mxu2 %vm917_vm1, %v7310_v13  ;;  %4382 = vmatmul.msk.f32.vlgmr.msra.gmra.mxu0 %vm917_vm1, %v7311_v25  ;;  %v7315_v5 = vld [vmem:[#allocation44_spill] sm:$0xff]  ;;  %v7317_v25 = vld [vmem:[#allocation10_spill] sm:$0xff] }
 0x5a6   : > { %v6455_v33 = vadd.f32 %v6326_v46, %v2277_v59  ;;  %v7319_v59 = vld [vmem:[#allocation34_spill] sm:$0xff] }
 0x5a8   : > { %7312 = vst [vmem:[#allocation30_spill] sm:$0xff] %v6455_v33  ;;  %4322 = vmatmul.msk.f32.gmra.mxu3 %vm917_vm1, %v7313_v41 }
 0x5a9   : > { %v6474_v41 = vpop.f32.mrf.mxu0 }
 0x5aa   : > { %7320 = vst [vmem:[#allocation6_spill] sm:$0xff] %v6474_v41  ;;  %v7327_v41 = vld [vmem:[#allocation9_spill] sm:$0xff] }
 0x5ab   : > { %v2279_v7 = vpop.f32.mrf.mxu3 }
 0x5ac   : > { %v2280_v13 = vadd.f32 %v2279_v7, %v7315_v5  ;;  %4361 = vmatmul.msk.f32.gmra.mxu2 %vm917_vm1, %v7316_v35  ;;  %4383 = vmatmul.msk.f32.gmra.mxu0 %vm917_vm1, %v7317_v25  ;;  %v7323_v7 = vld [vmem:[#allocation4_spill] sm:$0xff]  ;;  %v2620_v35 = vpop.f32.mrf.mxu2 }
 0x5ad   : > { %v7324_v25 = vld [vmem:[#allocation36_spill] sm:$0xff] }
 0x5ae   : > { %v6470_v46 = vadd.f32 %v6357_v47, %v2280_v13  ;;  %v7325_v13 = vld [vmem:[#allocation50_spill] sm:$0xff] }
 0x5b0   : > { %7318 = vst [vmem:[#allocation73_spill] sm:$0xff] %v6470_v46  ;;  %4323 = vmatmul.msk.f32.gmra.mxu3 %vm917_vm1, %v7319_v59  ;;  %v7326_v46 = vld [vmem:[#allocation85_spill] sm:$0xff] }
 0x5b3   : > { %v2282_v33 = vpop.f32.mrf.mxu3 }
 0x5b4   : > { %v2283_v56 = vadd.f32 %v2282_v33, %v7321_v4  ;;  %4362 = vmatmul.msk.f32.gmra.mxu2 %vm917_vm1, %v7322_v32  ;;  %4384 = vmatmul.msk.f32.gmra.mxu0 %vm917_vm1, %v7323_v7  ;;  %v6490_v4 = vpop.f32.mrf.mxu0  ;;  %v2623_v32 = vpop.f32.mrf.mxu2  ;;  %v7329_v7 = vld [vmem:[#allocation39_spill] sm:$0xff] }
 0x5b6   : > { %v6481_v5 = vadd.f32 %v2608_v19, %v2283_v56  ;;  %v7330_v56 = vld [vmem:[#allocation52_spill] sm:$0xff] }
 0x5b8   : > { %4324 = vmatmul.msk.f32.gmra.mxu3 %vm917_vm1, %v7324_v25 }
 0x5bb   : > { %v2285_v47 = vpop.f32.mrf.mxu3 }
 0x5bc   : > { %v2286_v59 = vadd.f32 %v2285_v47, %v7325_v13  ;;  %4363 = vmatmul.msk.f32.gmra.mxu2 %vm917_vm1, %v7326_v46  ;;  %4385 = vmatmul.msk.f32.gmra.mxu0 %vm917_vm1, %v7327_v41  ;;  %v7331_v47 = vld [vmem:[#allocation3_spill] sm:$0xff]  ;;  %v6503_v41 = vpop.f32.mrf.mxu0  ;;  %v7333_v13 = vld [vmem:[#allocation42_spill] sm:$0xff] }
 0x5be   : > { %v6492_v33 = vadd.f32 %v2611_v50, %v2286_v59  ;;  %v2626_v50 = vpop.f32.mrf.mxu2 }
 0x5c0   : > { %7328 = vst [vmem:[#allocation32_spill] sm:$0xff] %v6492_v33  ;;  %4325 = vmatmul.msk.f32.gmra.mxu3 %vm917_vm1, %v7329_v7  ;;  %v7334_v33 = vld [vmem:[#allocation55_spill] sm:$0xff] }
 0x5c3   : > { %v2288_v19 = vpop.f32.mrf.mxu3 }
 0x5c4   : > { %v2289_v25 = vadd.f32 %v2288_v19, %v7330_v56  ;;  %4364 = vmatmul.msk.f32.gmra.mxu2 %vm917_vm1, %v5973_v21  ;;  %4386 = vmatmul.msk.f32.gmra.mxu0 %vm917_vm1, %v7331_v47  ;;  %v7335_v19 = vld [vmem:[#allocation8_spill] sm:$0xff]  ;;  %v7336_v56 = vld [vmem:[#allocation45_spill] sm:$0xff] }
 0x5c6   : > { %v6501_v46 = vadd.f32 %v2614_v52, %v2289_v25  ;;  %v6516_v52 = vpop.f32.mrf.mxu0  ;;  %v2629_v25 = vpop.f32.mrf.mxu2 }
 0x5c8   : > { %7332 = vst [vmem:[#allocation44_spill] sm:$0xff] %v6501_v46  ;;  %4326 = vmatmul.msk.f32.gmra.mxu3 %vm917_vm1, %v7333_v13  ;;  %v7337_v13 = vld [vmem:[#allocation58_spill] sm:$0xff] }
 0x5cb   : > { %v2291_v59 = vpop.f32.mrf.mxu3 }
 0x5cc   : > { %v2292_v7 = vadd.f32 %v2291_v59, %v7334_v33  ;;  %4365 = vmatmul.msk.f32.gmra.mxu2 %vm917_vm1, %v5995_v6  ;;  %4387 = vmatmul.msk.f32.gmra.mxu0 %vm917_vm1, %v7335_v19  ;;  %v7338_v33 = vld [vmem:[#allocation2_spill] sm:$0xff]  ;;  %v7340_v59 = vld [vmem:[#allocation48_spill] sm:$0xff]  ;;  %v7341_v19 = vld [vmem:[#allocation61_spill] sm:$0xff] }
 0x5ce   : > { %v6512_v21 = vadd.f32 %v2617_v61, %v2292_v7  ;;  %v6527_v61 = vpop.f32.mrf.mxu0 }
 0x5d0   : > { %4327 = vmatmul.msk.f32.gmra.mxu3 %vm917_vm1, %v7336_v56 }
 0x5d3   : > { %v2294_v47 = vpop.f32.mrf.mxu3 }
 0x5d4   : > { %v2295_v46 = vadd.f32 %v2294_v47, %v7337_v13  ;;  %4366 = vmatmul.msk.f32.gmra.mxu2 %vm917_vm1, %v6026_v9  ;;  %4388 = vmatmul.msk.f32.gmra.mxu0 %vm917_vm1, %v7338_v33  ;;  %v7342_v47 = vld [vmem:[#allocation7_spill] sm:$0xff]  ;;  %v2632_v9 = vpop.f32.mrf.mxu2 }
 0x5d5   : > { %v7344_v33 = vld [vmem:[#allocation51_spill] sm:$0xff] }
 0x5d6   : > { %v6523_v6 = vadd.f32 %v2620_v35, %v2295_v46  ;;  %v7345_v46 = vld [vmem:[#allocation64_spill] sm:$0xff] }
 0x5d8   : > { %7339 = vst [vmem:[#allocation77_spill] sm:$0xff] %v6523_v6  ;;  %4328 = vmatmul.msk.f32.gmra.mxu3 %vm917_vm1, %v7340_v59  ;;  %v7346_v6 = vld [vmem:[#allocation5_spill] sm:$0xff] }
 0x5db   : > { %v2297_v7 = vpop.f32.mrf.mxu3 }
 0x5dc   : > { %v2298_v56 = vadd.f32 %v2297_v7, %v7341_v19  ;;  %4367 = vmatmul.msk.f32.gmra.mxu2 %vm917_vm1, %v6060_v31  ;;  %4389 = vmatmul.msk.f32.gmra.mxu0 %vm917_vm1, %v7342_v47  ;;  %v6543_v7 = vpop.f32.mrf.mxu0  ;;  %v2635_v19 = vpop.f32.mrf.mxu2  ;;  %v7348_v47 = vld [vmem:[#allocation53_spill] sm:$0xff] }
 0x5de   : > { %v6534_v13 = vadd.f32 %v2623_v32, %v2298_v56  ;;  %v3650_v32 = vld [vmem:[%s7089_s8 + $0x10] sm:$0xff] }
 0x5df   : > { %3765 = vmatpush.msrb.mxu3 %v3650_v32  ;;  %v7353_v32 = vld [vmem:[#allocation12_spill] sm:$0xff] }
 0x5e0   : > { %7343 = vst [vmem:[#allocation10_spill] sm:$0xff] %v6534_v13  ;;  %4329 = vmatmul.msk.f32.gmra.mxu3 %vm917_vm1, %v7344_v33  ;;  %v7349_v33 = vld [vmem:[#allocation67_spill] sm:$0xff] }
 0x5e3   : > { %v2300_v35 = vpop.f32.mrf.mxu3 }
 0x5e4   : > { %v2301_v59 = vadd.f32 %v2300_v35, %v7345_v46  ;;  %4368 = vmatmul.msk.f32.gmra.mxu2 %vm917_vm1, %v6088_v49  ;;  %4390 = vmatmul.msk.f32.gmra.mxu0 %vm917_vm1, %v7346_v6  ;;  %v7350_v49 = vld [vmem:[#allocation11_spill] sm:$0xff]  ;;  %v6559_v6 = vpop.f32.mrf.mxu0  ;;  %v7351_v46 = vld [vmem:[#allocation56_spill] sm:$0xff] }
 0x5e6   : > { %v6545_v31 = vadd.f32 %v2626_v50, %v2301_v59  ;;  %v2638_v59 = vpop.f32.mrf.mxu2 }
 0x5e8   : > { %7347 = vst [vmem:[#allocation34_spill] sm:$0xff] %v6545_v31  ;;  %4330 = vmatmul.msk.f32.gmra.mxu3 %vm917_vm1, %v7348_v47  ;;  %v7352_v31 = vld [vmem:[#allocation71_spill] sm:$0xff] }
 0x5eb   : > { %v2303_v56 = vpop.f32.mrf.mxu3 }
 0x5ec   : > { %v2304_v35 = vadd.f32 %v2303_v56, %v7349_v33  ;;  %4369 = vmatmul.msk.f32.gmra.mxu2 %vm917_vm1, %v6114_v38  ;;  %4391 = vmatmul.msk.f32.gmra.mxu0 %vm917_vm1, %v7350_v49  ;;  %v7355_v56 = vld [vmem:[#allocation59_spill] sm:$0xff] }
 0x5ed   : > { %v7356_v49 = vld [vmem:[#allocation75_spill] sm:$0xff] }
 0x5ee   : > { %v6557_v50 = vadd.f32 %v2629_v25, %v2304_v35  ;;  %v6572_v25 = vpop.f32.mrf.mxu0  ;;  %v2641_v33 = vpop.f32.mrf.mxu2 }
 0x5f0   : > { %4331 = vmatmul.msk.f32.gmra.mxu3 %vm917_vm1, %v7351_v46 }
 0x5f3   : > { %v2306_v47 = vpop.f32.mrf.mxu3 }
 0x5f4   : > { %v2307_v13 = vadd.f32 %v2306_v47, %v7352_v31  ;;  %4370 = vmatmul.msk.f32.gmra.mxu2 %vm917_vm1, %v6151_v12  ;;  %4392 = vmatmul.msk.f32.gmra.mxu0 %vm917_vm1, %v7353_v32  ;;  %v7357_v31 = vld [vmem:[#allocation13_spill] sm:$0xff]  ;;  %v7359_v47 = vld [vmem:[#allocation62_spill] sm:$0xff]  ;;  %v7360_v32 = vld [vmem:[#allocation79_spill] sm:$0xff] }
 0x5f6   : > { %v6568_v38 = vadd.f32 %v2632_v9, %v2307_v13  ;;  %v6583_v9 = vpop.f32.mrf.mxu0 }
 0x5f8   : > { %7354 = vst [vmem:[#allocation47_spill] sm:$0xff] %v6568_v38  ;;  %4332 = vmatmul.msk.f32.gmra.mxu3 %vm917_vm1, %v7355_v56 }
 0x5fb   : > { %v2309_v35 = vpop.f32.mrf.mxu3 }
 0x5fc   : > { %v2310_v46 = vadd.f32 %v2309_v35, %v7356_v49  ;;  %4371 = vmatmul.msk.f32.gmra.mxu2 %vm917_vm1, %v6179_v20  ;;  %4393 = vmatmul.msk.f32.gmra.mxu0 %vm917_vm1, %v7357_v31  ;;  %v7361_v35 = vld [vmem:[#allocation14_spill] sm:$0xff]  ;;  %v2644_v20 = vpop.f32.mrf.mxu2  ;;  %v7363_v31 = vld [vmem:[#allocation65_spill] sm:$0xff] }
 0x5fe   : > { %v6579_v12 = vadd.f32 %v2635_v19, %v2310_v46  ;;  %v7364_v46 = vld [vmem:[#allocation83_spill] sm:$0xff] }
 0x600   : > { %7358 = vst [vmem:[#allocation81_spill] sm:$0xff] %v6579_v12  ;;  %4333 = vmatmul.msk.f32.gmra.mxu3 %vm917_vm1, %v7359_v47  ;;  %v7365_v12 = vld [vmem:[#allocation15_spill] sm:$0xff] }
 0x603   : > { %v2312_v13 = vpop.f32.mrf.mxu3 }
 0x604   : > { %v2313_v56 = vadd.f32 %v2312_v13, %v7360_v32  ;;  %4372 = vmatmul.msk.f32.gmra.mxu2 %vm917_vm1, %v6207_v51  ;;  %4394 = vmatmul.msk.f32.gmra.mxu0 %vm917_vm1, %v7361_v35  ;;  %v6599_v13 = vpop.f32.mrf.mxu0  ;;  %v3162_v32 = vpop.f32.mrf.mxu2  ;;  %v7367_v35 = vld [vmem:[#allocation68_spill] sm:$0xff] }
 0x606   : > { %v6590_v49 = vadd.f32 %v2638_v59, %v2313_v56  ;;  %v7368_v56 = vld [vmem:[#allocation86_spill] sm:$0xff] }
 0x608   : > { %7362 = vst [vmem:[#allocation4_spill] sm:$0xff] %v6590_v49  ;;  %4334 = vmatmul.msk.f32.gmra.mxu3 %vm917_vm1, %v7363_v31 }
 0x60b   : > { %v2315_v19 = vpop.f32.mrf.mxu3 }
 0x60c   : > { %v2316_v47 = vadd.f32 %v2315_v19, %v7364_v46  ;;  %4373 = vmatmul.msk.f32.gmra.mxu2 %vm917_vm1, %v6237_v36  ;;  %4395 = vmatmul.msk.f32.gmra.mxu0 %vm917_vm1, %v7365_v12  ;;  %v7369_v19 = vld [vmem:[#allocation17_spill] sm:$0xff]  ;;  %v7370_v36 = vld [vmem:[#allocation91_spill] sm:$0xff]  ;;  %v7371_v46 = vld [vmem:[#allocation92_spill] sm:$0xff] }
 0x60d   : > { %v2805_v12 = vadd.f32 %v7371_v46, %v7370_v36  ;;  %v7376_v36 = vld [vmem:[#allocation76_spill] sm:$0xff] }
 0x60e   : > { %v6601_v51 = vadd.f32 %v2641_v33, %v2316_v47  ;;  %v6614_v33 = vpop.f32.mrf.mxu0  ;;  %v7372_v47 = vld [vmem:[#allocation72_spill] sm:$0xff] }
 0x610   : > { %7366 = vst [vmem:[#allocation36_spill] sm:$0xff] %v6601_v51  ;;  %4335 = vmatmul.msk.f32.gmra.mxu3 %vm917_vm1, %v7367_v35  ;;  %v3165_v35 = vpop.f32.mrf.mxu2  ;;  %v7373_v51 = vld [vmem:[#allocation16_spill] sm:$0xff] }
 0x611   : > { %v2954_v38 = vadd.f32 %v7373_v51, %v2805_v12 }
 0x613   : > { %v2318_v59 = vpop.f32.mrf.mxu3 }
 0x614   : > { %v2319_v31 = vadd.f32 %v2318_v59, %v7368_v56  ;;  %4374 = vmatmul.msk.f32.gmra.mxu2 %vm917_vm1, %v6257_v34  ;;  %4396 = vmatmul.msk.f32.gmra.mxu0 %vm917_vm1, %v7369_v19  ;;  %v7374_v34 = vld [vmem:[#allocation94_spill] sm:$0xff]  ;;  %v7375_v19 = vld [vmem:[#allocation96_spill] sm:$0xff] }
 0x616   : > { %v6612_v49 = vadd.f32 %v2644_v20, %v2319_v31  ;;  %v2806_v20 = vadd.f32 %v7375_v19, %v7374_v34  ;;  %v6629_v46 = vpop.f32.mrf.mxu0  ;;  %v7380_v34 = vld [vmem:[#allocation80_spill] sm:$0xff]  ;;  %v7381_v19 = vld [vmem:[#allocation19_spill] sm:$0xff] }
 0x618   : > { %4336 = vmatmul.msk.f32.gmra.mxu3 %vm917_vm1, %v7372_v47  ;;  %v7377_v47 = vld [vmem:[#allocation18_spill] sm:$0xff]  ;;  %v3168_v12 = vpop.f32.mrf.mxu2 }
 0x619   : > { %v2955_v51 = vadd.f32 %v7377_v47, %v2806_v20 }
 0x61b   : > { %v3017_v59 = vpop.f32.mrf.mxu3 }
 0x61c   : > { %v3113_v56 = vadd.f32 %v3017_v59, %v2954_v38  ;;  %4375 = vmatmul.msk.f32.gmra.mxu2 %vm917_vm1, %v6285_v28  ;;  %4397 = vmatmul.msk.f32.gmra.mxu0 %vm917_vm1, %v5405_v23  ;;  %v7378_v23 = vld [vmem:[#allocation98_spill] sm:$0xff]  ;;  %v7379_v28 = vld [vmem:[#allocation99_spill] sm:$0xff] }
 0x61e   : > { %v6625_v31 = vadd.f32 %v3162_v32, %v3113_v56  ;;  %v2807_v32 = vadd.f32 %v7379_v28, %v7378_v23  ;;  %v6643_v20 = vpop.f32.mrf.mxu0  ;;  %v3649_v23 = vld [vmem:[%s7089_s8 + $0x8] sm:$0xff]  ;;  %v7384_v28 = vld [vmem:[#allocation20_spill] sm:$0xff] }
 0x61f   : > { %3766 = vmatpush.msrb.mxu3 %v3649_v23 }
 0x620   : > { %4337 = vmatmul.msk.f32.gmra.mxu3 %vm917_vm1, %v7376_v36  ;;  %v2956_v36 = vadd.f32 %v7381_v19, %v2807_v32  ;;  %v7387_v19 = vld [vmem:[#allocation106_spill] sm:$0xff] }
 0x623   : > { %v3020_v38 = vpop.f32.mrf.mxu3 }
 0x624   : > { %v3114_v59 = vadd.f32 %v3020_v38, %v2955_v51  ;;  %4376 = vmatmul.msk.f32.gmra.mxu2 %vm917_vm1, %v6309_v44  ;;  %4398 = vmatmul.msk.f32.gmra.mxu0 %vm917_vm1, %v5415_v15  ;;  %v3171_v15 = vpop.f32.mrf.mxu2  ;;  %v7382_v44 = vld [vmem:[#allocation102_spill] sm:$0xff] }
 0x626   : > { %v6638_v56 = vadd.f32 %v3165_v35, %v3114_v59  ;;  %v2808_v35 = vadd.f32 %v6107_v60, %v7382_v44  ;;  %v7383_v59 = vld [vmem:[#allocation84_spill] sm:$0xff]  ;;  %v6663_v60 = vpop.f32.mrf.mxu0  ;;  %v7388_v44 = vld [vmem:[#allocation87_spill] sm:$0xff] }
 0x628   : > { %4338 = vmatmul.msk.f32.gmra.mxu3 %vm917_vm1, %v7380_v34  ;;  %v2957_v32 = vadd.f32 %v7384_v28, %v2808_v35  ;;  %v7389_v35 = vld [vmem:[#allocation21_spill] sm:$0xff] }
 0x62b   : > { %v3023_v47 = vpop.f32.mrf.mxu3 }
 0x62c   : > { %v3115_v51 = vadd.f32 %v3023_v47, %v2956_v36  ;;  %4377 = vmatmul.msk.f32.gmra.mxu2 %vm917_vm1, %v6331_v8  ;;  %4399 = vmatmul.msk.f32.gmra.mxu0 %vm917_vm1, %v5431_v18  ;;  %v7385_v18 = vld [vmem:[#allocation22_spill] sm:$0xff] }
 0x62e   : > { %v6651_v38 = vadd.f32 %v3168_v12, %v3115_v51  ;;  %v7386_v12 = vld [vmem:[#allocation105_spill] sm:$0xff]  ;;  %v3174_v51 = vpop.f32.mrf.mxu2 }
 0x62f   : > { %v2809_v36 = vadd.f32 %v7387_v19, %v7386_v12  ;;  %v7392_v12 = vld [vmem:[#allocation23_spill] sm:$0xff] }
 0x630   : > { %4339 = vmatmul.msk.f32.gmra.mxu3 %vm917_vm1, %v7383_v59 }
 0x631   : > { %v2958_v59 = vadd.f32 %v7389_v35, %v2809_v36  ;;  %v7395_v35 = vld [vmem:[#allocation93_spill] sm:$0xff] }
 0x633   : > { %v3026_v8 = vpop.f32.mrf.mxu3 }
 0x634   : > { %v3116_v34 = vadd.f32 %v3026_v8, %v2957_v32  ;;  %4378 = vmatmul.msk.f32.gmra.mxu2 %vm917_vm1, %v6361_v26  ;;  %4400 = vmatmul.msk.f32.gmra.mxu0 %vm917_vm1, %v7385_v18  ;;  %v7390_v26 = vld [vmem:[#allocation109_spill] sm:$0xff] }
 0x635   : > { %v2810_v32 = vadd.f32 %v7390_v26, %v6162_v62 }
 0x636   : > { %v6667_v47 = vadd.f32 %v3171_v15, %v3116_v34  ;;  %v6680_v15 = vpop.f32.mrf.mxu0  ;;  %v7391_v34 = vld [vmem:[#allocation89_spill] sm:$0xff]  ;;  %v3177_v18 = vpop.f32.mrf.mxu2 }
 0x637   : > { %v2959_v19 = vadd.f32 %v7392_v12, %v2810_v32  ;;  %v7398_v12 = vld [vmem:[#allocation97_spill] sm:$0xff] }
 0x638   : > { %4340 = vmatmul.msk.f32.gmra.mxu3 %vm917_vm1, %v7388_v44 }
 0x63b   : > { %v3029_v23 = vpop.f32.mrf.mxu3 }
 0x63c   : > { %v3117_v28 = vadd.f32 %v3029_v23, %v2958_v59  ;;  %4379 = vmatmul.msk.f32.gmra.mxu2 %vm917_vm1, %v6385_v24  ;;  %4401 = vmatmul.msk.f32.gmra.mxu0 %vm917_vm1, %v5463_v17  ;;  %v7393_v24 = vld [vmem:[#allocation25_spill] sm:$0xff]  ;;  %v7394_v17 = vld [vmem:[#allocation110_spill] sm:$0xff]  ;;  %v7396_v23 = vld [vmem:[#allocation24_spill] sm:$0xff] }
 0x63d   : > { %v2811_v62 = vadd.f32 %v6200_v45, %v7394_v17 }
 0x63e   : > { %v6678_v8 = vadd.f32 %v3174_v51, %v3117_v28  ;;  %v6695_v59 = vpop.f32.mrf.mxu0  ;;  %v3180_v26 = vpop.f32.mrf.mxu2 }
 0x63f   : > { %v2960_v28 = vadd.f32 %v7396_v23, %v2811_v62  ;;  %v7400_v62 = vld [vmem:[#allocation101_spill] sm:$0xff] }
 0x640   : > { %4341 = vmatmul.msk.f32.gmra.mxu3 %vm917_vm1, %v7391_v34 }
 0x643   : > { %v3032_v36 = vpop.f32.mrf.mxu3 }
 0x644   : > { %v3118_v44 = vadd.f32 %v3032_v36, %v2959_v19  ;;  %4380 = vmatmul.msk.f32.gmra.mxu2 %vm917_vm1, %v6412_v27  ;;  %4402 = vmatmul.msk.f32.gmra.mxu0 %vm917_vm1, %v7393_v24  ;;  %v7397_v27 = vld [vmem:[#allocation113_spill] sm:$0xff]  ;;  %v7399_v19 = vld [vmem:[#allocation26_spill] sm:$0xff] }
 0x645   : > { %v2812_v45 = vadd.f32 %v6226_v11, %v7397_v27  ;;  %v2813_v11 = vadd.f32 %v6253_v57, %v6246_v1  ;;  %v7403_v1 = vld [vmem:[#allocation103_spill] sm:$0xff]  ;;  %v7404_v57 = vld [vmem:[#allocation29_spill] sm:$0xff] }
 0x646   : > { %v6691_v51 = vadd.f32 %v3177_v18, %v3118_v44  ;;  %v6709_v44 = vpop.f32.mrf.mxu0 }
 0x647   : > { %v2961_v36 = vadd.f32 %v7399_v19, %v2812_v45 }
 0x648   : > { %4342 = vmatmul.msk.f32.gmra.mxu3 %vm917_vm1, %v7395_v35  ;;  %v7401_v35 = vld [vmem:[#allocation27_spill] sm:$0xff] }
 0x649   : > { %v2962_v23 = vadd.f32 %v7401_v35, %v2813_v11  ;;  %v2816_v11 = vadd.f32 %v6328_v22, %v6317_v54  ;;  %v7409_v22 = vld [vmem:[#allocation112_spill] sm:$0xff] }
 0x64b   : > { %v3035_v32 = vpop.f32.mrf.mxu3 }
 0x64c   : > { %v3119_v34 = vadd.f32 %v3035_v32, %v2960_v28  ;;  %4381 = vmatmul.msk.f32.gmra.mxu2 %vm917_vm1, %v6432_v0  ;;  %4403 = vmatmul.msk.f32.gmra.mxu0 %vm917_vm1, %v5483_v14  ;;  %v3183_v14 = vpop.f32.mrf.mxu2  ;;  %v7402_v32 = vld [vmem:[#allocation117_spill] sm:$0xff] }
 0x64e   : > { %v6704_v18 = vadd.f32 %v3180_v26, %v3119_v34  ;;  %v2814_v34 = vadd.f32 %v7402_v32, %v6272_v63  ;;  %v7406_v63 = vld [vmem:[#allocation31_spill] sm:$0xff] }
 0x650   : > { %4343 = vmatmul.msk.f32.gmra.mxu3 %vm917_vm1, %v7398_v12  ;;  %v2963_v27 = vadd.f32 %v7404_v57, %v2814_v34  ;;  %v7411_v57 = vld [vmem:[#allocation123_spill] sm:$0xff] }
 0x653   : > { %v3038_v24 = vpop.f32.mrf.mxu3 }
 0x654   : > { %v3120_v17 = vadd.f32 %v3038_v24, %v2961_v36  ;;  %4404 = vmatmul.msk.f32.gmra.mxu0 %vm917_vm1, %v5494_v43  ;;  %3251 = vmatmul.f32.gmra.mxu2 %v7301_v42  ;;  %v3313_v43 = vpop.f32.mrf.mxu0  ;;  %v7405_v36 = vld [vmem:[#allocation107_spill] sm:$0xff] }
 0x656   : > { %v6716_v0 = vadd.f32 %v3183_v14, %v3120_v17 }
 0x658   : > { %4344 = vmatmul.msk.f32.gmra.mxu3 %vm917_vm1, %v7400_v62 }
 0x65b   : > { %v3041_v28 = vpop.f32.mrf.mxu3 }
 0x65c   : > { %v6721_v26 = vadd.f32 %v3041_v28, %v2962_v23  ;;  %4405 = vmatmul.msk.f32.gmra.mxu0 %vm917_vm1, %v5505_v30  ;;  %3254 = vmatmul.f32.gmra.mxu2 %v7301_v42  ;;  %v2815_v30 = vadd.f32 %v6305_v58, %v6296_v48  ;;  %v6737_v19 = vpop.f32.mrf.mxu0  ;;  %v7407_v58 = vld [vmem:[#allocation33_spill] sm:$0xff] }
 0x65d   : > { %v2965_v62 = vadd.f32 %v7407_v58, %v2816_v11  ;;  %v7416_v11 = vld [vmem:[#allocation43_spill] sm:$0xff] }
 0x65e   : > { %v2964_v24 = vadd.f32 %v7406_v63, %v2815_v30  ;;  %v7414_v63 = vld [vmem:[#allocation37_spill] sm:$0xff] }
 0x660   : > { %4345 = vmatmul.msk.f32.gmra.mxu3 %vm917_vm1, %v7403_v1 }
 0x663   : > { %v3044_v45 = vpop.f32.mrf.mxu3 }
 0x664   : > { %v6731_v12 = vadd.f32 %v3044_v45, %v2963_v27  ;;  %4406 = vmatmul.msk.f32.gmra.mxu0 %vm917_vm1, %v5528_v39  ;;  %v3648_v39 = vld [vmem:[%s7089_s8] sm:$0xff]  ;;  %v6753_v48 = vpop.f32.mrf.mxu0  ;;  %v2818_v27 = vadd.f32 %v7411_v57, %v6370_v3  ;;  %v3403_v3 = vadd.f32 %v6695_v59, %v6625_v31  ;;  %v7420_v31 = vld [vmem:[#allocation125_spill] sm:$0xff] }
 0x665   : > { %3767 = vmatpush.msrb.mxu3 %v3648_v39 }
 0x668   : > { %4346 = vmatmul.msk.f32.gmra.mxu3 %vm917_vm1, %v7405_v36 }
 0x66b   : > { %v3047_v17 = vpop.f32.mrf.mxu3 }
 0x66c   : > { %v6742_v14 = vadd.f32 %v3047_v17, %v2964_v24  ;;  %4407 = vmatmul.msk.f32.gmra.mxu0 %vm917_vm1, %v5546_v2  ;;  %v7408_v2 = vld [vmem:[#allocation120_spill] sm:$0xff]  ;;  %v6765_v32 = vpop.f32.mrf.mxu0  ;;  %v2819_v17 = vadd.f32 %v6419_v53, %v6399_v29  ;;  %v6799_v29 = vld [vmem:[%s7088_s7] ss:$0 sm:$0xff] }
 0x66d   : > { %v2817_v54 = vadd.f32 %v7408_v2, %v6340_v37  ;;  %v7413_v37 = vld [vmem:[#allocation40_spill] sm:$0xff]  ;;  %v7418_v2 = vld [vmem:[#allocation38_spill] sm:$0xff] }
 0x66e   : > { %v2967_v45 = vadd.f32 %v7413_v37, %v2818_v27  ;;  %v2968_v39 = vadd.f32 %v7416_v11, %v2819_v17  ;;  %v7423_v37 = vld [vmem:[#allocation41_spill] sm:$0xff] }
 0x66f   : > { %v7425_v11 = vld [vmem:[#allocation49_spill] sm:$0xff] }
 0x670   : > { %4347 = vmatmul.msk.f32.gmra.mxu3 %vm917_vm1, %v6176_v10  ;;  %v7410_v10 = vld [vmem:[#allocation35_spill] sm:$0xff] }
 0x671   : > { %v2966_v28 = vadd.f32 %v7410_v10, %v2817_v54 }
 0x673   : > { %v3050_v35 = vpop.f32.mrf.mxu3 }
 0x674   : > { %v6756_v23 = vadd.f32 %v3050_v35, %v2965_v62  ;;  %4408 = vmatmul.msk.f32.gmra.mxu0 %vm917_vm1, %v5576_v40  ;;  %v7412_v40 = vld [vmem:[#allocation115_spill] sm:$0xff]  ;;  %v6780_v24 = vpop.f32.mrf.mxu0  ;;  %v7417_v35 = vld [vmem:[#allocation126_spill] sm:$0xff] }
 0x675   : > { %v2820_v54 = vadd.f32 %v7418_v2, %v7417_v35  ;;  %v7426_v2 = vld [vmem:[#allocation30_spill] sm:$0xff] }
 0x678   : > { %4348 = vmatmul.msk.f32.gmra.mxu3 %vm917_vm1, %v7409_v22  ;;  %v7419_v22 = vld [vmem:[#allocation114_spill] sm:$0xff] }
 0x679   : > { %v3548_v10 = vadd.f32 %v7419_v22, %v3403_v3 }
 0x67b   : > { %v3053_v34 = vpop.f32.mrf.mxu3  ;;  %v3584_v59 = vadd.f32 %v6799_v29, %v3548_v10 }
 0x67c   : > { %v6767_v1 = vadd.f32 %v3053_v34, %v2966_v28  ;;  %4409 = vmatmul.msk.f32.gmra.mxu0 %vm917_vm1, %v5593_v16  ;;  %v7415_v16 = vld [vmem:[#allocation122_spill] sm:$0xff]  ;;  %v6801_v53 = vpop.f32.mrf.mxu0 }
 0x67d   : > { %v7421_v28 = vld [vmem:[#allocation46_spill] sm:$0xff] }
 0x67e   : > { %v2969_v34 = vadd.f32 %v7421_v28, %v2820_v54  ;;  %v7427_v54 = vld [vmem:[#allocation6_spill] sm:$0xff] }
 0x67f   : > { %v2822_v22 = vadd.f32 %v7427_v54, %v7426_v2 }
 0x680   : > { %4349 = vmatmul.msk.f32.gmra.mxu3 %vm917_vm1, %v7412_v40  ;;  %v7422_v40 = vld [vmem:[#allocation28_spill] sm:$0xff] }
 0x683   : > { %v3056_v30 = vpop.f32.mrf.mxu3 }
 0x684   : > { %v6776_v36 = vadd.f32 %v3056_v30, %v2967_v45  ;;  %4410 = vmatmul.msk.f32.gmra.mxu0 %vm917_vm1, %v7414_v63  ;;  %v2821_v45 = vadd.f32 %v7423_v37, %v7422_v40  ;;  %v3616_v30 = vmax.f32 %v3584_v59, 0.0  ;;  %v7424_v63 = vld [vmem:[#allocation116_spill] sm:$0xff]  ;;  %v6818_v3 = vpop.f32.mrf.mxu0 }
 0x688   : > { %4350 = vmatmul.msk.f32.gmra.mxu3 %vm917_vm1, %v7415_v16  ;;  %v6815_v16 = vpop.f32.mrf.mxu2 }
 0x68b   : > { %v3059_v58 = vpop.f32.mrf.mxu3 }
 0x68c   : > { %v6789_v62 = vadd.f32 %v3059_v58, %v2968_v39  ;;  %4411 = vmatmul.msk.f32.gmra.mxu0 %vm917_vm1, %v5626_v55  ;;  %v3404_v55 = vadd.f32 %v6709_v44, %v6638_v56  ;;  %v3405_v44 = vadd.f32 %v3313_v43, %v6651_v38  ;;  %v2970_v39 = vadd.f32 %v7425_v11, %v2821_v45  ;;  %v7430_v45 = vld [vmem:[#allocation73_spill] sm:$0xff] }
 0x68d   : > { %v3406_v43 = vadd.f32 %v6737_v19, %v6667_v47  ;;  %v3407_v47 = vadd.f32 %v6753_v48, %v6678_v8  ;;  %v7432_v19 = vld [vmem:[#allocation57_spill] sm:$0xff]  ;;  %v3408_v8 = vadd.f32 %v6765_v32, %v6691_v51  ;;  %v7434_v48 = vld [vmem:[#allocation60_spill] sm:$0xff]  ;;  %v3409_v32 = vadd.f32 %v6780_v24, %v6704_v18 }
 0x68e   : > { %v3549_v17 = vadd.f32 %v7424_v63, %v3404_v55  ;;  %v6829_v55 = vpop.f32.mrf.mxu1  ;;  %v3410_v24 = vadd.f32 %v6801_v53, %v6716_v0 }
 0x690   : > { %4351 = vmatmul.msk.f32.gmra.mxu3 %vm917_vm1, %v7420_v31  ;;  %v3585_v56 = vadd.f32 %v6799_v29, %v3549_v17  ;;  %v7428_v31 = vld [vmem:[#allocation118_spill] sm:$0xff]  ;;  %v6832_v28 = vpop.f32.mrf.mxu2  ;;  %v7431_v17 = vld [vmem:[#allocation119_spill] sm:$0xff] }
 0x691   : > { %v3550_v59 = vadd.f32 %v7428_v31, %v3405_v44  ;;  %v7433_v31 = vld [vmem:[#allocation121_spill] sm:$0xff] }
 0x692   : > { %v3617_v10 = vmax.f32 %v3585_v56, 0.0  ;;  %v3551_v56 = vadd.f32 %v7431_v17, %v3406_v43 }
 0x693   : > { %v3062_v57 = vpop.f32.mrf.mxu3  ;;  %v3586_v38 = vadd.f32 %v6799_v29, %v3550_v59  ;;  %v3552_v59 = vadd.f32 %v7433_v31, %v3407_v47  ;;  %v7439_v31 = vld [vmem:[#allocation66_spill] sm:$0xff] }
 0x694   : > { %v6809_v27 = vadd.f32 %v3062_v57, %v2969_v34  ;;  %3396 = vmatmul.f32.gmra.mxu0 %v7301_v42  ;;  %v7429_v34 = vld [vmem:[#allocation54_spill] sm:$0xff]  ;;  %v3587_v11 = vadd.f32 %v6799_v29, %v3551_v56 }
 0x695   : > { %v2971_v57 = vadd.f32 %v7429_v34, %v2822_v22  ;;  %v3618_v63 = vmax.f32 %v3586_v38, 0.0  ;;  %v2824_v22 = vadd.f32 %v6503_v41, %v6481_v5  ;;  %v3588_v38 = vadd.f32 %v6799_v29, %v3552_v59 }
 0x696   : > { %v6846_v44 = vpop.f32.mrf.mxu1  ;;  %v3554_v59 = vadd.f32 %v7439_v31, %v3409_v32 }
 0x697   : > { %v2973_v43 = vadd.f32 %v7434_v48, %v2824_v22  ;;  %v7440_v48 = vld [vmem:[#allocation70_spill] sm:$0xff] }
 0x698   : > { %4442 = vmatmul.msk.f32.vlgmr.msrb.gmra.mxu3 %vm917_vm1, %v3616_v30  ;;  %v2823_v30 = vadd.f32 %v6490_v4, %v7430_v45  ;;  %v6852_v2 = vpop.f32.mrf.mxu2  ;;  %v7435_v45 = vld [vmem:[#allocation32_spill] sm:$0xff]  ;;  %v3590_v18 = vadd.f32 %v6799_v29, %v3554_v59 }
 0x699   : > { %v2825_v5 = vadd.f32 %v6516_v52, %v7435_v45 }
 0x69b   : > { %v3065_v58 = vpop.f32.mrf.mxu3 }
 0x69c   : > { %v6823_v35 = vadd.f32 %v3065_v58, %v2970_v39  ;;  %3399 = vmatmul.f32.gmra.mxu0 %v7301_v42  ;;  %v6838_v42 = vpop.f32.mrf.mxu0  ;;  %v2972_v39 = vadd.f32 %v7432_v19, %v2823_v30  ;;  %v3620_v30 = vmax.f32 %v3588_v38, 0.0 }
 0x69e   : > { %v6866_v34 = vpop.f32.mrf.mxu1 }
 0x6a0   : > { %4443 = vmatmul.msk.f32.gmra.mxu3 %vm917_vm1, %v3617_v10  ;;  %v3619_v10 = vmax.f32 %v3587_v11, 0.0  ;;  %v6872_v41 = vpop.f32.mrf.mxu2  ;;  %v7437_v11 = vld [vmem:[#allocation63_spill] sm:$0xff] }
 0x6a1   : > { %v2974_v47 = vadd.f32 %v7437_v11, %v2825_v5  ;;  %v3622_v5 = vmax.f32 %v3590_v18, 0.0  ;;  %v7442_v11 = vld [vmem:[#allocation74_spill] sm:$0xff] }
 0x6a2   : > { %v7444_v18 = vld [vmem:[#allocation78_spill] sm:$0xff] }
 0x6a3   : > { %v3068_v40 = vpop.f32.mrf.mxu3 }
 0x6a4   : > { %v6840_v37 = vadd.f32 %v3068_v40, %v2971_v57  ;;  %v6856_v4 = vpop.f32.mrf.mxu0 }
 0x6a6   : > { %v6884_v52 = vpop.f32.mrf.mxu1 }
 0x6a8   : > { %4444 = vmatmul.msk.f32.gmra.mxu3 %vm917_vm1, %v3618_v63  ;;  %v7436_v63 = vld [vmem:[#allocation124_spill] sm:$0xff]  ;;  %v3198_v38 = vpop.f32.mrf.mxu2 }
 0x6a9   : > { %v3553_v17 = vadd.f32 %v7436_v63, %v3408_v8 }
 0x6ab   : > { %v3071_v58 = vpop.f32.mrf.mxu3  ;;  %v3589_v51 = vadd.f32 %v6799_v29, %v3553_v17 }
 0x6ac   : > { %v6854_v54 = vadd.f32 %v3071_v58, %v2972_v39  ;;  %v6875_v56 = vpop.f32.mrf.mxu0  ;;  %v7438_v58 = vld [vmem:[#allocation44_spill] sm:$0xff] }
 0x6ad   : > { %v2826_v22 = vadd.f32 %v6527_v61, %v7438_v58  ;;  %v2827_v61 = vadd.f32 %v6543_v7, %v6512_v21  ;;  %v7443_v21 = vld [vmem:[#allocation77_spill] sm:$0xff] }
 0x6ae   : > { %v3488_v17 = vpop.f32.mrf.mxu1  ;;  %v2828_v7 = vadd.f32 %v6559_v6, %v7443_v21 }
 0x6b0   : > { %4445 = vmatmul.msk.f32.gmra.mxu3 %vm917_vm1, %v3619_v10  ;;  %v3621_v10 = vmax.f32 %v3589_v51, 0.0  ;;  %v3266_v51 = vadd.f32 %v6815_v16, %v6721_v26  ;;  %v3201_v32 = vpop.f32.mrf.mxu2  ;;  %v3267_v26 = vadd.f32 %v6832_v28, %v6731_v12  ;;  %v3268_v28 = vadd.f32 %v6852_v2, %v6742_v14 }
 0x6b1   : > { %v3269_v2 = vadd.f32 %v6872_v41, %v6756_v23  ;;  %v3270_v23 = vadd.f32 %v3198_v38, %v6767_v1  ;;  %v3271_v1 = vadd.f32 %v3201_v32, %v6776_v36 }
 0x6b2   : > { %v3411_v53 = vadd.f32 %v6818_v3, %v3266_v51  ;;  %v3412_v59 = vadd.f32 %v6838_v42, %v3267_v26 }
 0x6b3   : > { %v3074_v57 = vpop.f32.mrf.mxu3 }
 0x6b4   : > { %v6868_v40 = vadd.f32 %v3074_v57, %v2973_v43  ;;  %v6890_v8 = vpop.f32.mrf.mxu0  ;;  %v2975_v43 = vadd.f32 %v7440_v48, %v2826_v22  ;;  %v3556_v31 = vadd.f32 %v6829_v55, %v3411_v53  ;;  %v3557_v12 = vadd.f32 %v6846_v44, %v3412_v59 }
 0x6b5   : > { %v2831_v59 = vadd.f32 %v6599_v13, %v6557_v50 }
 0x6b6   : > { %v3491_v16 = vpop.f32.mrf.mxu1  ;;  %v3592_v3 = vadd.f32 %v6799_v29, %v3556_v31  ;;  %v3593_v42 = vadd.f32 %v6799_v29, %v3557_v12 }
 0x6b8   : > { %4446 = vmatmul.msk.f32.gmra.mxu3 %vm917_vm1, %v3620_v30  ;;  %v7441_v30 = vld [vmem:[#allocation69_spill] sm:$0xff]  ;;  %v3625_v44 = vmax.f32 %v3593_v42, 0.0 }
 0x6b9   : > { %v3555_v63 = vadd.f32 %v7441_v30, %v3410_v24  ;;  %v2977_v24 = vadd.f32 %v7444_v18, %v2828_v7  ;;  %v3413_v30 = vadd.f32 %v6856_v4, %v3268_v28  ;;  %v3414_v7 = vadd.f32 %v6875_v56, %v3269_v2  ;;  %v7450_v28 = vld [vmem:[#allocation47_spill] sm:$0xff] }
 0x6ba   : > { %v2832_v50 = vadd.f32 %v6614_v33, %v7450_v28 }
 0x6bb   : > { %v3077_v19 = vpop.f32.mrf.mxu3  ;;  %v3591_v0 = vadd.f32 %v6799_v29, %v3555_v63  ;;  %v7446_v63 = vld [vmem:[#allocation82_spill] sm:$0xff]  ;;  %v3558_v21 = vadd.f32 %v6866_v34, %v3413_v30  ;;  %v3559_v18 = vadd.f32 %v6884_v52, %v3414_v7 }
 0x6bc   : > { %v6882_v39 = vadd.f32 %v3077_v19, %v2974_v47  ;;  %v2976_v47 = vadd.f32 %v7442_v11, %v2827_v61  ;;  %v3346_v19 = vpop.f32.mrf.mxu0  ;;  %v7445_v61 = vld [vmem:[#allocation10_spill] sm:$0xff] }
 0x6bd   : > { %v2829_v55 = vadd.f32 %v6572_v25, %v7445_v61  ;;  %v3594_v4 = vadd.f32 %v6799_v29, %v3558_v21  ;;  %v3595_v56 = vadd.f32 %v6799_v29, %v3559_v18  ;;  %v7449_v61 = vld [vmem:[#allocation90_spill] sm:$0xff] }
 0x6bf   : > { %v2978_v51 = vadd.f32 %v7446_v63, %v2829_v55  ;;  %v3626_v34 = vmax.f32 %v3594_v4, 0.0  ;;  %v2980_v55 = vadd.f32 %v7449_v61, %v2831_v59  ;;  %v3627_v13 = vmax.f32 %v3595_v56, 0.0 }
 0x6c0   : > { %4447 = vmatmul.msk.f32.gmra.mxu3 %vm917_vm1, %v3621_v10  ;;  %v3623_v10 = vmax.f32 %v3591_v0, 0.0  ;;  %v3494_v0 = vpop.f32.mrf.mxu1  ;;  %v3416_v63 = vadd.f32 %v3346_v19, %v3271_v1  ;;  %v7453_v19 = vld [vmem:[#allocation100_spill] sm:$0xff] }
 0x6c3   : > { %v3080_v57 = vpop.f32.mrf.mxu3 }
 0x6c4   : > { %v6896_v45 = vadd.f32 %v3080_v57, %v2975_v43  ;;  %v3204_v43 = vpop.f32.mrf.mxu2  ;;  %v3349_v6 = vpop.f32.mrf.mxu0 }
 0x6c5   : > { %v3272_v2 = vadd.f32 %v3204_v43, %v6789_v62 }
 0x6c7   : > { %v3417_v4 = vadd.f32 %v3349_v6, %v3272_v2  ;;  %v7455_v6 = vld [vmem:[#allocation104_spill] sm:$0xff] }
 0x6c8   : > { %4448 = vmatmul.msk.f32.gmra.mxu3 %vm917_vm1, %v3622_v5  ;;  %v3624_v5 = vmax.f32 %v3592_v3, 0.0 }
 0x6cb   : > { %v3083_v58 = vpop.f32.mrf.mxu3 }
 0x6cc   : > { %v6907_v22 = vadd.f32 %v3083_v58, %v2976_v47  ;;  %v7447_v47 = vld [vmem:[#allocation34_spill] sm:$0xff]  ;;  %v3207_v58 = vpop.f32.mrf.mxu2  ;;  %v3352_v14 = vpop.f32.mrf.mxu0 }
 0x6cd   : > { %v2830_v25 = vadd.f32 %v6583_v9, %v7447_v47  ;;  %v3497_v9 = vpop.f32.mrf.mxu1  ;;  %v3273_v62 = vadd.f32 %v3207_v58, %v6809_v27 }
 0x6d0   : > { %4449 = vmatmul.msk.f32.gmra.mxu3 %vm917_vm1, %v3623_v10  ;;  %v7448_v10 = vld [vmem:[#allocation88_spill] sm:$0xff] }
 0x6d1   : > { %v2979_v31 = vadd.f32 %v7448_v10, %v2830_v25 }
 0x6d3   : > { %v3086_v48 = vpop.f32.mrf.mxu3 }
 0x6d4   : > { %v6918_v57 = vadd.f32 %v3086_v48, %v2977_v24  ;;  %v3210_v24 = vpop.f32.mrf.mxu2  ;;  %v3355_v41 = vpop.f32.mrf.mxu0  ;;  %v3415_v48 = vadd.f32 %v6890_v8, %v3270_v23  ;;  %v7451_v8 = vld [vmem:[#allocation95_spill] sm:$0xff]  ;;  %v3418_v23 = vadd.f32 %v3352_v14, %v3273_v62 }
 0x6d5   : > { %v3500_v42 = vpop.f32.mrf.mxu1  ;;  %v3274_v27 = vadd.f32 %v3210_v24, %v6823_v35 }
 0x6d6   : > { %v3560_v52 = vadd.f32 %v3488_v17, %v3415_v48  ;;  %v3561_v17 = vadd.f32 %v3491_v16, %v3416_v63  ;;  %v3562_v16 = vadd.f32 %v3494_v0, %v3417_v4 }
 0x6d7   : > { %v3419_v14 = vadd.f32 %v3355_v41, %v3274_v27 }
 0x6d8   : > { %4450 = vmatmul.msk.f32.gmra.mxu3 %vm917_vm1, %v3624_v5  ;;  %v3596_v30 = vadd.f32 %v6799_v29, %v3560_v52  ;;  %v3597_v32 = vadd.f32 %v6799_v29, %v3561_v17  ;;  %v3598_v43 = vadd.f32 %v6799_v29, %v3562_v16  ;;  %v7457_v52 = vld [vmem:[#allocation108_spill] sm:$0xff] }
 0x6da   : > { %v3628_v21 = vmax.f32 %v3596_v30, 0.0  ;;  %v3629_v18 = vmax.f32 %v3597_v32, 0.0 }
 0x6db   : > { %v3089_v53 = vpop.f32.mrf.mxu3 }
 0x6dc   : > { %v6929_v11 = vadd.f32 %v3089_v53, %v2978_v51  ;;  %v3213_v38 = vpop.f32.mrf.mxu2  ;;  %v2981_v51 = vadd.f32 %v7451_v8, %v2832_v50  ;;  %v3358_v53 = vpop.f32.mrf.mxu0 }
 0x6dd   : > { %v3503_v36 = vpop.f32.mrf.mxu1 }
 0x6e0   : > { %4451 = vmatmul.msk.f32.gmra.mxu3 %vm917_vm1, %v3625_v44  ;;  %v7452_v44 = vld [vmem:[#allocation81_spill] sm:$0xff] }
 0x6e1   : > { %v2833_v33 = vadd.f32 %v6629_v46, %v7452_v44  ;;  %v3275_v44 = vadd.f32 %v3213_v38, %v6840_v37 }
 0x6e3   : > { %v3092_v26 = vpop.f32.mrf.mxu3  ;;  %v2982_v7 = vadd.f32 %v7453_v19, %v2833_v33  ;;  %v3420_v41 = vadd.f32 %v3358_v53, %v3275_v44  ;;  %v7458_v33 = vld [vmem:[#allocation111_spill] sm:$0xff] }
 0x6e4   : > { %v6940_v3 = vadd.f32 %v3092_v26, %v2979_v31  ;;  %v3216_v31 = vpop.f32.mrf.mxu2  ;;  %v3361_v59 = vpop.f32.mrf.mxu0 }
 0x6e5   : > { %v3506_v48 = vpop.f32.mrf.mxu1  ;;  %v3565_v4 = vadd.f32 %v3503_v36, %v3420_v41 }
 0x6e8   : > { %4452 = vmatmul.msk.f32.gmra.mxu3 %vm917_vm1, %v3626_v34  ;;  %v7454_v34 = vld [vmem:[#allocation4_spill] sm:$0xff] }
 0x6e9   : > { %v2834_v46 = vadd.f32 %v6643_v20, %v7454_v34  ;;  %v3630_v20 = vmax.f32 %v3598_v43, 0.0 }
 0x6eb   : > { %v3095_v5 = vpop.f32.mrf.mxu3  ;;  %v2983_v56 = vadd.f32 %v7455_v6, %v2834_v46 }
 0x6ec   : > { %v6950_v12 = vadd.f32 %v3095_v5, %v2980_v55  ;;  %v7456_v5 = vld [vmem:[#allocation36_spill] sm:$0xff]  ;;  %v3219_v50 = vpop.f32.mrf.mxu2  ;;  %v3364_v0 = vpop.f32.mrf.mxu0 }
 0x6ed   : > { %v2835_v28 = vadd.f32 %v6663_v60, %v7456_v5  ;;  %v3509_v8 = vpop.f32.mrf.mxu1  ;;  %v2836_v60 = vadd.f32 %v6680_v15, %v6612_v49  ;;  %v3276_v49 = vadd.f32 %v3216_v31, %v6854_v54  ;;  %v6997_v15 = vld [vmem:[%s7090_s9] ss:$0 sm:$0xff]  ;;  %v3277_v54 = vadd.f32 %v3219_v50, %v6868_v40 }
 0x6ef   : > { %v2984_v1 = vadd.f32 %v7457_v52, %v2835_v28  ;;  %v3421_v38 = vadd.f32 %v3361_v59, %v3276_v49 }
 0x6f0   : > { %4453 = vmatmul.msk.f32.gmra.mxu3 %vm917_vm1, %v3627_v13  ;;  %v3563_v13 = vadd.f32 %v3497_v9, %v3418_v23 }
 0x6f1   : > { %v3566_v36 = vadd.f32 %v3506_v48, %v3421_v38 }
 0x6f2   : > { %v3599_v58 = vadd.f32 %v6799_v29, %v3563_v13 }
 0x6f3   : > { %v3098_v47 = vpop.f32.mrf.mxu3  ;;  %v3602_v46 = vadd.f32 %v6799_v29, %v3566_v36 }
 0x6f4   : > { %v6958_v25 = vadd.f32 %v3098_v47, %v2981_v51  ;;  %v3631_v51 = vmax.f32 %v3599_v58, 0.0  ;;  %v3564_v47 = vadd.f32 %v3500_v42, %v3419_v14  ;;  %v3222_v9 = vpop.f32.mrf.mxu2  ;;  %v3367_v35 = vpop.f32.mrf.mxu0  ;;  %v3601_v42 = vadd.f32 %v6799_v29, %v3565_v4 }
 0x6f5   : > { %v3512_v19 = vpop.f32.mrf.mxu1  ;;  %v3634_v23 = vmax.f32 %v3602_v46, 0.0 }
 0x6f6   : > { %v3600_v24 = vadd.f32 %v6799_v29, %v3564_v47  ;;  %v3633_v34 = vmax.f32 %v3601_v42, 0.0 }
 0x6f8   : > { %4454 = vmatmul.msk.f32.gmra.mxu3 %vm917_vm1, %v3628_v21  ;;  %v2985_v21 = vadd.f32 %v7458_v33, %v2836_v60  ;;  %v3632_v32 = vmax.f32 %v3600_v24, 0.0 }
 0x6fb   : > { %v3101_v10 = vpop.f32.mrf.mxu3 }
 0x6fc   : > { %v6966_v26 = vadd.f32 %v3101_v10, %v2982_v7  ;;  %v3225_v37 = vpop.f32.mrf.mxu2  ;;  %v3370_v53 = vpop.f32.mrf.mxu0 }
 0x6fd   : > { %v3515_v31 = vpop.f32.mrf.mxu1  ;;  %v3279_v27 = vadd.f32 %v3225_v37, %v6896_v45 }
 0x6ff   : > { %v3424_v58 = vadd.f32 %v3370_v53, %v3279_v27 }
 0x700   : > { %4455 = vmatmul.msk.f32.gmra.mxu3 %vm917_vm1, %v3629_v18  ;;  %v3422_v18 = vadd.f32 %v3364_v0, %v3277_v54 }
 0x702   : > { %v3567_v6 = vadd.f32 %v3509_v8, %v3422_v18  ;;  %v3569_v8 = vadd.f32 %v3515_v31, %v3424_v58 }
 0x703   : > { %v3104_v61 = vpop.f32.mrf.mxu3 }
 0x704   : > { %v6974_v55 = vadd.f32 %v3104_v61, %v2983_v56  ;;  %v3228_v62 = vpop.f32.mrf.mxu2  ;;  %v3373_v59 = vpop.f32.mrf.mxu0  ;;  %v3278_v56 = vadd.f32 %v3222_v9, %v6882_v39  ;;  %v3603_v40 = vadd.f32 %v6799_v29, %v3567_v6  ;;  %v3605_v45 = vadd.f32 %v6799_v29, %v3569_v8 }
 0x705   : > { %v3518_v61 = vpop.f32.mrf.mxu1 }
 0x706   : > { %v3423_v48 = vadd.f32 %v3367_v35, %v3278_v56  ;;  %v3637_v24 = vmax.f32 %v3605_v45, 0.0 }
 0x708   : > { %4456 = vmatmul.msk.f32.gmra.mxu3 %vm917_vm1, %v3630_v20  ;;  %v3635_v20 = vmax.f32 %v3603_v40, 0.0  ;;  %v3568_v13 = vadd.f32 %v3512_v19, %v3423_v48 }
 0x70a   : > { %v3604_v39 = vadd.f32 %v6799_v29, %v3568_v13 }
 0x70b   : > { %v3107_v30 = vpop.f32.mrf.mxu3 }
 0x70c   : > { %v6982_v63 = vadd.f32 %v3107_v30, %v2984_v1  ;;  %v3231_v50 = vpop.f32.mrf.mxu2  ;;  %v3376_v0 = vpop.f32.mrf.mxu0  ;;  %v3636_v30 = vmax.f32 %v3604_v39, 0.0 }
 0x70d   : > { %v3521_v1 = vpop.f32.mrf.mxu1 }
 0x710   : > { %4457 = vmatmul.msk.f32.gmra.mxu3 %vm917_vm1, %v3631_v51  ;;  %v3280_v51 = vadd.f32 %v3228_v62, %v6907_v22 }
 0x712   : > { %v3425_v9 = vadd.f32 %v3373_v59, %v3280_v51 }
 0x713   : > { %v3110_v17 = vpop.f32.mrf.mxu3 }
 0x714   : > { %v6990_v2 = vadd.f32 %v3110_v17, %v2985_v21  ;;  %v3234_v60 = vpop.f32.mrf.mxu2  ;;  %v3379_v47 = vpop.f32.mrf.mxu0  ;;  %v3570_v41 = vadd.f32 %v3518_v61, %v3425_v9  ;;  %v3281_v21 = vadd.f32 %v3231_v50, %v6918_v57 }
 0x715   : > { %v3524_v33 = vpop.f32.mrf.mxu1  ;;  %v3282_v38 = vadd.f32 %v3234_v60, %v6929_v11 }
 0x716   : > { %v3606_v22 = vadd.f32 %v6799_v29, %v3570_v41 }
 0x718   : > { %4458 = vmatmul.msk.f32.gmra.mxu3 %vm917_vm1, %v3632_v32  ;;  %v3426_v32 = vadd.f32 %v3376_v0, %v3281_v21  ;;  %v3638_v37 = vmax.f32 %v3606_v22, 0.0 }
 0x71a   : > { %v3571_v42 = vadd.f32 %v3521_v1, %v3426_v32 }
 0x71b   : > { %v3769_v7 = vpop.f32.mrf.mxu3 }
 0x71c   : > { %v3770_v10 = vadd.f32 %v6997_v15, %v3769_v7  ;;  %v3237_v17 = vpop.f32.mrf.mxu2  ;;  %v3382_v4 = vpop.f32.mrf.mxu0  ;;  %v3607_v57 = vadd.f32 %v6799_v29, %v3571_v42  ;;  %v3427_v7 = vadd.f32 %v3379_v47, %v3282_v38 }
 0x71d   : > { %v3527_v53 = vpop.f32.mrf.mxu1  ;;  %v3283_v18 = vadd.f32 %v3237_v17, %v6940_v3 }
 0x71e   : > { %3865 = vxpose.xlu0.b32.start [1/16] (narrow) %v3770_v10, 16  ;;  %v3639_v31 = vmax.f32 %v3607_v57, 0.0  ;;  %v3572_v46 = vadd.f32 %v3524_v33, %v3427_v7 }
 0x720   : > { %4459 = vmatmul.msk.f32.gmra.mxu3 %vm917_vm1, %v3633_v34  ;;  %v3608_v11 = vadd.f32 %v6799_v29, %v3572_v46 }
 0x722   : > { %v3640_v6 = vmax.f32 %v3608_v11, 0.0 }
 0x723   : > { %v3772_v16 = vpop.f32.mrf.mxu3 }
 0x724   : > { %v3773_v43 = vadd.f32 %v6997_v15, %v3772_v16  ;;  %v3240_v34 = vpop.f32.mrf.mxu2  ;;  %v3385_v54 = vpop.f32.mrf.mxu0  ;;  %v3428_v16 = vadd.f32 %v3382_v4, %v3283_v18 }
 0x725   : > { %v3530_v62 = vpop.f32.mrf.mxu1  ;;  %v3284_v48 = vadd.f32 %v3240_v34, %v6950_v12 }
 0x726   : > { %3866 = vxpose.xlu0.b32.cont [2/16] (narrow) %v3773_v43, 16  ;;  %v3573_v56 = vadd.f32 %v3527_v53, %v3428_v16 }
 0x727   : > { %v3429_v61 = vadd.f32 %v3385_v54, %v3284_v48 }
 0x728   : > { %4460 = vmatmul.msk.f32.gmra.mxu3 %vm917_vm1, %v3634_v23  ;;  %v3609_v3 = vadd.f32 %v6799_v29, %v3573_v56 }
 0x729   : > { %v3574_v13 = vadd.f32 %v3530_v62, %v3429_v61 }
 0x72b   : > { %v3775_v5 = vpop.f32.mrf.mxu3  ;;  %v3610_v12 = vadd.f32 %v6799_v29, %v3574_v13 }
 0x72c   : > { %v3776_v28 = vadd.f32 %v6997_v15, %v3775_v5  ;;  %v3243_v23 = vpop.f32.mrf.mxu2  ;;  %v3388_v40 = vpop.f32.mrf.mxu0 }
 0x72d   : > { %v3533_v50 = vpop.f32.mrf.mxu1  ;;  %v3285_v27 = vadd.f32 %v3243_v23, %v6958_v25  ;;  %v3642_v1 = vmax.f32 %v3610_v12, 0.0 }
 0x72e   : > { %3867 = vxpose.xlu0.b32.cont [3/16] (narrow) %v3776_v28, 16 }
 0x72f   : > { %v3430_v58 = vadd.f32 %v3388_v40, %v3285_v27 }
 0x730   : > { %4461 = vmatmul.msk.f32.gmra.mxu3 %vm917_vm1, %v3635_v20  ;;  %v3641_v20 = vmax.f32 %v3609_v3, 0.0 }
 0x733   : > { %v3778_v14 = vpop.f32.mrf.mxu3 }
 0x734   : > { %v3779_v52 = vadd.f32 %v6997_v15, %v3778_v14  ;;  %v3246_v0 = vpop.f32.mrf.mxu2  ;;  %v3391_v39 = vpop.f32.mrf.mxu0 }
 0x735   : > { %v3536_v8 = vpop.f32.mrf.mxu1  ;;  %v3286_v60 = vadd.f32 %v3246_v0, %v6966_v26 }
 0x736   : > { %3868 = vxpose.xlu0.b32.cont [4/16] (narrow) %v3779_v52, 16 }
 0x737   : > { %v3431_v47 = vadd.f32 %v3391_v39, %v3286_v60 }
 0x738   : > { %4462 = vmatmul.msk.f32.gmra.mxu3 %vm917_vm1, %v3636_v30  ;;  %v3575_v30 = vadd.f32 %v3533_v50, %v3430_v58 }
 0x73a   : > { %v3611_v25 = vadd.f32 %v6799_v29, %v3575_v30 }
 0x73b   : > { %v3781_v44 = vpop.f32.mrf.mxu3 }
 0x73c   : > { %v3782_v35 = vadd.f32 %v6997_v15, %v3781_v44  ;;  %v3249_v51 = vpop.f32.mrf.mxu2  ;;  %v3394_v45 = vpop.f32.mrf.mxu0 }
 0x73d   : > { %v3287_v41 = vadd.f32 %v3249_v51, %v6974_v55  ;;  %v3539_v33 = vpop.f32.mrf.mxu1 }
 0x73e   : > { %3869 = vxpose.xlu0.b32.cont [5/16] (narrow) %v3782_v35, 16  ;;  %v3643_v35 = vmax.f32 %v3611_v25, 0.0 }
 0x73f   : > { %v3432_v21 = vadd.f32 %v3394_v45, %v3287_v41 }
 0x740   : > { %4463 = vmatmul.msk.f32.gmra.mxu3 %vm917_vm1, %v3637_v24  ;;  %v3576_v24 = vadd.f32 %v3536_v8, %v3431_v47 }
 0x742   : > { %v3612_v26 = vadd.f32 %v6799_v29, %v3576_v24 }
 0x743   : > { %v3784_v19 = vpop.f32.mrf.mxu3 }
 0x744   : > { %v3785_v49 = vadd.f32 %v6997_v15, %v3784_v19  ;;  %v3252_v17 = vpop.f32.mrf.mxu2  ;;  %v3397_v4 = vpop.f32.mrf.mxu0  ;;  %v3644_v19 = vmax.f32 %v3612_v26, 0.0 }
 0x745   : > { %v3542_v42 = vpop.f32.mrf.mxu1 }
 0x746   : > { %3870 = vxpose.xlu0.b32.cont [6/16] (narrow) %v3785_v49, 16  ;;  %v3577_v49 = vadd.f32 %v3539_v33, %v3432_v21 }
 0x748   : > { %4464 = vmatmul.msk.f32.gmra.mxu3 %vm917_vm1, %v3638_v37  ;;  %v3288_v37 = vadd.f32 %v3252_v17, %v6982_v63  ;;  %v3613_v55 = vadd.f32 %v6799_v29, %v3577_v49 }
 0x74a   : > { %v3433_v38 = vadd.f32 %v3397_v4, %v3288_v37 }
 0x74b   : > { %v3787_v10 = vpop.f32.mrf.mxu3 }
 0x74c   : > { %v3788_v36 = vadd.f32 %v6997_v15, %v3787_v10  ;;  %v3255_v7 = vpop.f32.mrf.mxu2  ;;  %v3645_v10 = vmax.f32 %v3613_v55, 0.0  ;;  %v3578_v34 = vadd.f32 %v3542_v42, %v3433_v38 }
 0x74d   : > { %v3289_v54 = vadd.f32 %v3255_v7, %v6990_v2  ;;  %v3545_v46 = vpop.f32.mrf.mxu1 }
 0x74e   : > { %3871 = vxpose.xlu0.b32.cont [7/16] (narrow) %v3788_v36, 16  ;;  %v3400_v36 = vpop.f32.mrf.mxu0  ;;  %v3614_v63 = vadd.f32 %v6799_v29, %v3578_v34 }
 0x750   : > { %4465 = vmatmul.msk.f32.gmra.mxu3 %vm917_vm1, %v3639_v31  ;;  %v3434_v31 = vadd.f32 %v3400_v36, %v3289_v54  ;;  %v3646_v16 = vmax.f32 %v3614_v63, 0.0 }
 0x752   : > { %v3579_v62 = vadd.f32 %v3545_v46, %v3434_v31 }
 0x753   : > { %v3790_v43 = vpop.f32.mrf.mxu3 }
 0x754   : > { %v3791_v59 = vadd.f32 %v6997_v15, %v3790_v43  ;;  %v3615_v43 = vadd.f32 %v6799_v29, %v3579_v62 }
 0x756   : > { %3872 = vxpose.xlu0.b32.cont [8/16] (narrow) %v3791_v59, 16  ;;  %v3647_v2 = vmax.f32 %v3615_v43, 0.0 }
 0x758   : > { %4466 = vmatmul.msk.f32.gmra.mxu3 %vm917_vm1, %v3640_v6 }
 0x75b   : > { %v3793_v5 = vpop.f32.mrf.mxu3 }
 0x75c   : > { %v3794_v28 = vadd.f32 %v6997_v15, %v3793_v5 }
 0x75e   : > { %3873 = vxpose.xlu0.b32.cont [9/16] (narrow) %v3794_v28, 16 }
 0x760   : > { %4467 = vmatmul.msk.f32.gmra.mxu3 %vm917_vm1, %v3641_v20 }
 0x763   : > { %v3796_v14 = vpop.f32.mrf.mxu3 }
 0x764   : > { %v3797_v52 = vadd.f32 %v6997_v15, %v3796_v14 }
 0x766   : > { %3874 = vxpose.xlu0.b32.cont [10/16] (narrow) %v3797_v52, 16 }
 0x768   : > { %4468 = vmatmul.msk.f32.gmra.mxu3 %vm917_vm1, %v3642_v1 }
 0x76b   : > { %v3799_v9 = vpop.f32.mrf.mxu3 }
 0x76c   : > { %v3800_v44 = vadd.f32 %v6997_v15, %v3799_v9 }
 0x76e   : > { %3875 = vxpose.xlu0.b32.cont [11/16] (narrow) %v3800_v44, 16 }
 0x770   : > { %4469 = vmatmul.msk.f32.gmra.mxu3 %vm917_vm1, %v3643_v35 }
 0x773   : > { %v3802_v22 = vpop.f32.mrf.mxu3 }
 0x774   : > { %v3803_v32 = vadd.f32 %v6997_v15, %v3802_v22 }
 0x776   : > { %3876 = vxpose.xlu0.b32.cont [12/16] (narrow) %v3803_v32, 16 }
 0x778   : > { %4470 = vmatmul.msk.f32.gmra.mxu3 %vm917_vm1, %v3644_v19 }
 0x77b   : > { %v3805_v53 = vpop.f32.mrf.mxu3 }
 0x77c   : > { %v3806_v57 = vadd.f32 %v6997_v15, %v3805_v53 }
 0x77e   : > { %3877 = vxpose.xlu0.b32.cont [13/16] (narrow) %v3806_v57, 16 }
 0x780   : > { %4471 = vmatmul.msk.f32.gmra.mxu3 %vm917_vm1, %v3645_v10 }
 0x783   : > { %v3808_v18 = vpop.f32.mrf.mxu3 }
 0x784   : > { %v3809_v11 = vadd.f32 %v6997_v15, %v3808_v18 }
 0x786   : > { %3878 = vxpose.xlu0.b32.cont [14/16] (narrow) %v3809_v11, 16 }
 0x788   : > { %4472 = vmatmul.msk.f32.gmra.mxu3 %vm917_vm1, %v3646_v16 }
 0x78b   : > { %v3811_v59 = vpop.f32.mrf.mxu3 }
 0x78c   : > { %v3812_v23 = vadd.f32 %v6997_v15, %v3811_v59 }
 0x78e   : > { %3879 = vxpose.xlu0.b32.cont [15/16] (narrow) %v3812_v23, 16 }
 0x790   : > { %4473 = vmatmul.msk.f32.gmra.mxu3 %vm917_vm1, %v3647_v2 }
 0x793   : > { %v3814_v6 = vpop.f32.mrf.mxu3 }
 0x794   : > { %v3815_v56 = vadd.f32 %v6997_v15, %v3814_v6 }
 0x796   : > { %3880 = vxpose.xlu0.b32.end [16/16] (narrow) %v3815_v56, 16 }
 0x79b   : > { %v3817_v40 = vpop.f32.mrf.mxu3 }
 0x79c   : > { %v3818_v48 = vadd.f32 %v6997_v15, %v3817_v40 }
 0x79e   : > { %3897 = vxpose.xlu1.b32.start [1/16] (narrow) %v3818_v48, 16 }
 0x7a3   : > { %v3820_v3 = vpop.f32.mrf.mxu3 }
 0x7a4   : > { %v3821_v61 = vadd.f32 %v6997_v15, %v3820_v3 }
 0x7a6   : > { %3898 = vxpose.xlu1.b32.cont [2/16] (narrow) %v3821_v61, 16 }
 0x7ab   : > { %v3823_v29 = vpop.f32.mrf.mxu3 }
 0x7ac   : > { %v3824_v5 = vadd.f32 %v6997_v15, %v3823_v29 }
 0x7ae   : > { %3899 = vxpose.xlu1.b32.cont [3/16] (narrow) %v3824_v5, 16 }
 0x7b3   : > { %v3826_v28 = vpop.f32.mrf.mxu3 }
 0x7b4   : > { %v3827_v50 = vadd.f32 %v6997_v15, %v3826_v28 }
 0x7b6   : > { %3900 = vxpose.xlu1.b32.cont [4/16] (narrow) %v3827_v50, 16 }
 0x7bb   : > { %v3829_v20 = vpop.f32.mrf.mxu3 }
 0x7bc   : > { %v3830_v13 = vadd.f32 %v6997_v15, %v3829_v20 }
 0x7be   : > { %3901 = vxpose.xlu1.b32.cont [5/16] (narrow) %v3830_v13, 16 }
 0x7c2   : > { %v3881_v21 = vpop.trf.xlu0 }
 0x7c3   : > { %v3832_v0 = vpop.f32.mrf.mxu3  ;;  %3929 = vst [vmem:[%s373_s17] sm:$0xff] %v3881_v21 }
 0x7c4   : > { %v3833_v27 = vadd.f32 %v6997_v15, %v3832_v0 }
 0x7c6   : > { %3902 = vxpose.xlu1.b32.cont [6/16] (narrow) %v3833_v27, 16 }
 0x7ca   : > { %v3882_v17 = vpop.trf.xlu0 }
 0x7cb   : > { %v3835_v39 = vpop.f32.mrf.mxu3  ;;  %3931 = vst [vmem:[%s373_s17 + $0x10] sm:$0x3] %v3882_v17 }
 0x7cc   : > { %v3836_v12 = vadd.f32 %v6997_v15, %v3835_v39 }
 0x7ce   : > { %3903 = vxpose.xlu1.b32.cont [7/16] (narrow) %v3836_v12, 16 }
 0x7d3   : > { %v3838_v58 = vpop.f32.mrf.mxu3 }
 0x7d4   : > { %v3839_v14 = vadd.f32 %v6997_v15, %v3838_v58 }
 0x7d6   : > { %3904 = vxpose.xlu1.b32.cont [8/16] (narrow) %v3839_v14, 16 }
 0x7db   : > { %v3841_v52 = vpop.f32.mrf.mxu3 }
 0x7dc   : > { %v3842_v1 = vadd.f32 %v6997_v15, %v3841_v52 }
 0x7de   : > { %3905 = vxpose.xlu1.b32.cont [9/16] (narrow) %v3842_v1, 16 }
 0x7e3   : > { %v3844_v30 = vpop.f32.mrf.mxu3 }
 0x7e4   : > { %v3845_v8 = vadd.f32 %v6997_v15, %v3844_v30 }
 0x7e6   : > { %3906 = vxpose.xlu1.b32.cont [10/16] (narrow) %v3845_v8, 16 }
 0x7eb   : > { %v3847_v60 = vpop.f32.mrf.mxu3 }
 0x7ec   : > { %v3848_v51 = vadd.f32 %v6997_v15, %v3847_v60 }
 0x7ee   : > { %3907 = vxpose.xlu1.b32.cont [11/16] (narrow) %v3848_v51, 16 }
 0x7f3   : > { %v3850_v25 = vpop.f32.mrf.mxu3 }
 0x7f4   : > { %v3851_v47 = vadd.f32 %v6997_v15, %v3850_v25 }
 0x7f6   : > { %3908 = vxpose.xlu1.b32.cont [12/16] (narrow) %v3851_v47, 16 }
 0x7fb   : > { %v3853_v45 = vpop.f32.mrf.mxu3 }
 0x7fc   : > { %v3854_v9 = vadd.f32 %v6997_v15, %v3853_v45 }
 0x7fe   : > { %3909 = vxpose.xlu1.b32.cont [13/16] (narrow) %v3854_v9, 16 }
 0x803   : > { %v3856_v44 = vpop.f32.mrf.mxu3 }
 0x804   : > { %v3857_v35 = vadd.f32 %v6997_v15, %v3856_v44 }
 0x806   : > { %3910 = vxpose.xlu1.b32.cont [14/16] (narrow) %v3857_v35, 16 }
 0x80b   : > { %v3859_v24 = vpop.f32.mrf.mxu3 }
 0x80c   : > { %v3860_v41 = vadd.f32 %v6997_v15, %v3859_v24 }
 0x80e   : > { %3911 = vxpose.xlu1.b32.cont [15/16] (narrow) %v3860_v41, 16 }
 0x813   : > { %v3862_v33 = vpop.f32.mrf.mxu3 }
 0x814   : > { %v3863_v26 = vadd.f32 %v6997_v15, %v3862_v33 }
 0x816   : > { %3912 = vxpose.xlu1.b32.end [16/16] (narrow) %v3863_v26, 16 }
 0x842   : > { %v3913_v22 = vpop.trf.xlu1 }
 0x843   : > { %3930 = vst [vmem:[%s373_s17 + $0x8] sm:$0xff] %v3913_v22 }
 0x84a   : > { %v3914_v32 = vpop.trf.xlu1 }
 0x84b   : > { %3932 = vst [vmem:[%s373_s17 + $0x18] sm:$0x3] %v3914_v32 }
 0x84c PF: > { %s20_s13 = sadd.s32 1, %s4507_s13  }
 0x84d   : > { %p17_p4 = scmp.ge.s32.totalorder %s20_s13, 4  }
 0x84f   :  { %19 = sbr.rel (!%p17_p4) target bundleno = 1 (0x1), region = 93 }

</bundles_post_ra>
